<compile_context>
chip_gen: v5e
topology: v5e:2x2
jax: 0.10.0
libtpu: 0.0.40
codegen_flags: <defaults>
</compile_context>

<pallas_src>
import functools

import jax
import jax.numpy as jnp
from jax.experimental import pallas as pl
from jax.experimental.pallas import tpu as pltpu


def _routing_kernel(x_ref, w_ref, o_ref, *, num_iters):
    """One batch tile, ALL output capsules, full routing loop fused in one grid step.

    x_ref: (batch_tile, D_in, R)      input capsules (R on lanes), read once per tile
    w_ref: (C, D_in, D_out, R)        full weight slab, VMEM-resident (constant index_map)
    o_ref: (batch_tile, C * D_out)    lane-dense output slab
    """
    x = x_ref[...]                                               # (bt, D_in, R)
    bt, d_in, r = x.shape
    num_caps, _, d_out, _ = w_ref.shape
    inv_r = jnp.float32(1.0 / r)

    def squash_scale(s):
        # squash scale = sqrt(||s||^2) / (1 + ||s||^2), norm over out_channels (sublanes).
        # eps guards the 0/0 case: near-zero capsules squash to ~0 instead of NaN.
        sq = jnp.sum(s * s, axis=1, keepdims=True)               # (bt, 1, 1)
        return sq * jax.lax.rsqrt(sq + 1e-12) * pl.reciprocal(1.0 + sq, approx=False)

    outs = []
    for c in range(num_caps):                                    # C is small & static
        # Prediction vectors: x_hat[b,e,r] = sum_d x[b,d,r] * W[c,d,e,r].
        # D_in is tiny -> unrolled VPU MACs; weight rows streamed straight from the ref.
        x_hat = x[:, 0:1, :] * w_ref[c, 0]                       # (bt, D_out, R)
        for d in range(1, d_in):
            x_hat = x_hat + x[:, d:d + 1, :] * w_ref[c, d]

        # --- routing iteration 0: logits are all zero => coupling is exactly 1/R,
        # so skip the first softmax entirely (constant scale after the lane reduce).
        s = jnp.sum(x_hat, axis=-1, keepdims=True) * inv_r       # (bt, D_out, 1)
        v = s * squash_scale(s)

        # --- remaining routing iterations (small static count -> unrolled).
        b_logits = jnp.zeros((bt, 1, r), jnp.float32)
        for _ in range(1, num_iters):
            # agreement <x_hat, v>: sublane reduction over out_channels
            b_logits = b_logits + jnp.sum(x_hat * v, axis=1, keepdims=True)
            # softmax over routing nodes (lane reduction); normalize via EUP reciprocal
            m = jnp.max(b_logits, axis=-1, keepdims=True)
            e = jnp.exp(b_logits - m)
            coup = e * pl.reciprocal(jnp.sum(e, axis=-1, keepdims=True), approx=False)
            # weighted sum of predictions (lane reduction), then squash
            s = jnp.sum(x_hat * coup, axis=-1, keepdims=True)    # (bt, D_out, 1)
            v = s * squash_scale(s)

        # relayout (bt, D_out, 1) -> lane-major (bt, D_out) so the store is lane-dense
        outs.append(jnp.reshape(v, (bt, d_out)))

    # single lane-dense (bt, C*D_out) store
    o_ref[...] = jnp.concatenate(outs, axis=-1).astype(o_ref.dtype)


def prepare_weights(weights):
    """One-time (parameter-init-time) layout prep: (C, R, D_in, D_out) -> (C, D_in, D_out, R) f32.

    Call this once when the module is constructed, not on every forward.
    """
    return jnp.transpose(weights, (0, 2, 3, 1)).astype(jnp.float32)


def intermediate_caps_layer(x, weights_prepared, routing_iterations=3, batch_tile=None):
    """Forward pass of IntermediateCapsLayer.

    x:                (B, R, D_in)          input capsule vectors (R = routing_nodes)
    weights_prepared: (C, D_in, D_out, R)   from prepare_weights()
    returns:          (C, B, 1, 1, D_out)   squashed output capsules (matches the module)
    """
    B, R, D_in = x.shape
    C, D_in_w, D_out, R_w = weights_prepared.shape
    assert (R, D_in) == (R_w, D_in_w), (x.shape, weights_prepared.shape)
    assert routing_iterations >= 1

    if batch_tile is None:
        batch_tile = 8 if (B % 8 == 0) else B                    # keep vreg pressure low
    batch_tile = min(batch_tile, B)
    assert B % batch_tile == 0, "batch must be divisible by batch_tile"
    n_bt = B // batch_tile

    # Lane-dense activation layout: routing-node axis R last (-> lanes).
    x_t = jnp.transpose(x, (0, 2, 1)).astype(jnp.float32)        # (B, D_in, R)

    kernel = functools.partial(_routing_kernel, num_iters=routing_iterations)
    out = pl.pallas_call(
        kernel,
        out_shape=jax.ShapeDtypeStruct((B, C * D_out), jnp.float32),
        grid_spec=pltpu.PrefetchScalarGridSpec(
            num_scalar_prefetch=0,
            grid=(n_bt,),
            in_specs=[
                # one x tile per grid step -> x read from HBM exactly once
                pl.BlockSpec((batch_tile, D_in, R), lambda bt: (bt, 0, 0)),
                # full weight slab, constant index_map -> fetched once, kept VMEM-resident
                pl.BlockSpec((C, D_in, D_out, R), lambda bt: (0, 0, 0, 0)),
            ],
            out_specs=pl.BlockSpec((batch_tile, C * D_out), lambda bt: (bt, 0)),
        ),
        compiler_params=pltpu.CompilerParams(dimension_semantics=("parallel",)),
    )(x_t, weights_prepared)                                     # (B, C*D_out)

    # tiny host-side layout fixup to the module's (C, B, 1, 1, D_out) output
    out = out.reshape(B, C, D_out).transpose(1, 0, 2)            # (C, B, D_out)
    return out.reshape(C, B, 1, 1, D_out)


def _reference(x, weights, routing_iterations=3):
    """Pure-JAX mirror of the PyTorch module (f32 throughout)."""
    x_hat = jnp.einsum("brd,crde->cbre", x, weights,
                       precision=jax.lax.Precision.HIGHEST)      # (C, B, R, D_out)
    b = jnp.zeros(x_hat.shape, x_hat.dtype)
    outputs = None
    for i in range(routing_iterations):
        c = jax.nn.softmax(b, axis=2)                            # over routing nodes
        s = jnp.sum(x_hat * c, axis=2, keepdims=True)            # (C, B, 1, D_out)
        sq = jnp.sum(s * s, axis=-1, keepdims=True)
        outputs = sq / (1.0 + sq) * s / jnp.sqrt(sq)             # standard squash
        if i != routing_iterations - 1:
            b = b + jnp.sum(x_hat * outputs, axis=-1, keepdims=True)
    return outputs[:, :, None, :, :]                             # (C, B, 1, 1, D_out)


if __name__ == "__main__":
    # Small shapes consistent with the module: 4 output capsules routed from 128
    # primary-capsule nodes (dim 8) to output vectors of dim 16, batch 2, 3 iterations.
    B, C, R, D_in, D_out = 2, 4, 128, 8, 16
    routing_iterations = 3

    key = jax.random.PRNGKey(0)
    kx, kw = jax.random.split(key)
    x = 0.3 * jax.random.normal(kx, (B, R, D_in), dtype=jnp.float32)
    weights = jax.random.normal(kw, (C, R, D_in, D_out), dtype=jnp.float32)

    w_prep = prepare_weights(weights)            # one-time, init-style layout prep
    out = intermediate_caps_layer(x, w_prep, routing_iterations)
    out = jax.block_until_ready(out)

    ref = _reference(x, weights, routing_iterations)
    assert out.shape == ref.shape == (C, B, 1, 1, D_out), (out.shape, ref.shape)
    assert jnp.allclose(out, ref, atol=1e-4, rtol=1e-4), float(
        jnp.max(jnp.abs(out - ref)))

    print("KERNEL_OK")
</pallas_src>

<mosaic_0001>
module attributes {stable_mosaic.version = 11 : i64} {
  func.func @_routing_kernel(%arg0: i32, %arg1: memref<2x8x128xf32, #tpu.memory_space<vmem>>, %arg2: memref<4x8x16x128xf32, #tpu.memory_space<vmem>>, %arg3: memref<2x64xf32, #tpu.memory_space<vmem>>) attributes {dimension_semantics = [#tpu.dimension_semantics<parallel>], iteration_bounds = array<i64: 1>, scalar_prefetch = 0 : i64, scratch_operands = 0 : i64, tpu.core_type = #tpu.core_type<tc>, window_params = [{transform_indices = @transform_0, window_bounds = array<i64: 2, 8, 128>}, {pipeline_mode = #tpu.pipeline_mode<synchronous>, transform_indices = @transform_1, window_bounds = array<i64: 4, 8, 16, 128>}, {transform_indices = @transform_2, window_bounds = array<i64: 2, 64>}]} {
    %c0 = arith.constant 0 : index
    %c0_0 = arith.constant 0 : index
    %c0_1 = arith.constant 0 : index
    %0 = vector.load %arg1[%c0, %c0_0, %c0_1] : memref<2x8x128xf32, #tpu.memory_space<vmem>>, vector<2x8x128xf32>
    %1 = vector.extract_strided_slice %0 {offsets = [0, 0, 0], sizes = [2, 1, 128], strides = [1, 1, 1]} : vector<2x8x128xf32> to vector<2x1x128xf32>
    %c0_2 = arith.constant 0 : index
    %c0_3 = arith.constant 0 : index
    %c0_4 = arith.constant 0 : index
    %c0_5 = arith.constant 0 : index
    %2 = vector.load %arg2[%c0_2, %c0_3, %c0_4, %c0_5] : memref<4x8x16x128xf32, #tpu.memory_space<vmem>>, vector<1x1x16x128xf32>
    %3 = vector.shape_cast %2 : vector<1x1x16x128xf32> to vector<16x128xf32>
    %4 = vector.shape_cast %3 : vector<16x128xf32> to vector<1x16x128xf32>
    %5 = vector.broadcast %1 : vector<2x1x128xf32> to vector<2x16x128xf32>
    %6 = vector.broadcast %4 : vector<1x16x128xf32> to vector<2x16x128xf32>
    %7 = arith.mulf %5, %6 : vector<2x16x128xf32>
    %8 = vector.extract_strided_slice %0 {offsets = [0, 1, 0], sizes = [2, 1, 128], strides = [1, 1, 1]} : vector<2x8x128xf32> to vector<2x1x128xf32>
    %c0_6 = arith.constant 0 : index
    %c1 = arith.constant 1 : index
    %c0_7 = arith.constant 0 : index
    %c0_8 = arith.constant 0 : index
    %9 = vector.load %arg2[%c0_6, %c1, %c0_7, %c0_8] : memref<4x8x16x128xf32, #tpu.memory_space<vmem>>, vector<1x1x16x128xf32>
    %10 = vector.shape_cast %9 : vector<1x1x16x128xf32> to vector<16x128xf32>
    %11 = vector.shape_cast %10 : vector<16x128xf32> to vector<1x16x128xf32>
    %12 = vector.broadcast %8 : vector<2x1x128xf32> to vector<2x16x128xf32>
    %13 = vector.broadcast %11 : vector<1x16x128xf32> to vector<2x16x128xf32>
    %14 = arith.mulf %12, %13 : vector<2x16x128xf32>
    %15 = arith.addf %7, %14 : vector<2x16x128xf32>
    %16 = vector.extract_strided_slice %0 {offsets = [0, 2, 0], sizes = [2, 1, 128], strides = [1, 1, 1]} : vector<2x8x128xf32> to vector<2x1x128xf32>
    %c0_9 = arith.constant 0 : index
    %c2 = arith.constant 2 : index
    %c0_10 = arith.constant 0 : index
    %c0_11 = arith.constant 0 : index
    %17 = vector.load %arg2[%c0_9, %c2, %c0_10, %c0_11] : memref<4x8x16x128xf32, #tpu.memory_space<vmem>>, vector<1x1x16x128xf32>
    %18 = vector.shape_cast %17 : vector<1x1x16x128xf32> to vector<16x128xf32>
    %19 = vector.shape_cast %18 : vector<16x128xf32> to vector<1x16x128xf32>
    %20 = vector.broadcast %16 : vector<2x1x128xf32> to vector<2x16x128xf32>
    %21 = vector.broadcast %19 : vector<1x16x128xf32> to vector<2x16x128xf32>
    %22 = arith.mulf %20, %21 : vector<2x16x128xf32>
    %23 = arith.addf %15, %22 : vector<2x16x128xf32>
    %24 = vector.extract_strided_slice %0 {offsets = [0, 3, 0], sizes = [2, 1, 128], strides = [1, 1, 1]} : vector<2x8x128xf32> to vector<2x1x128xf32>
    %c0_12 = arith.constant 0 : index
    %c3 = arith.constant 3 : index
    %c0_13 = arith.constant 0 : index
    %c0_14 = arith.constant 0 : index
    %25 = vector.load %arg2[%c0_12, %c3, %c0_13, %c0_14] : memref<4x8x16x128xf32, #tpu.memory_space<vmem>>, vector<1x1x16x128xf32>
    %26 = vector.shape_cast %25 : vector<1x1x16x128xf32> to vector<16x128xf32>
    %27 = vector.shape_cast %26 : vector<16x128xf32> to vector<1x16x128xf32>
    %28 = vector.broadcast %24 : vector<2x1x128xf32> to vector<2x16x128xf32>
    %29 = vector.broadcast %27 : vector<1x16x128xf32> to vector<2x16x128xf32>
    %30 = arith.mulf %28, %29 : vector<2x16x128xf32>
    %31 = arith.addf %23, %30 : vector<2x16x128xf32>
    %32 = vector.extract_strided_slice %0 {offsets = [0, 4, 0], sizes = [2, 1, 128], strides = [1, 1, 1]} : vector<2x8x128xf32> to vector<2x1x128xf32>
    %c0_15 = arith.constant 0 : index
    %c4 = arith.constant 4 : index
    %c0_16 = arith.constant 0 : index
    %c0_17 = arith.constant 0 : index
    %33 = vector.load %arg2[%c0_15, %c4, %c0_16, %c0_17] : memref<4x8x16x128xf32, #tpu.memory_space<vmem>>, vector<1x1x16x128xf32>
    %34 = vector.shape_cast %33 : vector<1x1x16x128xf32> to vector<16x128xf32>
    %35 = vector.shape_cast %34 : vector<16x128xf32> to vector<1x16x128xf32>
    %36 = vector.broadcast %32 : vector<2x1x128xf32> to vector<2x16x128xf32>
    %37 = vector.broadcast %35 : vector<1x16x128xf32> to vector<2x16x128xf32>
    %38 = arith.mulf %36, %37 : vector<2x16x128xf32>
    %39 = arith.addf %31, %38 : vector<2x16x128xf32>
    %40 = vector.extract_strided_slice %0 {offsets = [0, 5, 0], sizes = [2, 1, 128], strides = [1, 1, 1]} : vector<2x8x128xf32> to vector<2x1x128xf32>
    %c0_18 = arith.constant 0 : index
    %c5 = arith.constant 5 : index
    %c0_19 = arith.constant 0 : index
    %c0_20 = arith.constant 0 : index
    %41 = vector.load %arg2[%c0_18, %c5, %c0_19, %c0_20] : memref<4x8x16x128xf32, #tpu.memory_space<vmem>>, vector<1x1x16x128xf32>
    %42 = vector.shape_cast %41 : vector<1x1x16x128xf32> to vector<16x128xf32>
    %43 = vector.shape_cast %42 : vector<16x128xf32> to vector<1x16x128xf32>
    %44 = vector.broadcast %40 : vector<2x1x128xf32> to vector<2x16x128xf32>
    %45 = vector.broadcast %43 : vector<1x16x128xf32> to vector<2x16x128xf32>
    %46 = arith.mulf %44, %45 : vector<2x16x128xf32>
    %47 = arith.addf %39, %46 : vector<2x16x128xf32>
    %48 = vector.extract_strided_slice %0 {offsets = [0, 6, 0], sizes = [2, 1, 128], strides = [1, 1, 1]} : vector<2x8x128xf32> to vector<2x1x128xf32>
    %c0_21 = arith.constant 0 : index
    %c6 = arith.constant 6 : index
    %c0_22 = arith.constant 0 : index
    %c0_23 = arith.constant 0 : index
    %49 = vector.load %arg2[%c0_21, %c6, %c0_22, %c0_23] : memref<4x8x16x128xf32, #tpu.memory_space<vmem>>, vector<1x1x16x128xf32>
    %50 = vector.shape_cast %49 : vector<1x1x16x128xf32> to vector<16x128xf32>
    %51 = vector.shape_cast %50 : vector<16x128xf32> to vector<1x16x128xf32>
    %52 = vector.broadcast %48 : vector<2x1x128xf32> to vector<2x16x128xf32>
    %53 = vector.broadcast %51 : vector<1x16x128xf32> to vector<2x16x128xf32>
    %54 = arith.mulf %52, %53 : vector<2x16x128xf32>
    %55 = arith.addf %47, %54 : vector<2x16x128xf32>
    %56 = vector.extract_strided_slice %0 {offsets = [0, 7, 0], sizes = [2, 1, 128], strides = [1, 1, 1]} : vector<2x8x128xf32> to vector<2x1x128xf32>
    %c0_24 = arith.constant 0 : index
    %c7 = arith.constant 7 : index
    %c0_25 = arith.constant 0 : index
    %c0_26 = arith.constant 0 : index
    %57 = vector.load %arg2[%c0_24, %c7, %c0_25, %c0_26] : memref<4x8x16x128xf32, #tpu.memory_space<vmem>>, vector<1x1x16x128xf32>
    %58 = vector.shape_cast %57 : vector<1x1x16x128xf32> to vector<16x128xf32>
    %59 = vector.shape_cast %58 : vector<16x128xf32> to vector<1x16x128xf32>
    %60 = vector.broadcast %56 : vector<2x1x128xf32> to vector<2x16x128xf32>
    %61 = vector.broadcast %59 : vector<1x16x128xf32> to vector<2x16x128xf32>
    %62 = arith.mulf %60, %61 : vector<2x16x128xf32>
    %63 = arith.addf %55, %62 : vector<2x16x128xf32>
    %cst = arith.constant dense<0.000000e+00> : vector<2x16xf32>
    %64 = vector.multi_reduction <add>, %63, %cst [2] : vector<2x16x128xf32> to vector<2x16xf32>
    %65 = vector.shape_cast %64 : vector<2x16xf32> to vector<2x16x1xf32>
    %cst_27 = arith.constant 7.812500e-03 : f32
    %66 = vector.broadcast %cst_27 : f32 to vector<2x16x1xf32>
    %67 = arith.mulf %65, %66 : vector<2x16x1xf32>
    %68 = arith.mulf %67, %67 : vector<2x16x1xf32>
    %cst_28 = arith.constant dense<0.000000e+00> : vector<2x1xf32>
    %69 = vector.multi_reduction <add>, %68, %cst_28 [1] : vector<2x16x1xf32> to vector<2x1xf32>
    %70 = vector.shape_cast %69 : vector<2x1xf32> to vector<2x1x1xf32>
    %cst_29 = arith.constant 9.99999996E-13 : f32
    %71 = vector.broadcast %cst_29 : f32 to vector<2x1x1xf32>
    %72 = arith.addf %70, %71 : vector<2x1x1xf32>
    %73 = math.rsqrt %72 : vector<2x1x1xf32>
    %74 = arith.mulf %70, %73 : vector<2x1x1xf32>
    %cst_30 = arith.constant 1.000000e+00 : f32
    %75 = vector.broadcast %cst_30 : f32 to vector<2x1x1xf32>
    %76 = arith.addf %75, %70 : vector<2x1x1xf32>
    %77 = tpu.reciprocal %76 : vector<2x1x1xf32> -> vector<2x1x1xf32>
    %78 = arith.mulf %74, %77 : vector<2x1x1xf32>
    %79 = vector.broadcast %78 : vector<2x1x1xf32> to vector<2x16x1xf32>
    %80 = arith.mulf %67, %79 : vector<2x16x1xf32>
    %cst_31 = arith.constant 0.000000e+00 : f32
    %81 = vector.broadcast %cst_31 : f32 to vector<2x1x128xf32>
    %82 = vector.broadcast %80 : vector<2x16x1xf32> to vector<2x16x128xf32>
    %83 = arith.mulf %63, %82 : vector<2x16x128xf32>
    %cst_32 = arith.constant dense<0.000000e+00> : vector<2x128xf32>
    %84 = vector.multi_reduction <add>, %83, %cst_32 [1] : vector<2x16x128xf32> to vector<2x128xf32>
    %85 = vector.shape_cast %84 : vector<2x128xf32> to vector<2x1x128xf32>
    %86 = arith.addf %81, %85 : vector<2x1x128xf32>
    %cst_33 = arith.constant dense<0xFF800000> : vector<2x1xf32>
    %87 = vector.multi_reduction <maximumf>, %86, %cst_33 [2] : vector<2x1x128xf32> to vector<2x1xf32>
    %88 = vector.shape_cast %87 : vector<2x1xf32> to vector<2x1x1xf32>
    %89 = vector.broadcast %88 : vector<2x1x1xf32> to vector<2x1x128xf32>
    %90 = arith.subf %86, %89 : vector<2x1x128xf32>
    %91 = math.exp %90 : vector<2x1x128xf32>
    %cst_34 = arith.constant dense<0.000000e+00> : vector<2x1xf32>
    %92 = vector.multi_reduction <add>, %91, %cst_34 [2] : vector<2x1x128xf32> to vector<2x1xf32>
    %93 = vector.shape_cast %92 : vector<2x1xf32> to vector<2x1x1xf32>
    %94 = tpu.reciprocal %93 : vector<2x1x1xf32> -> vector<2x1x1xf32>
    %95 = vector.broadcast %94 : vector<2x1x1xf32> to vector<2x1x128xf32>
    %96 = arith.mulf %91, %95 : vector<2x1x128xf32>
    %97 = vector.broadcast %96 : vector<2x1x128xf32> to vector<2x16x128xf32>
    %98 = arith.mulf %63, %97 : vector<2x16x128xf32>
    %cst_35 = arith.constant dense<0.000000e+00> : vector<2x16xf32>
    %99 = vector.multi_reduction <add>, %98, %cst_35 [2] : vector<2x16x128xf32> to vector<2x16xf32>
    %100 = vector.shape_cast %99 : vector<2x16xf32> to vector<2x16x1xf32>
    %101 = arith.mulf %100, %100 : vector<2x16x1xf32>
    %cst_36 = arith.constant dense<0.000000e+00> : vector<2x1xf32>
    %102 = vector.multi_reduction <add>, %101, %cst_36 [1] : vector<2x16x1xf32> to vector<2x1xf32>
    %103 = vector.shape_cast %102 : vector<2x1xf32> to vector<2x1x1xf32>
    %cst_37 = arith.constant 9.99999996E-13 : f32
    %104 = vector.broadcast %cst_37 : f32 to vector<2x1x1xf32>
    %105 = arith.addf %103, %104 : vector<2x1x1xf32>
    %106 = math.rsqrt %105 : vector<2x1x1xf32>
    %107 = arith.mulf %103, %106 : vector<2x1x1xf32>
    %cst_38 = arith.constant 1.000000e+00 : f32
    %108 = vector.broadcast %cst_38 : f32 to vector<2x1x1xf32>
    %109 = arith.addf %108, %103 : vector<2x1x1xf32>
    %110 = tpu.reciprocal %109 : vector<2x1x1xf32> -> vector<2x1x1xf32>
    %111 = arith.mulf %107, %110 : vector<2x1x1xf32>
    %112 = vector.broadcast %111 : vector<2x1x1xf32> to vector<2x16x1xf32>
    %113 = arith.mulf %100, %112 : vector<2x16x1xf32>
    %114 = vector.broadcast %113 : vector<2x16x1xf32> to vector<2x16x128xf32>
    %115 = arith.mulf %63, %114 : vector<2x16x128xf32>
    %cst_39 = arith.constant dense<0.000000e+00> : vector<2x128xf32>
    %116 = vector.multi_reduction <add>, %115, %cst_39 [1] : vector<2x16x128xf32> to vector<2x128xf32>
    %117 = vector.shape_cast %116 : vector<2x128xf32> to vector<2x1x128xf32>
    %118 = arith.addf %86, %117 : vector<2x1x128xf32>
    %cst_40 = arith.constant dense<0xFF800000> : vector<2x1xf32>
    %119 = vector.multi_reduction <maximumf>, %118, %cst_40 [2] : vector<2x1x128xf32> to vector<2x1xf32>
    %120 = vector.shape_cast %119 : vector<2x1xf32> to vector<2x1x1xf32>
    %121 = vector.broadcast %120 : vector<2x1x1xf32> to vector<2x1x128xf32>
    %122 = arith.subf %118, %121 : vector<2x1x128xf32>
    %123 = math.exp %122 : vector<2x1x128xf32>
    %cst_41 = arith.constant dense<0.000000e+00> : vector<2x1xf32>
    %124 = vector.multi_reduction <add>, %123, %cst_41 [2] : vector<2x1x128xf32> to vector<2x1xf32>
    %125 = vector.shape_cast %124 : vector<2x1xf32> to vector<2x1x1xf32>
    %126 = tpu.reciprocal %125 : vector<2x1x1xf32> -> vector<2x1x1xf32>
    %127 = vector.broadcast %126 : vector<2x1x1xf32> to vector<2x1x128xf32>
    %128 = arith.mulf %123, %127 : vector<2x1x128xf32>
    %129 = vector.broadcast %128 : vector<2x1x128xf32> to vector<2x16x128xf32>
    %130 = arith.mulf %63, %129 : vector<2x16x128xf32>
    %cst_42 = arith.constant dense<0.000000e+00> : vector<2x16xf32>
    %131 = vector.multi_reduction <add>, %130, %cst_42 [2] : vector<2x16x128xf32> to vector<2x16xf32>
    %132 = vector.shape_cast %131 : vector<2x16xf32> to vector<2x16x1xf32>
    %133 = arith.mulf %132, %132 : vector<2x16x1xf32>
    %cst_43 = arith.constant dense<0.000000e+00> : vector<2x1xf32>
    %134 = vector.multi_reduction <add>, %133, %cst_43 [1] : vector<2x16x1xf32> to vector<2x1xf32>
    %135 = vector.shape_cast %134 : vector<2x1xf32> to vector<2x1x1xf32>
    %cst_44 = arith.constant 9.99999996E-13 : f32
    %136 = vector.broadcast %cst_44 : f32 to vector<2x1x1xf32>
    %137 = arith.addf %135, %136 : vector<2x1x1xf32>
    %138 = math.rsqrt %137 : vector<2x1x1xf32>
    %139 = arith.mulf %135, %138 : vector<2x1x1xf32>
    %cst_45 = arith.constant 1.000000e+00 : f32
    %140 = vector.broadcast %cst_45 : f32 to vector<2x1x1xf32>
    %141 = arith.addf %140, %135 : vector<2x1x1xf32>
    %142 = tpu.reciprocal %141 : vector<2x1x1xf32> -> vector<2x1x1xf32>
    %143 = arith.mulf %139, %142 : vector<2x1x1xf32>
    %144 = vector.broadcast %143 : vector<2x1x1xf32> to vector<2x16x1xf32>
    %145 = arith.mulf %132, %144 : vector<2x16x1xf32>
    %146 = vector.shape_cast %145 : vector<2x16x1xf32> to vector<2x16xf32>
    %147 = vector.extract_strided_slice %0 {offsets = [0, 0, 0], sizes = [2, 1, 128], strides = [1, 1, 1]} : vector<2x8x128xf32> to vector<2x1x128xf32>
    %c1_46 = arith.constant 1 : index
    %c0_47 = arith.constant 0 : index
    %c0_48 = arith.constant 0 : index
    %c0_49 = arith.constant 0 : index
    %148 = vector.load %arg2[%c1_46, %c0_47, %c0_48, %c0_49] : memref<4x8x16x128xf32, #tpu.memory_space<vmem>>, vector<1x1x16x128xf32>
    %149 = vector.shape_cast %148 : vector<1x1x16x128xf32> to vector<16x128xf32>
    %150 = vector.shape_cast %149 : vector<16x128xf32> to vector<1x16x128xf32>
    %151 = vector.broadcast %147 : vector<2x1x128xf32> to vector<2x16x128xf32>
    %152 = vector.broadcast %150 : vector<1x16x128xf32> to vector<2x16x128xf32>
    %153 = arith.mulf %151, %152 : vector<2x16x128xf32>
    %154 = vector.extract_strided_slice %0 {offsets = [0, 1, 0], sizes = [2, 1, 128], strides = [1, 1, 1]} : vector<2x8x128xf32> to vector<2x1x128xf32>
    %c1_50 = arith.constant 1 : index
    %c1_51 = arith.constant 1 : index
    %c0_52 = arith.constant 0 : index
    %c0_53 = arith.constant 0 : index
    %155 = vector.load %arg2[%c1_50, %c1_51, %c0_52, %c0_53] : memref<4x8x16x128xf32, #tpu.memory_space<vmem>>, vector<1x1x16x128xf32>
    %156 = vector.shape_cast %155 : vector<1x1x16x128xf32> to vector<16x128xf32>
    %157 = vector.shape_cast %156 : vector<16x128xf32> to vector<1x16x128xf32>
    %158 = vector.broadcast %154 : vector<2x1x128xf32> to vector<2x16x128xf32>
    %159 = vector.broadcast %157 : vector<1x16x128xf32> to vector<2x16x128xf32>
    %160 = arith.mulf %158, %159 : vector<2x16x128xf32>
    %161 = arith.addf %153, %160 : vector<2x16x128xf32>
    %162 = vector.extract_strided_slice %0 {offsets = [0, 2, 0], sizes = [2, 1, 128], strides = [1, 1, 1]} : vector<2x8x128xf32> to vector<2x1x128xf32>
    %c1_54 = arith.constant 1 : index
    %c2_55 = arith.constant 2 : index
    %c0_56 = arith.constant 0 : index
    %c0_57 = arith.constant 0 : index
    %163 = vector.load %arg2[%c1_54, %c2_55, %c0_56, %c0_57] : memref<4x8x16x128xf32, #tpu.memory_space<vmem>>, vector<1x1x16x128xf32>
    %164 = vector.shape_cast %163 : vector<1x1x16x128xf32> to vector<16x128xf32>
    %165 = vector.shape_cast %164 : vector<16x128xf32> to vector<1x16x128xf32>
    %166 = vector.broadcast %162 : vector<2x1x128xf32> to vector<2x16x128xf32>
    %167 = vector.broadcast %165 : vector<1x16x128xf32> to vector<2x16x128xf32>
    %168 = arith.mulf %166, %167 : vector<2x16x128xf32>
    %169 = arith.addf %161, %168 : vector<2x16x128xf32>
    %170 = vector.extract_strided_slice %0 {offsets = [0, 3, 0], sizes = [2, 1, 128], strides = [1, 1, 1]} : vector<2x8x128xf32> to vector<2x1x128xf32>
    %c1_58 = arith.constant 1 : index
    %c3_59 = arith.constant 3 : index
    %c0_60 = arith.constant 0 : index
    %c0_61 = arith.constant 0 : index
    %171 = vector.load %arg2[%c1_58, %c3_59, %c0_60, %c0_61] : memref<4x8x16x128xf32, #tpu.memory_space<vmem>>, vector<1x1x16x128xf32>
    %172 = vector.shape_cast %171 : vector<1x1x16x128xf32> to vector<16x128xf32>
    %173 = vector.shape_cast %172 : vector<16x128xf32> to vector<1x16x128xf32>
    %174 = vector.broadcast %170 : vector<2x1x128xf32> to vector<2x16x128xf32>
    %175 = vector.broadcast %173 : vector<1x16x128xf32> to vector<2x16x128xf32>
    %176 = arith.mulf %174, %175 : vector<2x16x128xf32>
    %177 = arith.addf %169, %176 : vector<2x16x128xf32>
    %178 = vector.extract_strided_slice %0 {offsets = [0, 4, 0], sizes = [2, 1, 128], strides = [1, 1, 1]} : vector<2x8x128xf32> to vector<2x1x128xf32>
    %c1_62 = arith.constant 1 : index
    %c4_63 = arith.constant 4 : index
    %c0_64 = arith.constant 0 : index
    %c0_65 = arith.constant 0 : index
    %179 = vector.load %arg2[%c1_62, %c4_63, %c0_64, %c0_65] : memref<4x8x16x128xf32, #tpu.memory_space<vmem>>, vector<1x1x16x128xf32>
    %180 = vector.shape_cast %179 : vector<1x1x16x128xf32> to vector<16x128xf32>
    %181 = vector.shape_cast %180 : vector<16x128xf32> to vector<1x16x128xf32>
    %182 = vector.broadcast %178 : vector<2x1x128xf32> to vector<2x16x128xf32>
    %183 = vector.broadcast %181 : vector<1x16x128xf32> to vector<2x16x128xf32>
    %184 = arith.mulf %182, %183 : vector<2x16x128xf32>
    %185 = arith.addf %177, %184 : vector<2x16x128xf32>
    %186 = vector.extract_strided_slice %0 {offsets = [0, 5, 0], sizes = [2, 1, 128], strides = [1, 1, 1]} : vector<2x8x128xf32> to vector<2x1x128xf32>
    %c1_66 = arith.constant 1 : index
    %c5_67 = arith.constant 5 : index
    %c0_68 = arith.constant 0 : index
    %c0_69 = arith.constant 0 : index
    %187 = vector.load %arg2[%c1_66, %c5_67, %c0_68, %c0_69] : memref<4x8x16x128xf32, #tpu.memory_space<vmem>>, vector<1x1x16x128xf32>
    %188 = vector.shape_cast %187 : vector<1x1x16x128xf32> to vector<16x128xf32>
    %189 = vector.shape_cast %188 : vector<16x128xf32> to vector<1x16x128xf32>
    %190 = vector.broadcast %186 : vector<2x1x128xf32> to vector<2x16x128xf32>
    %191 = vector.broadcast %189 : vector<1x16x128xf32> to vector<2x16x128xf32>
    %192 = arith.mulf %190, %191 : vector<2x16x128xf32>
    %193 = arith.addf %185, %192 : vector<2x16x128xf32>
    %194 = vector.extract_strided_slice %0 {offsets = [0, 6, 0], sizes = [2, 1, 128], strides = [1, 1, 1]} : vector<2x8x128xf32> to vector<2x1x128xf32>
    %c1_70 = arith.constant 1 : index
    %c6_71 = arith.constant 6 : index
    %c0_72 = arith.constant 0 : index
    %c0_73 = arith.constant 0 : index
    %195 = vector.load %arg2[%c1_70, %c6_71, %c0_72, %c0_73] : memref<4x8x16x128xf32, #tpu.memory_space<vmem>>, vector<1x1x16x128xf32>
    %196 = vector.shape_cast %195 : vector<1x1x16x128xf32> to vector<16x128xf32>
    %197 = vector.shape_cast %196 : vector<16x128xf32> to vector<1x16x128xf32>
    %198 = vector.broadcast %194 : vector<2x1x128xf32> to vector<2x16x128xf32>
    %199 = vector.broadcast %197 : vector<1x16x128xf32> to vector<2x16x128xf32>
    %200 = arith.mulf %198, %199 : vector<2x16x128xf32>
    %201 = arith.addf %193, %200 : vector<2x16x128xf32>
    %202 = vector.extract_strided_slice %0 {offsets = [0, 7, 0], sizes = [2, 1, 128], strides = [1, 1, 1]} : vector<2x8x128xf32> to vector<2x1x128xf32>
    %c1_74 = arith.constant 1 : index
    %c7_75 = arith.constant 7 : index
    %c0_76 = arith.constant 0 : index
    %c0_77 = arith.constant 0 : index
    %203 = vector.load %arg2[%c1_74, %c7_75, %c0_76, %c0_77] : memref<4x8x16x128xf32, #tpu.memory_space<vmem>>, vector<1x1x16x128xf32>
    %204 = vector.shape_cast %203 : vector<1x1x16x128xf32> to vector<16x128xf32>
    %205 = vector.shape_cast %204 : vector<16x128xf32> to vector<1x16x128xf32>
    %206 = vector.broadcast %202 : vector<2x1x128xf32> to vector<2x16x128xf32>
    %207 = vector.broadcast %205 : vector<1x16x128xf32> to vector<2x16x128xf32>
    %208 = arith.mulf %206, %207 : vector<2x16x128xf32>
    %209 = arith.addf %201, %208 : vector<2x16x128xf32>
    %cst_78 = arith.constant dense<0.000000e+00> : vector<2x16xf32>
    %210 = vector.multi_reduction <add>, %209, %cst_78 [2] : vector<2x16x128xf32> to vector<2x16xf32>
    %211 = vector.shape_cast %210 : vector<2x16xf32> to vector<2x16x1xf32>
    %cst_79 = arith.constant 7.812500e-03 : f32
    %212 = vector.broadcast %cst_79 : f32 to vector<2x16x1xf32>
    %213 = arith.mulf %211, %212 : vector<2x16x1xf32>
    %214 = arith.mulf %213, %213 : vector<2x16x1xf32>
    %cst_80 = arith.constant dense<0.000000e+00> : vector<2x1xf32>
    %215 = vector.multi_reduction <add>, %214, %cst_80 [1] : vector<2x16x1xf32> to vector<2x1xf32>
    %216 = vector.shape_cast %215 : vector<2x1xf32> to vector<2x1x1xf32>
    %cst_81 = arith.constant 9.99999996E-13 : f32
    %217 = vector.broadcast %cst_81 : f32 to vector<2x1x1xf32>
    %218 = arith.addf %216, %217 : vector<2x1x1xf32>
    %219 = math.rsqrt %218 : vector<2x1x1xf32>
    %220 = arith.mulf %216, %219 : vector<2x1x1xf32>
    %cst_82 = arith.constant 1.000000e+00 : f32
    %221 = vector.broadcast %cst_82 : f32 to vector<2x1x1xf32>
    %222 = arith.addf %221, %216 : vector<2x1x1xf32>
    %223 = tpu.reciprocal %222 : vector<2x1x1xf32> -> vector<2x1x1xf32>
    %224 = arith.mulf %220, %223 : vector<2x1x1xf32>
    %225 = vector.broadcast %224 : vector<2x1x1xf32> to vector<2x16x1xf32>
    %226 = arith.mulf %213, %225 : vector<2x16x1xf32>
    %cst_83 = arith.constant 0.000000e+00 : f32
    %227 = vector.broadcast %cst_83 : f32 to vector<2x1x128xf32>
    %228 = vector.broadcast %226 : vector<2x16x1xf32> to vector<2x16x128xf32>
    %229 = arith.mulf %209, %228 : vector<2x16x128xf32>
    %cst_84 = arith.constant dense<0.000000e+00> : vector<2x128xf32>
    %230 = vector.multi_reduction <add>, %229, %cst_84 [1] : vector<2x16x128xf32> to vector<2x128xf32>
    %231 = vector.shape_cast %230 : vector<2x128xf32> to vector<2x1x128xf32>
    %232 = arith.addf %227, %231 : vector<2x1x128xf32>
    %cst_85 = arith.constant dense<0xFF800000> : vector<2x1xf32>
    %233 = vector.multi_reduction <maximumf>, %232, %cst_85 [2] : vector<2x1x128xf32> to vector<2x1xf32>
    %234 = vector.shape_cast %233 : vector<2x1xf32> to vector<2x1x1xf32>
    %235 = vector.broadcast %234 : vector<2x1x1xf32> to vector<2x1x128xf32>
    %236 = arith.subf %232, %235 : vector<2x1x128xf32>
    %237 = math.exp %236 : vector<2x1x128xf32>
    %cst_86 = arith.constant dense<0.000000e+00> : vector<2x1xf32>
    %238 = vector.multi_reduction <add>, %237, %cst_86 [2] : vector<2x1x128xf32> to vector<2x1xf32>
    %239 = vector.shape_cast %238 : vector<2x1xf32> to vector<2x1x1xf32>
    %240 = tpu.reciprocal %239 : vector<2x1x1xf32> -> vector<2x1x1xf32>
    %241 = vector.broadcast %240 : vector<2x1x1xf32> to vector<2x1x128xf32>
    %242 = arith.mulf %237, %241 : vector<2x1x128xf32>
    %243 = vector.broadcast %242 : vector<2x1x128xf32> to vector<2x16x128xf32>
    %244 = arith.mulf %209, %243 : vector<2x16x128xf32>
    %cst_87 = arith.constant dense<0.000000e+00> : vector<2x16xf32>
    %245 = vector.multi_reduction <add>, %244, %cst_87 [2] : vector<2x16x128xf32> to vector<2x16xf32>
    %246 = vector.shape_cast %245 : vector<2x16xf32> to vector<2x16x1xf32>
    %247 = arith.mulf %246, %246 : vector<2x16x1xf32>
    %cst_88 = arith.constant dense<0.000000e+00> : vector<2x1xf32>
    %248 = vector.multi_reduction <add>, %247, %cst_88 [1] : vector<2x16x1xf32> to vector<2x1xf32>
    %249 = vector.shape_cast %248 : vector<2x1xf32> to vector<2x1x1xf32>
    %cst_89 = arith.constant 9.99999996E-13 : f32
    %250 = vector.broadcast %cst_89 : f32 to vector<2x1x1xf32>
    %251 = arith.addf %249, %250 : vector<2x1x1xf32>
    %252 = math.rsqrt %251 : vector<2x1x1xf32>
    %253 = arith.mulf %249, %252 : vector<2x1x1xf32>
    %cst_90 = arith.constant 1.000000e+00 : f32
    %254 = vector.broadcast %cst_90 : f32 to vector<2x1x1xf32>
    %255 = arith.addf %254, %249 : vector<2x1x1xf32>
    %256 = tpu.reciprocal %255 : vector<2x1x1xf32> -> vector<2x1x1xf32>
    %257 = arith.mulf %253, %256 : vector<2x1x1xf32>
    %258 = vector.broadcast %257 : vector<2x1x1xf32> to vector<2x16x1xf32>
    %259 = arith.mulf %246, %258 : vector<2x16x1xf32>
    %260 = vector.broadcast %259 : vector<2x16x1xf32> to vector<2x16x128xf32>
    %261 = arith.mulf %209, %260 : vector<2x16x128xf32>
    %cst_91 = arith.constant dense<0.000000e+00> : vector<2x128xf32>
    %262 = vector.multi_reduction <add>, %261, %cst_91 [1] : vector<2x16x128xf32> to vector<2x128xf32>
    %263 = vector.shape_cast %262 : vector<2x128xf32> to vector<2x1x128xf32>
    %264 = arith.addf %232, %263 : vector<2x1x128xf32>
    %cst_92 = arith.constant dense<0xFF800000> : vector<2x1xf32>
    %265 = vector.multi_reduction <maximumf>, %264, %cst_92 [2] : vector<2x1x128xf32> to vector<2x1xf32>
    %266 = vector.shape_cast %265 : vector<2x1xf32> to vector<2x1x1xf32>
    %267 = vector.broadcast %266 : vector<2x1x1xf32> to vector<2x1x128xf32>
    %268 = arith.subf %264, %267 : vector<2x1x128xf32>
    %269 = math.exp %268 : vector<2x1x128xf32>
    %cst_93 = arith.constant dense<0.000000e+00> : vector<2x1xf32>
    %270 = vector.multi_reduction <add>, %269, %cst_93 [2] : vector<2x1x128xf32> to vector<2x1xf32>
    %271 = vector.shape_cast %270 : vector<2x1xf32> to vector<2x1x1xf32>
    %272 = tpu.reciprocal %271 : vector<2x1x1xf32> -> vector<2x1x1xf32>
    %273 = vector.broadcast %272 : vector<2x1x1xf32> to vector<2x1x128xf32>
    %274 = arith.mulf %269, %273 : vector<2x1x128xf32>
    %275 = vector.broadcast %274 : vector<2x1x128xf32> to vector<2x16x128xf32>
    %276 = arith.mulf %209, %275 : vector<2x16x128xf32>
    %cst_94 = arith.constant dense<0.000000e+00> : vector<2x16xf32>
    %277 = vector.multi_reduction <add>, %276, %cst_94 [2] : vector<2x16x128xf32> to vector<2x16xf32>
    %278 = vector.shape_cast %277 : vector<2x16xf32> to vector<2x16x1xf32>
    %279 = arith.mulf %278, %278 : vector<2x16x1xf32>
    %cst_95 = arith.constant dense<0.000000e+00> : vector<2x1xf32>
    %280 = vector.multi_reduction <add>, %279, %cst_95 [1] : vector<2x16x1xf32> to vector<2x1xf32>
    %281 = vector.shape_cast %280 : vector<2x1xf32> to vector<2x1x1xf32>
    %cst_96 = arith.constant 9.99999996E-13 : f32
    %282 = vector.broadcast %cst_96 : f32 to vector<2x1x1xf32>
    %283 = arith.addf %281, %282 : vector<2x1x1xf32>
    %284 = math.rsqrt %283 : vector<2x1x1xf32>
    %285 = arith.mulf %281, %284 : vector<2x1x1xf32>
    %cst_97 = arith.constant 1.000000e+00 : f32
    %286 = vector.broadcast %cst_97 : f32 to vector<2x1x1xf32>
    %287 = arith.addf %286, %281 : vector<2x1x1xf32>
    %288 = tpu.reciprocal %287 : vector<2x1x1xf32> -> vector<2x1x1xf32>
    %289 = arith.mulf %285, %288 : vector<2x1x1xf32>
    %290 = vector.broadcast %289 : vector<2x1x1xf32> to vector<2x16x1xf32>
    %291 = arith.mulf %278, %290 : vector<2x16x1xf32>
    %292 = vector.shape_cast %291 : vector<2x16x1xf32> to vector<2x16xf32>
    %293 = vector.extract_strided_slice %0 {offsets = [0, 0, 0], sizes = [2, 1, 128], strides = [1, 1, 1]} : vector<2x8x128xf32> to vector<2x1x128xf32>
    %c2_98 = arith.constant 2 : index
    %c0_99 = arith.constant 0 : index
    %c0_100 = arith.constant 0 : index
    %c0_101 = arith.constant 0 : index
    %294 = vector.load %arg2[%c2_98, %c0_99, %c0_100, %c0_101] : memref<4x8x16x128xf32, #tpu.memory_space<vmem>>, vector<1x1x16x128xf32>
    %295 = vector.shape_cast %294 : vector<1x1x16x128xf32> to vector<16x128xf32>
    %296 = vector.shape_cast %295 : vector<16x128xf32> to vector<1x16x128xf32>
    %297 = vector.broadcast %293 : vector<2x1x128xf32> to vector<2x16x128xf32>
    %298 = vector.broadcast %296 : vector<1x16x128xf32> to vector<2x16x128xf32>
    %299 = arith.mulf %297, %298 : vector<2x16x128xf32>
    %300 = vector.extract_strided_slice %0 {offsets = [0, 1, 0], sizes = [2, 1, 128], strides = [1, 1, 1]} : vector<2x8x128xf32> to vector<2x1x128xf32>
    %c2_102 = arith.constant 2 : index
    %c1_103 = arith.constant 1 : index
    %c0_104 = arith.constant 0 : index
    %c0_105 = arith.constant 0 : index
    %301 = vector.load %arg2[%c2_102, %c1_103, %c0_104, %c0_105] : memref<4x8x16x128xf32, #tpu.memory_space<vmem>>, vector<1x1x16x128xf32>
    %302 = vector.shape_cast %301 : vector<1x1x16x128xf32> to vector<16x128xf32>
    %303 = vector.shape_cast %302 : vector<16x128xf32> to vector<1x16x128xf32>
    %304 = vector.broadcast %300 : vector<2x1x128xf32> to vector<2x16x128xf32>
    %305 = vector.broadcast %303 : vector<1x16x128xf32> to vector<2x16x128xf32>
    %306 = arith.mulf %304, %305 : vector<2x16x128xf32>
    %307 = arith.addf %299, %306 : vector<2x16x128xf32>
    %308 = vector.extract_strided_slice %0 {offsets = [0, 2, 0], sizes = [2, 1, 128], strides = [1, 1, 1]} : vector<2x8x128xf32> to vector<2x1x128xf32>
    %c2_106 = arith.constant 2 : index
    %c2_107 = arith.constant 2 : index
    %c0_108 = arith.constant 0 : index
    %c0_109 = arith.constant 0 : index
    %309 = vector.load %arg2[%c2_106, %c2_107, %c0_108, %c0_109] : memref<4x8x16x128xf32, #tpu.memory_space<vmem>>, vector<1x1x16x128xf32>
    %310 = vector.shape_cast %309 : vector<1x1x16x128xf32> to vector<16x128xf32>
    %311 = vector.shape_cast %310 : vector<16x128xf32> to vector<1x16x128xf32>
    %312 = vector.broadcast %308 : vector<2x1x128xf32> to vector<2x16x128xf32>
    %313 = vector.broadcast %311 : vector<1x16x128xf32> to vector<2x16x128xf32>
    %314 = arith.mulf %312, %313 : vector<2x16x128xf32>
    %315 = arith.addf %307, %314 : vector<2x16x128xf32>
    %316 = vector.extract_strided_slice %0 {offsets = [0, 3, 0], sizes = [2, 1, 128], strides = [1, 1, 1]} : vector<2x8x128xf32> to vector<2x1x128xf32>
    %c2_110 = arith.constant 2 : index
    %c3_111 = arith.constant 3 : index
    %c0_112 = arith.constant 0 : index
    %c0_113 = arith.constant 0 : index
    %317 = vector.load %arg2[%c2_110, %c3_111, %c0_112, %c0_113] : memref<4x8x16x128xf32, #tpu.memory_space<vmem>>, vector<1x1x16x128xf32>
    %318 = vector.shape_cast %317 : vector<1x1x16x128xf32> to vector<16x128xf32>
    %319 = vector.shape_cast %318 : vector<16x128xf32> to vector<1x16x128xf32>
    %320 = vector.broadcast %316 : vector<2x1x128xf32> to vector<2x16x128xf32>
    %321 = vector.broadcast %319 : vector<1x16x128xf32> to vector<2x16x128xf32>
    %322 = arith.mulf %320, %321 : vector<2x16x128xf32>
    %323 = arith.addf %315, %322 : vector<2x16x128xf32>
    %324 = vector.extract_strided_slice %0 {offsets = [0, 4, 0], sizes = [2, 1, 128], strides = [1, 1, 1]} : vector<2x8x128xf32> to vector<2x1x128xf32>
    %c2_114 = arith.constant 2 : index
    %c4_115 = arith.constant 4 : index
    %c0_116 = arith.constant 0 : index
    %c0_117 = arith.constant 0 : index
    %325 = vector.load %arg2[%c2_114, %c4_115, %c0_116, %c0_117] : memref<4x8x16x128xf32, #tpu.memory_space<vmem>>, vector<1x1x16x128xf32>
    %326 = vector.shape_cast %325 : vector<1x1x16x128xf32> to vector<16x128xf32>
    %327 = vector.shape_cast %326 : vector<16x128xf32> to vector<1x16x128xf32>
    %328 = vector.broadcast %324 : vector<2x1x128xf32> to vector<2x16x128xf32>
    %329 = vector.broadcast %327 : vector<1x16x128xf32> to vector<2x16x128xf32>
    %330 = arith.mulf %328, %329 : vector<2x16x128xf32>
    %331 = arith.addf %323, %330 : vector<2x16x128xf32>
    %332 = vector.extract_strided_slice %0 {offsets = [0, 5, 0], sizes = [2, 1, 128], strides = [1, 1, 1]} : vector<2x8x128xf32> to vector<2x1x128xf32>
    %c2_118 = arith.constant 2 : index
    %c5_119 = arith.constant 5 : index
    %c0_120 = arith.constant 0 : index
    %c0_121 = arith.constant 0 : index
    %333 = vector.load %arg2[%c2_118, %c5_119, %c0_120, %c0_121] : memref<4x8x16x128xf32, #tpu.memory_space<vmem>>, vector<1x1x16x128xf32>
    %334 = vector.shape_cast %333 : vector<1x1x16x128xf32> to vector<16x128xf32>
    %335 = vector.shape_cast %334 : vector<16x128xf32> to vector<1x16x128xf32>
    %336 = vector.broadcast %332 : vector<2x1x128xf32> to vector<2x16x128xf32>
    %337 = vector.broadcast %335 : vector<1x16x128xf32> to vector<2x16x128xf32>
    %338 = arith.mulf %336, %337 : vector<2x16x128xf32>
    %339 = arith.addf %331, %338 : vector<2x16x128xf32>
    %340 = vector.extract_strided_slice %0 {offsets = [0, 6, 0], sizes = [2, 1, 128], strides = [1, 1, 1]} : vector<2x8x128xf32> to vector<2x1x128xf32>
    %c2_122 = arith.constant 2 : index
    %c6_123 = arith.constant 6 : index
    %c0_124 = arith.constant 0 : index
    %c0_125 = arith.constant 0 : index
    %341 = vector.load %arg2[%c2_122, %c6_123, %c0_124, %c0_125] : memref<4x8x16x128xf32, #tpu.memory_space<vmem>>, vector<1x1x16x128xf32>
    %342 = vector.shape_cast %341 : vector<1x1x16x128xf32> to vector<16x128xf32>
    %343 = vector.shape_cast %342 : vector<16x128xf32> to vector<1x16x128xf32>
    %344 = vector.broadcast %340 : vector<2x1x128xf32> to vector<2x16x128xf32>
    %345 = vector.broadcast %343 : vector<1x16x128xf32> to vector<2x16x128xf32>
    %346 = arith.mulf %344, %345 : vector<2x16x128xf32>
    %347 = arith.addf %339, %346 : vector<2x16x128xf32>
    %348 = vector.extract_strided_slice %0 {offsets = [0, 7, 0], sizes = [2, 1, 128], strides = [1, 1, 1]} : vector<2x8x128xf32> to vector<2x1x128xf32>
    %c2_126 = arith.constant 2 : index
    %c7_127 = arith.constant 7 : index
    %c0_128 = arith.constant 0 : index
    %c0_129 = arith.constant 0 : index
    %349 = vector.load %arg2[%c2_126, %c7_127, %c0_128, %c0_129] : memref<4x8x16x128xf32, #tpu.memory_space<vmem>>, vector<1x1x16x128xf32>
    %350 = vector.shape_cast %349 : vector<1x1x16x128xf32> to vector<16x128xf32>
    %351 = vector.shape_cast %350 : vector<16x128xf32> to vector<1x16x128xf32>
    %352 = vector.broadcast %348 : vector<2x1x128xf32> to vector<2x16x128xf32>
    %353 = vector.broadcast %351 : vector<1x16x128xf32> to vector<2x16x128xf32>
    %354 = arith.mulf %352, %353 : vector<2x16x128xf32>
    %355 = arith.addf %347, %354 : vector<2x16x128xf32>
    %cst_130 = arith.constant dense<0.000000e+00> : vector<2x16xf32>
    %356 = vector.multi_reduction <add>, %355, %cst_130 [2] : vector<2x16x128xf32> to vector<2x16xf32>
    %357 = vector.shape_cast %356 : vector<2x16xf32> to vector<2x16x1xf32>
    %cst_131 = arith.constant 7.812500e-03 : f32
    %358 = vector.broadcast %cst_131 : f32 to vector<2x16x1xf32>
    %359 = arith.mulf %357, %358 : vector<2x16x1xf32>
    %360 = arith.mulf %359, %359 : vector<2x16x1xf32>
    %cst_132 = arith.constant dense<0.000000e+00> : vector<2x1xf32>
    %361 = vector.multi_reduction <add>, %360, %cst_132 [1] : vector<2x16x1xf32> to vector<2x1xf32>
    %362 = vector.shape_cast %361 : vector<2x1xf32> to vector<2x1x1xf32>
    %cst_133 = arith.constant 9.99999996E-13 : f32
    %363 = vector.broadcast %cst_133 : f32 to vector<2x1x1xf32>
    %364 = arith.addf %362, %363 : vector<2x1x1xf32>
    %365 = math.rsqrt %364 : vector<2x1x1xf32>
    %366 = arith.mulf %362, %365 : vector<2x1x1xf32>
    %cst_134 = arith.constant 1.000000e+00 : f32
    %367 = vector.broadcast %cst_134 : f32 to vector<2x1x1xf32>
    %368 = arith.addf %367, %362 : vector<2x1x1xf32>
    %369 = tpu.reciprocal %368 : vector<2x1x1xf32> -> vector<2x1x1xf32>
    %370 = arith.mulf %366, %369 : vector<2x1x1xf32>
    %371 = vector.broadcast %370 : vector<2x1x1xf32> to vector<2x16x1xf32>
    %372 = arith.mulf %359, %371 : vector<2x16x1xf32>
    %cst_135 = arith.constant 0.000000e+00 : f32
    %373 = vector.broadcast %cst_135 : f32 to vector<2x1x128xf32>
    %374 = vector.broadcast %372 : vector<2x16x1xf32> to vector<2x16x128xf32>
    %375 = arith.mulf %355, %374 : vector<2x16x128xf32>
    %cst_136 = arith.constant dense<0.000000e+00> : vector<2x128xf32>
    %376 = vector.multi_reduction <add>, %375, %cst_136 [1] : vector<2x16x128xf32> to vector<2x128xf32>
    %377 = vector.shape_cast %376 : vector<2x128xf32> to vector<2x1x128xf32>
    %378 = arith.addf %373, %377 : vector<2x1x128xf32>
    %cst_137 = arith.constant dense<0xFF800000> : vector<2x1xf32>
    %379 = vector.multi_reduction <maximumf>, %378, %cst_137 [2] : vector<2x1x128xf32> to vector<2x1xf32>
    %380 = vector.shape_cast %379 : vector<2x1xf32> to vector<2x1x1xf32>
    %381 = vector.broadcast %380 : vector<2x1x1xf32> to vector<2x1x128xf32>
    %382 = arith.subf %378, %381 : vector<2x1x128xf32>
    %383 = math.exp %382 : vector<2x1x128xf32>
    %cst_138 = arith.constant dense<0.000000e+00> : vector<2x1xf32>
    %384 = vector.multi_reduction <add>, %383, %cst_138 [2] : vector<2x1x128xf32> to vector<2x1xf32>
    %385 = vector.shape_cast %384 : vector<2x1xf32> to vector<2x1x1xf32>
    %386 = tpu.reciprocal %385 : vector<2x1x1xf32> -> vector<2x1x1xf32>
    %387 = vector.broadcast %386 : vector<2x1x1xf32> to vector<2x1x128xf32>
    %388 = arith.mulf %383, %387 : vector<2x1x128xf32>
    %389 = vector.broadcast %388 : vector<2x1x128xf32> to vector<2x16x128xf32>
    %390 = arith.mulf %355, %389 : vector<2x16x128xf32>
    %cst_139 = arith.constant dense<0.000000e+00> : vector<2x16xf32>
    %391 = vector.multi_reduction <add>, %390, %cst_139 [2] : vector<2x16x128xf32> to vector<2x16xf32>
    %392 = vector.shape_cast %391 : vector<2x16xf32> to vector<2x16x1xf32>
    %393 = arith.mulf %392, %392 : vector<2x16x1xf32>
    %cst_140 = arith.constant dense<0.000000e+00> : vector<2x1xf32>
    %394 = vector.multi_reduction <add>, %393, %cst_140 [1] : vector<2x16x1xf32> to vector<2x1xf32>
    %395 = vector.shape_cast %394 : vector<2x1xf32> to vector<2x1x1xf32>
    %cst_141 = arith.constant 9.99999996E-13 : f32
    %396 = vector.broadcast %cst_141 : f32 to vector<2x1x1xf32>
    %397 = arith.addf %395, %396 : vector<2x1x1xf32>
    %398 = math.rsqrt %397 : vector<2x1x1xf32>
    %399 = arith.mulf %395, %398 : vector<2x1x1xf32>
    %cst_142 = arith.constant 1.000000e+00 : f32
    %400 = vector.broadcast %cst_142 : f32 to vector<2x1x1xf32>
    %401 = arith.addf %400, %395 : vector<2x1x1xf32>
    %402 = tpu.reciprocal %401 : vector<2x1x1xf32> -> vector<2x1x1xf32>
    %403 = arith.mulf %399, %402 : vector<2x1x1xf32>
    %404 = vector.broadcast %403 : vector<2x1x1xf32> to vector<2x16x1xf32>
    %405 = arith.mulf %392, %404 : vector<2x16x1xf32>
    %406 = vector.broadcast %405 : vector<2x16x1xf32> to vector<2x16x128xf32>
    %407 = arith.mulf %355, %406 : vector<2x16x128xf32>
    %cst_143 = arith.constant dense<0.000000e+00> : vector<2x128xf32>
    %408 = vector.multi_reduction <add>, %407, %cst_143 [1] : vector<2x16x128xf32> to vector<2x128xf32>
    %409 = vector.shape_cast %408 : vector<2x128xf32> to vector<2x1x128xf32>
    %410 = arith.addf %378, %409 : vector<2x1x128xf32>
    %cst_144 = arith.constant dense<0xFF800000> : vector<2x1xf32>
    %411 = vector.multi_reduction <maximumf>, %410, %cst_144 [2] : vector<2x1x128xf32> to vector<2x1xf32>
    %412 = vector.shape_cast %411 : vector<2x1xf32> to vector<2x1x1xf32>
    %413 = vector.broadcast %412 : vector<2x1x1xf32> to vector<2x1x128xf32>
    %414 = arith.subf %410, %413 : vector<2x1x128xf32>
    %415 = math.exp %414 : vector<2x1x128xf32>
    %cst_145 = arith.constant dense<0.000000e+00> : vector<2x1xf32>
    %416 = vector.multi_reduction <add>, %415, %cst_145 [2] : vector<2x1x128xf32> to vector<2x1xf32>
    %417 = vector.shape_cast %416 : vector<2x1xf32> to vector<2x1x1xf32>
    %418 = tpu.reciprocal %417 : vector<2x1x1xf32> -> vector<2x1x1xf32>
    %419 = vector.broadcast %418 : vector<2x1x1xf32> to vector<2x1x128xf32>
    %420 = arith.mulf %415, %419 : vector<2x1x128xf32>
    %421 = vector.broadcast %420 : vector<2x1x128xf32> to vector<2x16x128xf32>
    %422 = arith.mulf %355, %421 : vector<2x16x128xf32>
    %cst_146 = arith.constant dense<0.000000e+00> : vector<2x16xf32>
    %423 = vector.multi_reduction <add>, %422, %cst_146 [2] : vector<2x16x128xf32> to vector<2x16xf32>
    %424 = vector.shape_cast %423 : vector<2x16xf32> to vector<2x16x1xf32>
    %425 = arith.mulf %424, %424 : vector<2x16x1xf32>
    %cst_147 = arith.constant dense<0.000000e+00> : vector<2x1xf32>
    %426 = vector.multi_reduction <add>, %425, %cst_147 [1] : vector<2x16x1xf32> to vector<2x1xf32>
    %427 = vector.shape_cast %426 : vector<2x1xf32> to vector<2x1x1xf32>
    %cst_148 = arith.constant 9.99999996E-13 : f32
    %428 = vector.broadcast %cst_148 : f32 to vector<2x1x1xf32>
    %429 = arith.addf %427, %428 : vector<2x1x1xf32>
    %430 = math.rsqrt %429 : vector<2x1x1xf32>
    %431 = arith.mulf %427, %430 : vector<2x1x1xf32>
    %cst_149 = arith.constant 1.000000e+00 : f32
    %432 = vector.broadcast %cst_149 : f32 to vector<2x1x1xf32>
    %433 = arith.addf %432, %427 : vector<2x1x1xf32>
    %434 = tpu.reciprocal %433 : vector<2x1x1xf32> -> vector<2x1x1xf32>
    %435 = arith.mulf %431, %434 : vector<2x1x1xf32>
    %436 = vector.broadcast %435 : vector<2x1x1xf32> to vector<2x16x1xf32>
    %437 = arith.mulf %424, %436 : vector<2x16x1xf32>
    %438 = vector.shape_cast %437 : vector<2x16x1xf32> to vector<2x16xf32>
    %439 = vector.extract_strided_slice %0 {offsets = [0, 0, 0], sizes = [2, 1, 128], strides = [1, 1, 1]} : vector<2x8x128xf32> to vector<2x1x128xf32>
    %c3_150 = arith.constant 3 : index
    %c0_151 = arith.constant 0 : index
    %c0_152 = arith.constant 0 : index
    %c0_153 = arith.constant 0 : index
    %440 = vector.load %arg2[%c3_150, %c0_151, %c0_152, %c0_153] : memref<4x8x16x128xf32, #tpu.memory_space<vmem>>, vector<1x1x16x128xf32>
    %441 = vector.shape_cast %440 : vector<1x1x16x128xf32> to vector<16x128xf32>
    %442 = vector.shape_cast %441 : vector<16x128xf32> to vector<1x16x128xf32>
    %443 = vector.broadcast %439 : vector<2x1x128xf32> to vector<2x16x128xf32>
    %444 = vector.broadcast %442 : vector<1x16x128xf32> to vector<2x16x128xf32>
    %445 = arith.mulf %443, %444 : vector<2x16x128xf32>
    %446 = vector.extract_strided_slice %0 {offsets = [0, 1, 0], sizes = [2, 1, 128], strides = [1, 1, 1]} : vector<2x8x128xf32> to vector<2x1x128xf32>
    %c3_154 = arith.constant 3 : index
    %c1_155 = arith.constant 1 : index
    %c0_156 = arith.constant 0 : index
    %c0_157 = arith.constant 0 : index
    %447 = vector.load %arg2[%c3_154, %c1_155, %c0_156, %c0_157] : memref<4x8x16x128xf32, #tpu.memory_space<vmem>>, vector<1x1x16x128xf32>
    %448 = vector.shape_cast %447 : vector<1x1x16x128xf32> to vector<16x128xf32>
    %449 = vector.shape_cast %448 : vector<16x128xf32> to vector<1x16x128xf32>
    %450 = vector.broadcast %446 : vector<2x1x128xf32> to vector<2x16x128xf32>
    %451 = vector.broadcast %449 : vector<1x16x128xf32> to vector<2x16x128xf32>
    %452 = arith.mulf %450, %451 : vector<2x16x128xf32>
    %453 = arith.addf %445, %452 : vector<2x16x128xf32>
    %454 = vector.extract_strided_slice %0 {offsets = [0, 2, 0], sizes = [2, 1, 128], strides = [1, 1, 1]} : vector<2x8x128xf32> to vector<2x1x128xf32>
    %c3_158 = arith.constant 3 : index
    %c2_159 = arith.constant 2 : index
    %c0_160 = arith.constant 0 : index
    %c0_161 = arith.constant 0 : index
    %455 = vector.load %arg2[%c3_158, %c2_159, %c0_160, %c0_161] : memref<4x8x16x128xf32, #tpu.memory_space<vmem>>, vector<1x1x16x128xf32>
    %456 = vector.shape_cast %455 : vector<1x1x16x128xf32> to vector<16x128xf32>
    %457 = vector.shape_cast %456 : vector<16x128xf32> to vector<1x16x128xf32>
    %458 = vector.broadcast %454 : vector<2x1x128xf32> to vector<2x16x128xf32>
    %459 = vector.broadcast %457 : vector<1x16x128xf32> to vector<2x16x128xf32>
    %460 = arith.mulf %458, %459 : vector<2x16x128xf32>
    %461 = arith.addf %453, %460 : vector<2x16x128xf32>
    %462 = vector.extract_strided_slice %0 {offsets = [0, 3, 0], sizes = [2, 1, 128], strides = [1, 1, 1]} : vector<2x8x128xf32> to vector<2x1x128xf32>
    %c3_162 = arith.constant 3 : index
    %c3_163 = arith.constant 3 : index
    %c0_164 = arith.constant 0 : index
    %c0_165 = arith.constant 0 : index
    %463 = vector.load %arg2[%c3_162, %c3_163, %c0_164, %c0_165] : memref<4x8x16x128xf32, #tpu.memory_space<vmem>>, vector<1x1x16x128xf32>
    %464 = vector.shape_cast %463 : vector<1x1x16x128xf32> to vector<16x128xf32>
    %465 = vector.shape_cast %464 : vector<16x128xf32> to vector<1x16x128xf32>
    %466 = vector.broadcast %462 : vector<2x1x128xf32> to vector<2x16x128xf32>
    %467 = vector.broadcast %465 : vector<1x16x128xf32> to vector<2x16x128xf32>
    %468 = arith.mulf %466, %467 : vector<2x16x128xf32>
    %469 = arith.addf %461, %468 : vector<2x16x128xf32>
    %470 = vector.extract_strided_slice %0 {offsets = [0, 4, 0], sizes = [2, 1, 128], strides = [1, 1, 1]} : vector<2x8x128xf32> to vector<2x1x128xf32>
    %c3_166 = arith.constant 3 : index
    %c4_167 = arith.constant 4 : index
    %c0_168 = arith.constant 0 : index
    %c0_169 = arith.constant 0 : index
    %471 = vector.load %arg2[%c3_166, %c4_167, %c0_168, %c0_169] : memref<4x8x16x128xf32, #tpu.memory_space<vmem>>, vector<1x1x16x128xf32>
    %472 = vector.shape_cast %471 : vector<1x1x16x128xf32> to vector<16x128xf32>
    %473 = vector.shape_cast %472 : vector<16x128xf32> to vector<1x16x128xf32>
    %474 = vector.broadcast %470 : vector<2x1x128xf32> to vector<2x16x128xf32>
    %475 = vector.broadcast %473 : vector<1x16x128xf32> to vector<2x16x128xf32>
    %476 = arith.mulf %474, %475 : vector<2x16x128xf32>
    %477 = arith.addf %469, %476 : vector<2x16x128xf32>
    %478 = vector.extract_strided_slice %0 {offsets = [0, 5, 0], sizes = [2, 1, 128], strides = [1, 1, 1]} : vector<2x8x128xf32> to vector<2x1x128xf32>
    %c3_170 = arith.constant 3 : index
    %c5_171 = arith.constant 5 : index
    %c0_172 = arith.constant 0 : index
    %c0_173 = arith.constant 0 : index
    %479 = vector.load %arg2[%c3_170, %c5_171, %c0_172, %c0_173] : memref<4x8x16x128xf32, #tpu.memory_space<vmem>>, vector<1x1x16x128xf32>
    %480 = vector.shape_cast %479 : vector<1x1x16x128xf32> to vector<16x128xf32>
    %481 = vector.shape_cast %480 : vector<16x128xf32> to vector<1x16x128xf32>
    %482 = vector.broadcast %478 : vector<2x1x128xf32> to vector<2x16x128xf32>
    %483 = vector.broadcast %481 : vector<1x16x128xf32> to vector<2x16x128xf32>
    %484 = arith.mulf %482, %483 : vector<2x16x128xf32>
    %485 = arith.addf %477, %484 : vector<2x16x128xf32>
    %486 = vector.extract_strided_slice %0 {offsets = [0, 6, 0], sizes = [2, 1, 128], strides = [1, 1, 1]} : vector<2x8x128xf32> to vector<2x1x128xf32>
    %c3_174 = arith.constant 3 : index
    %c6_175 = arith.constant 6 : index
    %c0_176 = arith.constant 0 : index
    %c0_177 = arith.constant 0 : index
    %487 = vector.load %arg2[%c3_174, %c6_175, %c0_176, %c0_177] : memref<4x8x16x128xf32, #tpu.memory_space<vmem>>, vector<1x1x16x128xf32>
    %488 = vector.shape_cast %487 : vector<1x1x16x128xf32> to vector<16x128xf32>
    %489 = vector.shape_cast %488 : vector<16x128xf32> to vector<1x16x128xf32>
    %490 = vector.broadcast %486 : vector<2x1x128xf32> to vector<2x16x128xf32>
    %491 = vector.broadcast %489 : vector<1x16x128xf32> to vector<2x16x128xf32>
    %492 = arith.mulf %490, %491 : vector<2x16x128xf32>
    %493 = arith.addf %485, %492 : vector<2x16x128xf32>
    %494 = vector.extract_strided_slice %0 {offsets = [0, 7, 0], sizes = [2, 1, 128], strides = [1, 1, 1]} : vector<2x8x128xf32> to vector<2x1x128xf32>
    %c3_178 = arith.constant 3 : index
    %c7_179 = arith.constant 7 : index
    %c0_180 = arith.constant 0 : index
    %c0_181 = arith.constant 0 : index
    %495 = vector.load %arg2[%c3_178, %c7_179, %c0_180, %c0_181] : memref<4x8x16x128xf32, #tpu.memory_space<vmem>>, vector<1x1x16x128xf32>
    %496 = vector.shape_cast %495 : vector<1x1x16x128xf32> to vector<16x128xf32>
    %497 = vector.shape_cast %496 : vector<16x128xf32> to vector<1x16x128xf32>
    %498 = vector.broadcast %494 : vector<2x1x128xf32> to vector<2x16x128xf32>
    %499 = vector.broadcast %497 : vector<1x16x128xf32> to vector<2x16x128xf32>
    %500 = arith.mulf %498, %499 : vector<2x16x128xf32>
    %501 = arith.addf %493, %500 : vector<2x16x128xf32>
    %cst_182 = arith.constant dense<0.000000e+00> : vector<2x16xf32>
    %502 = vector.multi_reduction <add>, %501, %cst_182 [2] : vector<2x16x128xf32> to vector<2x16xf32>
    %503 = vector.shape_cast %502 : vector<2x16xf32> to vector<2x16x1xf32>
    %cst_183 = arith.constant 7.812500e-03 : f32
    %504 = vector.broadcast %cst_183 : f32 to vector<2x16x1xf32>
    %505 = arith.mulf %503, %504 : vector<2x16x1xf32>
    %506 = arith.mulf %505, %505 : vector<2x16x1xf32>
    %cst_184 = arith.constant dense<0.000000e+00> : vector<2x1xf32>
    %507 = vector.multi_reduction <add>, %506, %cst_184 [1] : vector<2x16x1xf32> to vector<2x1xf32>
    %508 = vector.shape_cast %507 : vector<2x1xf32> to vector<2x1x1xf32>
    %cst_185 = arith.constant 9.99999996E-13 : f32
    %509 = vector.broadcast %cst_185 : f32 to vector<2x1x1xf32>
    %510 = arith.addf %508, %509 : vector<2x1x1xf32>
    %511 = math.rsqrt %510 : vector<2x1x1xf32>
    %512 = arith.mulf %508, %511 : vector<2x1x1xf32>
    %cst_186 = arith.constant 1.000000e+00 : f32
    %513 = vector.broadcast %cst_186 : f32 to vector<2x1x1xf32>
    %514 = arith.addf %513, %508 : vector<2x1x1xf32>
    %515 = tpu.reciprocal %514 : vector<2x1x1xf32> -> vector<2x1x1xf32>
    %516 = arith.mulf %512, %515 : vector<2x1x1xf32>
    %517 = vector.broadcast %516 : vector<2x1x1xf32> to vector<2x16x1xf32>
    %518 = arith.mulf %505, %517 : vector<2x16x1xf32>
    %cst_187 = arith.constant 0.000000e+00 : f32
    %519 = vector.broadcast %cst_187 : f32 to vector<2x1x128xf32>
    %520 = vector.broadcast %518 : vector<2x16x1xf32> to vector<2x16x128xf32>
    %521 = arith.mulf %501, %520 : vector<2x16x128xf32>
    %cst_188 = arith.constant dense<0.000000e+00> : vector<2x128xf32>
    %522 = vector.multi_reduction <add>, %521, %cst_188 [1] : vector<2x16x128xf32> to vector<2x128xf32>
    %523 = vector.shape_cast %522 : vector<2x128xf32> to vector<2x1x128xf32>
    %524 = arith.addf %519, %523 : vector<2x1x128xf32>
    %cst_189 = arith.constant dense<0xFF800000> : vector<2x1xf32>
    %525 = vector.multi_reduction <maximumf>, %524, %cst_189 [2] : vector<2x1x128xf32> to vector<2x1xf32>
    %526 = vector.shape_cast %525 : vector<2x1xf32> to vector<2x1x1xf32>
    %527 = vector.broadcast %526 : vector<2x1x1xf32> to vector<2x1x128xf32>
    %528 = arith.subf %524, %527 : vector<2x1x128xf32>
    %529 = math.exp %528 : vector<2x1x128xf32>
    %cst_190 = arith.constant dense<0.000000e+00> : vector<2x1xf32>
    %530 = vector.multi_reduction <add>, %529, %cst_190 [2] : vector<2x1x128xf32> to vector<2x1xf32>
    %531 = vector.shape_cast %530 : vector<2x1xf32> to vector<2x1x1xf32>
    %532 = tpu.reciprocal %531 : vector<2x1x1xf32> -> vector<2x1x1xf32>
    %533 = vector.broadcast %532 : vector<2x1x1xf32> to vector<2x1x128xf32>
    %534 = arith.mulf %529, %533 : vector<2x1x128xf32>
    %535 = vector.broadcast %534 : vector<2x1x128xf32> to vector<2x16x128xf32>
    %536 = arith.mulf %501, %535 : vector<2x16x128xf32>
    %cst_191 = arith.constant dense<0.000000e+00> : vector<2x16xf32>
    %537 = vector.multi_reduction <add>, %536, %cst_191 [2] : vector<2x16x128xf32> to vector<2x16xf32>
    %538 = vector.shape_cast %537 : vector<2x16xf32> to vector<2x16x1xf32>
    %539 = arith.mulf %538, %538 : vector<2x16x1xf32>
    %cst_192 = arith.constant dense<0.000000e+00> : vector<2x1xf32>
    %540 = vector.multi_reduction <add>, %539, %cst_192 [1] : vector<2x16x1xf32> to vector<2x1xf32>
    %541 = vector.shape_cast %540 : vector<2x1xf32> to vector<2x1x1xf32>
    %cst_193 = arith.constant 9.99999996E-13 : f32
    %542 = vector.broadcast %cst_193 : f32 to vector<2x1x1xf32>
    %543 = arith.addf %541, %542 : vector<2x1x1xf32>
    %544 = math.rsqrt %543 : vector<2x1x1xf32>
    %545 = arith.mulf %541, %544 : vector<2x1x1xf32>
    %cst_194 = arith.constant 1.000000e+00 : f32
    %546 = vector.broadcast %cst_194 : f32 to vector<2x1x1xf32>
    %547 = arith.addf %546, %541 : vector<2x1x1xf32>
    %548 = tpu.reciprocal %547 : vector<2x1x1xf32> -> vector<2x1x1xf32>
    %549 = arith.mulf %545, %548 : vector<2x1x1xf32>
    %550 = vector.broadcast %549 : vector<2x1x1xf32> to vector<2x16x1xf32>
    %551 = arith.mulf %538, %550 : vector<2x16x1xf32>
    %552 = vector.broadcast %551 : vector<2x16x1xf32> to vector<2x16x128xf32>
    %553 = arith.mulf %501, %552 : vector<2x16x128xf32>
    %cst_195 = arith.constant dense<0.000000e+00> : vector<2x128xf32>
    %554 = vector.multi_reduction <add>, %553, %cst_195 [1] : vector<2x16x128xf32> to vector<2x128xf32>
    %555 = vector.shape_cast %554 : vector<2x128xf32> to vector<2x1x128xf32>
    %556 = arith.addf %524, %555 : vector<2x1x128xf32>
    %cst_196 = arith.constant dense<0xFF800000> : vector<2x1xf32>
    %557 = vector.multi_reduction <maximumf>, %556, %cst_196 [2] : vector<2x1x128xf32> to vector<2x1xf32>
    %558 = vector.shape_cast %557 : vector<2x1xf32> to vector<2x1x1xf32>
    %559 = vector.broadcast %558 : vector<2x1x1xf32> to vector<2x1x128xf32>
    %560 = arith.subf %556, %559 : vector<2x1x128xf32>
    %561 = math.exp %560 : vector<2x1x128xf32>
    %cst_197 = arith.constant dense<0.000000e+00> : vector<2x1xf32>
    %562 = vector.multi_reduction <add>, %561, %cst_197 [2] : vector<2x1x128xf32> to vector<2x1xf32>
    %563 = vector.shape_cast %562 : vector<2x1xf32> to vector<2x1x1xf32>
    %564 = tpu.reciprocal %563 : vector<2x1x1xf32> -> vector<2x1x1xf32>
    %565 = vector.broadcast %564 : vector<2x1x1xf32> to vector<2x1x128xf32>
    %566 = arith.mulf %561, %565 : vector<2x1x128xf32>
    %567 = vector.broadcast %566 : vector<2x1x128xf32> to vector<2x16x128xf32>
    %568 = arith.mulf %501, %567 : vector<2x16x128xf32>
    %cst_198 = arith.constant dense<0.000000e+00> : vector<2x16xf32>
    %569 = vector.multi_reduction <add>, %568, %cst_198 [2] : vector<2x16x128xf32> to vector<2x16xf32>
    %570 = vector.shape_cast %569 : vector<2x16xf32> to vector<2x16x1xf32>
    %571 = arith.mulf %570, %570 : vector<2x16x1xf32>
    %cst_199 = arith.constant dense<0.000000e+00> : vector<2x1xf32>
    %572 = vector.multi_reduction <add>, %571, %cst_199 [1] : vector<2x16x1xf32> to vector<2x1xf32>
    %573 = vector.shape_cast %572 : vector<2x1xf32> to vector<2x1x1xf32>
    %cst_200 = arith.constant 9.99999996E-13 : f32
    %574 = vector.broadcast %cst_200 : f32 to vector<2x1x1xf32>
    %575 = arith.addf %573, %574 : vector<2x1x1xf32>
    %576 = math.rsqrt %575 : vector<2x1x1xf32>
    %577 = arith.mulf %573, %576 : vector<2x1x1xf32>
    %cst_201 = arith.constant 1.000000e+00 : f32
    %578 = vector.broadcast %cst_201 : f32 to vector<2x1x1xf32>
    %579 = arith.addf %578, %573 : vector<2x1x1xf32>
    %580 = tpu.reciprocal %579 : vector<2x1x1xf32> -> vector<2x1x1xf32>
    %581 = arith.mulf %577, %580 : vector<2x1x1xf32>
    %582 = vector.broadcast %581 : vector<2x1x1xf32> to vector<2x16x1xf32>
    %583 = arith.mulf %570, %582 : vector<2x16x1xf32>
    %584 = vector.shape_cast %583 : vector<2x16x1xf32> to vector<2x16xf32>
    %585 = tpu.concatenate %146, %292, %438, %584 in 1 : vector<2x16xf32>, vector<2x16xf32>, vector<2x16xf32>, vector<2x16xf32> -> vector<2x64xf32>
    %c0_202 = arith.constant 0 : index
    %c0_203 = arith.constant 0 : index
    %586 = vector.load %arg3[%c0_202, %c0_203] : memref<2x64xf32, #tpu.memory_space<vmem>>, vector<2x64xf32>
    tpu.vector_store %arg3[%c0_202, %c0_203], %585 {strides = array<i32>} : memref<2x64xf32, #tpu.memory_space<vmem>>, vector<2x64xf32>,
    return
  }
  func.func @transform_0(%arg0: i32) -> (i32, i32, i32) {
    %c0_i32 = arith.constant 0 : i32
    %c0_i32_0 = arith.constant 0 : i32
    %c0_i32_1 = arith.constant 0 : i32
    return %arg0, %c0_i32, %c0_i32_0 : i32, i32, i32
  }
  func.func @transform_1(%arg0: i32) -> (i32, i32, i32, i32) {
    %c0_i32 = arith.constant 0 : i32
    %c0_i32_0 = arith.constant 0 : i32
    %c0_i32_1 = arith.constant 0 : i32
    %c0_i32_2 = arith.constant 0 : i32
    %c0_i32_3 = arith.constant 0 : i32
    return %c0_i32, %c0_i32_0, %c0_i32_1, %c0_i32_2 : i32, i32, i32, i32
  }
  func.func @transform_2(%arg0: i32) -> (i32, i32) {
    %c0_i32 = arith.constant 0 : i32
    %c0_i32_0 = arith.constant 0 : i32
    return %arg0, %c0_i32 : i32, i32
  }
}

</mosaic_0001>

<bundles_post_ra>
// kernel: tpu_custom_call.1
= control target key start
LH: loop header
LB: loop body
LE: loop exit
PB: predicated region body
PF: predicated region fallthrough
CT: control target
= control target key end

     0   :  { %7 = vsyncpa [#allocation3], 0  ;;  %s4004_s0 = inlined_call_operand.hbm [shape: f32[2,8,128], index: 0, kind: input, shape index: {}]   ;;  %s4005_s1 = inlined_call_operand.hbm [shape: f32[4,8,16,128], index: 1, kind: input, shape index: {}]   ;;  %s4006_s2 = inlined_call_operand.hbm [shape: f32[2,64], index: 2, kind: output, shape index: {}]  }
   0x1   :  { %8 = vsyncpa [#allocation6], 0 }
   0x2   :  { %9 = vsyncpa [#allocation4], 0  ;;  %s14_s11 = sshll.u32 %s4004_s0, 4  ;;  %s2320_s12 = smov [#allocation2]   ;;  %s15_s11 = int_to_ptr.hbm [resolvable:$true] %s14_s11 }
   0x3   :  { %s16_s13 = sshll.u32 %s2320_s12, 4  ;;  %s27_s16 = sshll.u32 %s4005_s1, 4  ;;  %s17_s13 = int_to_ptr.vmem [resolvable:$true] %s16_s13  ;;  %s28_s16 = int_to_ptr.hbm [resolvable:$true] %s27_s16 }
   0x4   :  { %s2321_s17 = smov 128   ;;  %s2322_s18 = smov 8  }
   0x5   :  { %22 = dma.hbm_to_vmem [thread:$0]  %s15_s11, 256, %s17_s13, [#allocation3], %s2321_s17, %s2321_s17, %s2322_s18  }
   0x6   :  { %s2323_s19 = smov [#allocation5]  }
   0x7   :  { %s29_s20 = sshll.u32 %s2323_s19, 4  ;;  %s30_s20 = int_to_ptr.vmem [resolvable:$true] %s29_s20 }
   0x8   :  { %35 = dma.hbm_to_vmem [thread:$0]  %s28_s16, 8192, %s30_s20, [#allocation6], %s2321_s17, %s2321_s17, %s2322_s18  }
   0x9   :  { %2314 = dma.done.wait [#allocation3], 256  }
   0xa   :  { %2315 = vsyncadd [#allocation3], 4294967040 }
   0xb   :  { %2316 = dma.done.wait [#allocation6], 8192  }
   0xc   :  { %2317 = vsyncadd [#allocation6], 4294959104  ;;  %v45_v0 = vld [vmem:[#allocation2 + $0x8] sm:$0xff]  ;;  %v46_v1 = vld [vmem:[#allocation5] sm:$0xff]  ;;  %s2324_s0 = smov [#allocation7]   ;;  %s2066_s23 = sshll.u32 %s4006_s2, 4  ;;  %s2067_s23 = int_to_ptr.hbm [resolvable:$true] %s2066_s23 }
   0xd   :  { %v55_v2 = vld [vmem:[#allocation5 + $0x10] sm:$0xff]  ;;  %v2346_v3 = vperm.slane %v45_v0, 0  ;;  %v2348_v4 = vperm.slane %v45_v0, 1  ;;  %v68_v5 = vld [vmem:[#allocation5 + $0x20] sm:$0xff]  ;;  %v2350_v6 = vperm.slane %v45_v0, 2  ;;  %v2352_v8 = vperm.slane %v45_v0, 3 }
   0xe   :  { %v81_v7 = vld [vmem:[#allocation5 + $0x30] sm:$0xff]  ;;  %v2354_v9 = vperm.slane %v45_v0, 4  ;;  %v94_v13 = vld [vmem:[#allocation5 + $0x40] sm:$0xff]  ;;  %v2360_v16 = vperm.slane %v45_v0, 5  ;;  %v2362_v17 = vperm.slane %v45_v0, 6  ;;  %v2364_v18 = vperm.slane %v45_v0, 7 }
   0xf   :  { %v52_v10 = vmul.f32 %v2346_v3, %v46_v1  ;;  %v61_v11 = vmul.f32 %v2348_v4, %v55_v2  ;;  %v74_v12 = vmul.f32 %v2350_v6, %v68_v5  ;;  %v44_v14 = vld [vmem:[#allocation2] sm:$0xff]  ;;  %v87_v15 = vmul.f32 %v2352_v8, %v81_v7  ;;  %v2366_v19 = vld [vmem:[#allocation5 + $0x80] sm:$0xff]  ;;  %v47_v53 = vld [vmem:[#allocation5 + $0x8] sm:$0xff]  ;;  %s2064_s1 = sshll.u32 %s2324_s0, 4  ;;  %s2065_s1 = int_to_ptr.vmem [resolvable:$true] %s2064_s1 }
  0x10   :  { %v107_v21 = vld [vmem:[#allocation5 + $0x50] sm:$0xff]  ;;  %v2368_v22 = vperm.slane %v44_v14, 0  ;;  %v2370_v23 = vperm.slane %v44_v14, 1  ;;  %v2372_v24 = vperm.slane %v44_v14, 2  ;;  %v2376_v26 = vld [vmem:[#allocation5 + $0xa0] sm:$0xff]  ;;  %v100_v27 = vmul.f32 %v2354_v9, %v94_v13  ;;  %v56_v54 = vld [vmem:[#allocation5 + $0x18] sm:$0xff] }
  0x11   :  { %v65_v20 = vadd.f32 %v61_v11, %v52_v10  ;;  %v2374_v25 = vld [vmem:[#allocation5 + $0x90] sm:$0xff]  ;;  %v120_v28 = vld [vmem:[#allocation5 + $0x60] sm:$0xff]  ;;  %v2381_v30 = vperm.slane %v44_v14, 3  ;;  %v2383_v31 = vperm.slane %v44_v14, 4  ;;  %v2387_v34 = vperm.slane %v44_v14, 5  ;;  %v69_v55 = vld [vmem:[#allocation5 + $0x28] sm:$0xff] }
  0x12   :  { %v2379_v29 = vld [vmem:[#allocation5 + $0x70] sm:$0xff]  ;;  %v2389_v35 = vperm.slane %v44_v14, 6  ;;  %v546_v36 = vmul.f32 %v2366_v19, %v2368_v22  ;;  %v113_v37 = vmul.f32 %v2360_v16, %v107_v21  ;;  %v2394_v38 = vperm.slane %v44_v14, 7  ;;  %v2400_v41 = vld [vmem:[#allocation5 + $0xc0] sm:$0xff]  ;;  %v82_v0 = vld [vmem:[#allocation5 + $0x38] sm:$0xff] }
  0x13   :  { %v2385_v32 = vld [vmem:[#allocation5 + $0xb0] sm:$0xff]  ;;  %v78_v33 = vadd.f32 %v74_v12, %v65_v20  ;;  %v553_v39 = vmul.f32 %v2374_v25, %v2370_v23  ;;  %v564_v40 = vmul.f32 %v2376_v26, %v2372_v24  ;;  %v2404_v43 = vld [vmem:[#allocation5 + $0xe0] sm:$0xff]  ;;  %v126_v45 = vmul.f32 %v2362_v17, %v120_v28  ;;  %v95_v11 = vld [vmem:[#allocation5 + $0x48] sm:$0xff] }
  0x14   :  { %v2402_v42 = vld [vmem:[#allocation5 + $0xd0] sm:$0xff]  ;;  %v139_v46 = vmul.f32 %v2364_v18, %v2379_v29  ;;  %v575_v47 = vmul.f32 %v2385_v32, %v2381_v30  ;;  %v50_v50 = vmul.f32 %v2368_v22, %v46_v1  ;;  %v59_v51 = vmul.f32 %v2370_v23, %v55_v2  ;;  %v545_v12 = vld [vmem:[#allocation5 + $0x88] sm:$0xff] }
  0x15   :  { %v91_v44 = vadd.f32 %v87_v15, %v78_v33  ;;  %v2411_v48 = vld [vmem:[#allocation5 + $0xf0] sm:$0xff]  ;;  %v557_v49 = vadd.f32 %v553_v39, %v546_v36  ;;  %v72_v52 = vmul.f32 %v2372_v24, %v68_v5  ;;  %v586_v57 = vmul.f32 %v2400_v41, %v2383_v31  ;;  %v552_v33 = vld [vmem:[#allocation5 + $0x98] sm:$0xff]  ;;  %v563_v36 = vld [vmem:[#allocation5 + $0xa8] sm:$0xff] }
  0x16   :  { %4020 = vst [vmem:[#allocation11_spill] sm:$0xff] %v2411_v48  ;;  %v597_v58 = vmul.f32 %v2402_v42, %v2387_v34  ;;  %v608_v59 = vmul.f32 %v2404_v43, %v2389_v35  ;;  %v619_v61 = vmul.f32 %v2411_v48, %v2394_v38  ;;  %v63_v62 = vadd.f32 %v59_v51, %v50_v50 }
  0x17   :  { %v104_v56 = vadd.f32 %v100_v27, %v91_v44  ;;  %v568_v60 = vadd.f32 %v564_v40, %v557_v49  ;;  %v85_v63 = vmul.f32 %v2381_v30, %v81_v7  ;;  %v53_v2 = vmul.f32 %v2346_v3, %v47_v53  ;;  %v108_v44 = vld [vmem:[#allocation5 + $0x58] sm:$0xff] }
  0x18   :  { %v62_v5 = vmul.f32 %v2348_v4, %v56_v54  ;;  %v75_v10 = vmul.f32 %v2350_v6, %v69_v55  ;;  %v76_v15 = vadd.f32 %v72_v52, %v63_v62  ;;  %v98_v20 = vmul.f32 %v2383_v31, %v94_v13  ;;  %v574_v52 = vld [vmem:[#allocation5 + $0xb8] sm:$0xff] }
  0x19   :  { %v117_v1 = vadd.f32 %v113_v37, %v104_v56  ;;  %v579_v14 = vadd.f32 %v575_v47, %v568_v60  ;;  %v111_v27 = vmul.f32 %v2387_v34, %v107_v21  ;;  %v124_v7 = vmul.f32 %v2389_v35, %v120_v28  ;;  %v121_v56 = vld [vmem:[#allocation5 + $0x68] sm:$0xff] }
  0x1a   :  { %v66_v37 = vadd.f32 %v62_v5, %v53_v2  ;;  %v88_v40 = vmul.f32 %v2352_v8, %v82_v0  ;;  %v89_v50 = vadd.f32 %v85_v63, %v76_v15  ;;  %v101_v51 = vmul.f32 %v2354_v9, %v95_v11  ;;  %v585_v28 = vld [vmem:[#allocation5 + $0xc8] sm:$0xff]  ;;  %v596_v15 = vld [vmem:[#allocation5 + $0xd8] sm:$0xff] }
  0x1b   :  { %v130_v39 = vadd.f32 %v126_v45, %v117_v1  ;;  %v590_v49 = vadd.f32 %v586_v57, %v579_v14  ;;  %v547_v47 = vmul.f32 %v545_v12, %v2368_v22  ;;  %v554_v60 = vmul.f32 %v552_v33, %v2370_v23 }
  0x1c   :  { %v79_v21 = vadd.f32 %v75_v10, %v66_v37  ;;  %v565_v45 = vmul.f32 %v563_v36, %v2372_v24  ;;  %v102_v1 = vadd.f32 %v98_v20, %v89_v50  ;;  %v137_v57 = vmul.f32 %v2394_v38, %v2379_v29  ;;  %v607_v50 = vld [vmem:[#allocation5 + $0xe8] sm:$0xff] }
  0x1d   :  { %v2434_v13 = vadd.f32 %v139_v46, %v130_v39  ;;  %v601_v62 = vadd.f32 %v597_v58, %v590_v49  ;;  %v114_v63 = vmul.f32 %v2360_v16, %v108_v44  ;;  %v127_v5 = vmul.f32 %v2362_v17, %v121_v56  ;;  %v134_v46 = vld [vmem:[#allocation5 + $0x78] sm:$0xff] }
  0x1e   :  { %v92_v2 = vadd.f32 %v88_v40, %v79_v21  ;;  %v558_v14 = vadd.f32 %v554_v60, %v547_v47  ;;  %v576_v10 = vmul.f32 %v574_v52, %v2381_v30  ;;  %v115_v37 = vadd.f32 %v111_v27, %v102_v1 }
  0x1f   :  { %4021 = vst [vmem:[#allocation12_spill] sm:$0xff] %v2434_v13  ;;  %149 = vadd.xlane.f32.xlu1 %v2434_v13  ;;  %v612_v39 = vadd.f32 %v608_v59, %v601_v62  ;;  %v587_v58 = vmul.f32 %v585_v28, %v2383_v31  ;;  %v51_v20 = vmul.f32 %v2368_v22, %v47_v53  ;;  %v618_v62 = vld [vmem:[#allocation5 + $0xf8] sm:$0xff] }
  0x20   :  { %v105_v49 = vadd.f32 %v101_v51, %v92_v2  ;;  %v569_v29 = vadd.f32 %v565_v45, %v558_v14  ;;  %v60_v48 = vmul.f32 %v2370_v23, %v56_v54  ;;  %v73_v40 = vmul.f32 %v2372_v24, %v69_v55  ;;  %v1026_v14 = vld [vmem:[#allocation5 + $0x100] sm:$0xff] }
  0x21   :  { %v2448_v21 = vadd.f32 %v619_v61, %v612_v39  ;;  %v128_v13 = vadd.f32 %v124_v7, %v115_v37  ;;  %v140_v47 = vmul.f32 %v2364_v18, %v134_v46  ;;  %v598_v60 = vmul.f32 %v596_v15, %v2387_v34 }
  0x22   :  { %v118_v59 = vadd.f32 %v114_v63, %v105_v49  ;;  %v580_v27 = vadd.f32 %v576_v10, %v569_v29  ;;  %v64_v1 = vadd.f32 %v60_v48, %v51_v20  ;;  %v86_v53 = vmul.f32 %v2381_v30, %v82_v0  ;;  %v1033_v10 = vld [vmem:[#allocation5 + $0x110] sm:$0xff] }
  0x23   :  { %627 = vadd.xlane.f32.xlu2 %v2448_v21  ;;  %v2454_v51 = vadd.f32 %v137_v57, %v128_v13  ;;  %v609_v54 = vmul.f32 %v607_v50, %v2389_v35  ;;  %v99_v55 = vmul.f32 %v2383_v31, %v95_v11  ;;  %v549_v61 = vmul.f32 %v545_v12, %v2346_v3  ;;  %v1044_v11 = vld [vmem:[#allocation5 + $0x120] sm:$0xff] }
  0x24   :  { %v131_v7 = vadd.f32 %v127_v5, %v118_v59  ;;  %v591_v45 = vadd.f32 %v587_v58, %v580_v27  ;;  %v77_v2 = vadd.f32 %v73_v40, %v64_v1  ;;  %v556_v63 = vmul.f32 %v552_v33, %v2348_v4  ;;  %v1055_v58 = vld [vmem:[#allocation5 + $0x130] sm:$0xff] }
  0x25   :  { %145 = vadd.xlane.f32.xlu0 %v2454_v51  ;;  %v620_v48 = vmul.f32 %v618_v62, %v2394_v38  ;;  %v112_v0 = vmul.f32 %v2387_v34, %v108_v44  ;;  %v567_v13 = vmul.f32 %v563_v36, %v2350_v6  ;;  %v578_v57 = vmul.f32 %v574_v52, %v2352_v8 }
  0x26   :  { %v2465_v39 = vadd.f32 %v140_v47, %v131_v7  ;;  %v602_v12 = vadd.f32 %v598_v60, %v591_v45  ;;  %v90_v5 = vadd.f32 %v86_v53, %v77_v2  ;;  %v560_v37 = vadd.f32 %v556_v63, %v549_v61  ;;  %v1066_v47 = vld [vmem:[#allocation5 + $0x140] sm:$0xff]  ;;  %v1077_v7 = vld [vmem:[#allocation5 + $0x150] sm:$0xff] }
  0x27   :  { %v125_v33 = vmul.f32 %v2389_v35, %v121_v56  ;;  %v589_v20 = vmul.f32 %v585_v28, %v2354_v9  ;;  %v1028_v49 = vmul.f32 %v1026_v14, %v2368_v22  ;;  %v1035_v29 = vmul.f32 %v1033_v10, %v2370_v23  ;;  %v1088_v45 = vld [vmem:[#allocation5 + $0x160] sm:$0xff] }
  0x28   :  { %151 = vadd.xlane.f32.xlu1 %v2465_v39  ;;  %v613_v36 = vadd.f32 %v609_v54, %v602_v12  ;;  %v103_v44 = vadd.f32 %v99_v55, %v90_v5  ;;  %v571_v52 = vadd.f32 %v567_v13, %v560_v37  ;;  %v1046_v40 = vmul.f32 %v1044_v11, %v2372_v24 }
  0x29   :  { %v138_v60 = vmul.f32 %v2394_v38, %v134_v46  ;;  %v600_v59 = vmul.f32 %v596_v15, %v2360_v16  ;;  %v1039_v27 = vadd.f32 %v1035_v29, %v1028_v49  ;;  %v1057_v56 = vmul.f32 %v1055_v58, %v2381_v30  ;;  %v1027_v29 = vld [vmem:[#allocation5 + $0x108] sm:$0xff] }
  0x2a   :  { %v2476_v28 = vadd.f32 %v620_v48, %v613_v36  ;;  %v116_v1 = vadd.f32 %v112_v0, %v103_v44  ;;  %v582_v53 = vadd.f32 %v578_v57, %v571_v52  ;;  %v611_v61 = vmul.f32 %v607_v50, %v2362_v17  ;;  %v1099_v57 = vld [vmem:[#allocation5 + $0x170] sm:$0xff] }
  0x2b   :  { %v1050_v54 = vadd.f32 %v1046_v40, %v1039_v27  ;;  %v1068_v55 = vmul.f32 %v1066_v47, %v2383_v31  ;;  %v548_v2 = vmul.f32 %v2366_v19, %v2346_v3  ;;  %v555_v46 = vmul.f32 %v2374_v25, %v2348_v4  ;;  %v1034_v40 = vld [vmem:[#allocation5 + $0x118] sm:$0xff] }
  0x2c   :  { %629 = vadd.xlane.f32.xlu2 %v2476_v28  ;;  %v129_v15 = vadd.f32 %v125_v33, %v116_v1  ;;  %v593_v63 = vadd.f32 %v589_v20, %v582_v53  ;;  %v622_v48 = vmul.f32 %v618_v62, %v2364_v18  ;;  %v566_v50 = vmul.f32 %v2376_v26, %v2350_v6 }
  0x2d   :  { %v1061_v0 = vadd.f32 %v1057_v56, %v1050_v54  ;;  %v1079_v13 = vmul.f32 %v1077_v7, %v2387_v34  ;;  %v559_v12 = vadd.f32 %v555_v46, %v548_v2  ;;  %v577_v19 = vmul.f32 %v2385_v32, %v2352_v8  ;;  %v1056_v56 = vld [vmem:[#allocation5 + $0x138] sm:$0xff]  ;;  %v1067_v2 = vld [vmem:[#allocation5 + $0x148] sm:$0xff] }
  0x2e   :  { %v2491_v5 = vadd.f32 %v138_v60, %v129_v15  ;;  %v604_v25 = vadd.f32 %v600_v59, %v593_v63  ;;  %v1090_v37 = vmul.f32 %v1088_v45, %v2389_v35  ;;  %v588_v33 = vmul.f32 %v2400_v41, %v2354_v9 }
  0x2f   :  { %v1072_v62 = vadd.f32 %v1068_v55, %v1061_v0  ;;  %v570_v20 = vadd.f32 %v566_v50, %v559_v12  ;;  %v1030_v26 = vmul.f32 %v1026_v14, %v2346_v3  ;;  %v1037_v49 = vmul.f32 %v1033_v10, %v2348_v4  ;;  %v1045_v14 = vld [vmem:[#allocation5 + $0x128] sm:$0xff] }
  0x30   :  { %147 = vadd.xlane.f32.xlu0 %v2491_v5  ;;  %v615_v36 = vadd.f32 %v611_v61, %v604_v25  ;;  %v1101_v32 = vmul.f32 %v1099_v57, %v2394_v38  ;;  %v599_v44 = vmul.f32 %v2402_v42, %v2360_v16  ;;  %v1048_v52 = vmul.f32 %v1044_v11, %v2350_v6  ;;  %v1089_v25 = vld [vmem:[#allocation5 + $0x168] sm:$0xff] }
  0x31   :  { %v1083_v60 = vadd.f32 %v1079_v13, %v1072_v62  ;;  %v581_v41 = vadd.f32 %v577_v19, %v570_v20  ;;  %v1041_v59 = vadd.f32 %v1037_v49, %v1030_v26  ;;  %v1059_v27 = vmul.f32 %v1055_v58, %v2352_v8  ;;  %v4023_v58 = vld [vmem:[#allocation11_spill] sm:$0xff]  ;;  %v1078_v13 = vld [vmem:[#allocation5 + $0x158] sm:$0xff] }
  0x32   :  { %v2504_v10 = vadd.f32 %v622_v48, %v615_v36  ;;  %v610_v1 = vmul.f32 %v2404_v43, %v2362_v17  ;;  %v1070_v53 = vmul.f32 %v1066_v47, %v2354_v9  ;;  %v1031_v61 = vmul.f32 %v1027_v29, %v2346_v3  ;;  %v2525_v49 = vld [vmem:[#allocation5 + $0x188] sm:$0xff]  ;;  %v2527_v36 = vld [vmem:[#allocation5 + $0x198] sm:$0xff] }
  0x33   :  { %v1094_v42 = vadd.f32 %v1090_v37, %v1083_v60  ;;  %v592_v54 = vadd.f32 %v588_v33, %v581_v41  ;;  %v1052_v11 = vadd.f32 %v1048_v52, %v1041_v59  ;;  %v1038_v55 = vmul.f32 %v1034_v40, %v2348_v4 }
  0x34   :  { %4022 = vst [vmem:[#allocation13_spill] sm:$0xff] %v2504_v10  ;;  %633 = vadd.xlane.f32.xlu1 %v2504_v10  ;;  %v621_v46 = vmul.f32 %v4023_v58, %v2364_v18  ;;  %v1081_v15 = vmul.f32 %v1077_v7, %v2360_v16  ;;  %v1049_v63 = vmul.f32 %v1045_v14, %v2350_v6  ;;  %v1508_v58 = vld [vmem:[#allocation5 + $0x180] sm:$0xff] }
  0x35   :  { %v1060_v43 = vmul.f32 %v1056_v56, %v2352_v8  ;;  %v2517_v47 = vadd.f32 %v1101_v32, %v1094_v42  ;;  %v603_v48 = vadd.f32 %v599_v44, %v592_v54  ;;  %v1063_v50 = vadd.f32 %v1059_v27, %v1052_v11  ;;  %v1100_v44 = vld [vmem:[#allocation5 + $0x178] sm:$0xff] }
  0x36   :  { %v1042_v0 = vadd.f32 %v1038_v55, %v1031_v61  ;;  %v1092_v12 = vmul.f32 %v1088_v45, %v2362_v17  ;;  %v1071_v19 = vmul.f32 %v1067_v2, %v2354_v9  ;;  %v1029_v37 = vmul.f32 %v1027_v29, %v2368_v22 }
  0x37   :  { %v1036_v33 = vmul.f32 %v1034_v40, %v2370_v23  ;;  %1109 = vadd.xlane.f32.xlu2 %v2517_v47  ;;  %v614_v7 = vadd.f32 %v610_v1, %v603_v48  ;;  %v1074_v62 = vadd.f32 %v1070_v53, %v1063_v50  ;;  %v1047_v26 = vmul.f32 %v1045_v14, %v2372_v24  ;;  %v2532_v40 = vld [vmem:[#allocation5 + $0x1a8] sm:$0xff]  ;;  %v2537_v14 = vld [vmem:[#allocation5 + $0x1b8] sm:$0xff]  ;;  %v1526_v50 = vld [vmem:[#allocation5 + $0x1a0] sm:$0xff] }
  0x38   :  { %v1053_v20 = vadd.f32 %v1049_v63, %v1042_v0  ;;  %v1103_v45 = vmul.f32 %v1099_v57, %v2364_v18  ;;  %v1082_v32 = vmul.f32 %v1078_v13, %v2360_v16  ;;  %v1058_v29 = vmul.f32 %v1056_v56, %v2381_v30  ;;  %v2544_v56 = vld [vmem:[#allocation5 + $0x1c8] sm:$0xff]  ;;  %v2553_v48 = vld [vmem:[#allocation5 + $0x1d8] sm:$0xff] }
  0x39   :  { %v1040_v52 = vadd.f32 %v1036_v33, %v1029_v37  ;;  %v2534_v60 = vadd.f32 %v621_v46, %v614_v7  ;;  %v1085_v41 = vadd.f32 %v1081_v15, %v1074_v62  ;;  %v1093_v27 = vmul.f32 %v1089_v25, %v2362_v17  ;;  %v1515_v46 = vld [vmem:[#allocation5 + $0x190] sm:$0xff] }
  0x3a   :  { %v1064_v59 = vadd.f32 %v1060_v43, %v1053_v20  ;;  %v1069_v53 = vmul.f32 %v1067_v2, %v2383_v31  ;;  %v1511_v57 = vmul.f32 %v2525_v49, %v2368_v22  ;;  %v1518_v61 = vmul.f32 %v2527_v36, %v2370_v23  ;;  %v1537_v33 = vld [vmem:[#allocation5 + $0x1b0] sm:$0xff]  ;;  %v1571_v20 = vld [vmem:[#allocation5 + $0x1e8] sm:$0xff] }
  0x3b   :  { %v1051_v1 = vadd.f32 %v1047_v26, %v1040_v52  ;;  %631 = vadd.xlane.f32.xlu0 %v2534_v60  ;;  %v1096_v42 = vadd.f32 %v1092_v12, %v1085_v41  ;;  %v1104_v11 = vmul.f32 %v1100_v44, %v2364_v18  ;;  %v1529_v55 = vmul.f32 %v2532_v40, %v2372_v24  ;;  %v1548_v52 = vld [vmem:[#allocation5 + $0x1c0] sm:$0xff] }
  0x3c   :  { %v1075_v54 = vadd.f32 %v1071_v19, %v1064_v59  ;;  %v1080_v15 = vmul.f32 %v1078_v13, %v2387_v34  ;;  %v1522_v63 = vadd.f32 %v1518_v61, %v1511_v57  ;;  %v1540_v43 = vmul.f32 %v2537_v14, %v2381_v30 }
  0x3d   :  { %v1062_v2 = vadd.f32 %v1058_v29, %v1051_v1  ;;  %v2555_v0 = vadd.f32 %v1103_v45, %v1096_v42  ;;  %v1091_v19 = vmul.f32 %v1089_v25, %v2389_v35  ;;  %v1551_v37 = vmul.f32 %v2544_v56, %v2383_v31  ;;  %v1582_v1 = vld [vmem:[#allocation5 + $0x1f8] sm:$0xff] }
  0x3e   :  { %v1086_v12 = vadd.f32 %v1082_v32, %v1075_v54  ;;  %v1533_v62 = vadd.f32 %v1529_v55, %v1522_v63  ;;  %v1510_v13 = vmul.f32 %v1508_v58, %v2368_v22  ;;  %v1517_v26 = vmul.f32 %v1515_v46, %v2370_v23  ;;  %v1559_v22 = vld [vmem:[#allocation5 + $0x1d0] sm:$0xff] }
  0x3f   :  { %v1073_v7 = vadd.f32 %v1069_v53, %v1062_v2  ;;  %1113 = vadd.xlane.f32.xlu1 %v2555_v0  ;;  %v1102_v45 = vmul.f32 %v1100_v44, %v2394_v38  ;;  %v1562_v25 = vmul.f32 %v2553_v48, %v2387_v34  ;;  %v1528_v32 = vmul.f32 %v1526_v50, %v2372_v24  ;;  %v1570_v2 = vld [vmem:[#allocation5 + $0x1e0] sm:$0xff] }
  0x40   :  { %v1097_v29 = vadd.f32 %v1093_v27, %v1086_v12  ;;  %v1544_v59 = vadd.f32 %v1540_v43, %v1533_v62  ;;  %v1521_v53 = vadd.f32 %v1517_v26, %v1510_v13  ;;  %v1539_v57 = vmul.f32 %v1537_v33, %v2381_v30  ;;  %v1581_v12 = vld [vmem:[#allocation5 + $0x1f0] sm:$0xff] }
  0x41   :  { %v1084_v41 = vadd.f32 %v1080_v15, %v1073_v7  ;;  %v1573_v23 = vmul.f32 %v1571_v20, %v2389_v35  ;;  %v1550_v27 = vmul.f32 %v1548_v52, %v2383_v31  ;;  %v1512_v44 = vmul.f32 %v1508_v58, %v2346_v3 }
  0x42   :  { %v2568_v61 = vadd.f32 %v1104_v11, %v1097_v29  ;;  %v1555_v54 = vadd.f32 %v1551_v37, %v1544_v59  ;;  %v1532_v55 = vadd.f32 %v1528_v32, %v1521_v53  ;;  %v1519_v24 = vmul.f32 %v1515_v46, %v2348_v4 }
  0x43   :  { %v1095_v42 = vadd.f32 %v1091_v19, %v1084_v41  ;;  %v1584_v15 = vmul.f32 %v1582_v1, %v2394_v38  ;;  %v1561_v30 = vmul.f32 %v1559_v22, %v2387_v34  ;;  %v1530_v11 = vmul.f32 %v1526_v50, %v2350_v6 }
  0x44   :  { %1115 = vadd.xlane.f32.xlu2 %v2568_v61  ;;  %v1541_v63 = vmul.f32 %v1537_v33, %v2352_v8  ;;  %v1566_v31 = vadd.f32 %v1562_v25, %v1555_v54  ;;  %v1543_v58 = vadd.f32 %v1539_v57, %v1532_v55  ;;  %v1523_v19 = vadd.f32 %v1519_v24, %v1512_v44 }
  0x45   :  { %v2579_v43 = vadd.f32 %v1102_v45, %v1095_v42  ;;  %v1572_v37 = vmul.f32 %v1570_v2, %v2389_v35  ;;  %v1552_v46 = vmul.f32 %v1548_v52, %v2354_v9  ;;  %v1513_v7 = vmul.f32 %v2525_v49, %v2346_v3 }
  0x46   :  { %v1520_v34 = vmul.f32 %v2527_v36, %v2348_v4  ;;  %v1577_v50 = vadd.f32 %v1573_v23, %v1566_v31  ;;  %v1554_v33 = vadd.f32 %v1550_v27, %v1543_v58  ;;  %v1534_v62 = vadd.f32 %v1530_v11, %v1523_v19 }
  0x47   :  { %1111 = vadd.xlane.f32.xlu0 %v2579_v43  ;;  %v1531_v13 = vmul.f32 %v2532_v40, %v2350_v6  ;;  %v1583_v26 = vmul.f32 %v1581_v12, %v2394_v38  ;;  %v1542_v35 = vmul.f32 %v2537_v14, %v2352_v8  ;;  %v1563_v4 = vmul.f32 %v1559_v22, %v2360_v16 }
  0x48   :  { %v1524_v29 = vadd.f32 %v1520_v34, %v1513_v7  ;;  %v2593_v52 = vadd.f32 %v1584_v15, %v1577_v50  ;;  %v1565_v3 = vadd.f32 %v1561_v30, %v1554_v33  ;;  %v1545_v49 = vadd.f32 %v1541_v63, %v1534_v62 }
  0x49   :  { %v1553_v45 = vmul.f32 %v2544_v56, %v2354_v9  ;;  %v1574_v38 = vmul.f32 %v1570_v2, %v2362_v17  ;;  %v1564_v8 = vmul.f32 %v2553_v48, %v2360_v16  ;;  %v1585_v41 = vmul.f32 %v1581_v12, %v2364_v18 }
  0x4a   :  { %v1535_v36 = vadd.f32 %v1531_v13, %v1524_v29  ;;  %1593 = vadd.xlane.f32.xlu1 %v2593_v52  ;;  %v1576_v25 = vadd.f32 %v1572_v37, %v1565_v3  ;;  %v1556_v6 = vadd.f32 %v1552_v46, %v1545_v49  ;;  %v1575_v53 = vmul.f32 %v1571_v20, %v2362_v17 }
  0x4b   :  { %v1586_v57 = vmul.f32 %v1582_v1, %v2364_v18 }
  0x4c   :  { %v1546_v40 = vadd.f32 %v1542_v35, %v1535_v36  ;;  %v2602_v14 = vadd.f32 %v1583_v26, %v1576_v25  ;;  %v1567_v32 = vadd.f32 %v1563_v4, %v1556_v6 }
  0x4e   :  { %v1557_v59 = vadd.f32 %v1553_v45, %v1546_v40  ;;  %v1578_v9 = vadd.f32 %v1574_v38, %v1567_v32 }
  0x4f   :  { %1591 = vadd.xlane.f32.xlu0 %v2602_v14 }
  0x50   :  { %v1568_v56 = vadd.f32 %v1564_v8, %v1557_v59  ;;  %v2608_v22 = vadd.f32 %v1585_v41, %v1578_v9 }
  0x52   :  { %4024 = vst [vmem:[#allocation11_spill] sm:$0xff] %v2608_v22  ;;  %v1579_v23 = vadd.f32 %v1575_v53, %v1568_v56  ;;  %1595 = vadd.xlane.f32.xlu2 %v2608_v22 }
  0x54   :  { %v2611_v16 = vadd.f32 %v1586_v57, %v1579_v23 }
  0x56   :  { %4025 = vst [vmem:[#allocation14_spill] sm:$0xff] %v2611_v16 }
  0x57   :  { %1597 = vadd.xlane.f32.xlu0 %v2611_v16 }
  0x92   :  { %v150_v48 = vpop.xlane.xlu1 %149 }
  0x93   :  { %v2614_v44 = vmul.f32 0.0078125, %v150_v48 }
  0x95   :  { %v159_v42 = vmul.f32 %v2614_v44, %v2614_v44 }
  0x96   :  { %v628_v27 = vpop.xlane.xlu2 %627 }
  0x97   :  { %v2618_v54 = vmul.f32 0.0078125, %v628_v27 }
  0x98   :  { %v146_v17 = vpop.xlane.xlu0 %145 }
  0x99   :  { %v639_v2 = vmul.f32 %v2618_v54, %v2618_v54  ;;  %v2628_v30 = vmul.f32 0.0078125, %v146_v17 }
  0x9b   :  { %v152_v20 = vpop.xlane.xlu1 %151  ;;  %v157_v37 = vmul.f32 %v2628_v30, %v2628_v30 }
  0x9c   :  { %v2620_v18 = vmul.f32 0.0078125, %v152_v20 }
  0x9e   :  { %v160_v1 = vmul.f32 %v2620_v18, %v2620_v18 }
  0x9f   :  { %v630_v55 = vpop.xlane.xlu2 %629 }
  0xa0   :  { %v168_v24 = vadd.f32 %v160_v1, %v159_v42  ;;  %v2626_v15 = vmul.f32 0.0078125, %v630_v55 }
  0xa2   :  { %v169_v11 = vrot.slane %v168_v24, 4  ;;  %v640_v63 = vmul.f32 %v2626_v15, %v2626_v15 }
  0xa3   :  { %v148_v31 = vpop.xlane.xlu0 %147 }
  0xa4   :  { %v170_v58 = vadd.f32 %v169_v11, %v168_v24  ;;  %v643_v12 = vadd.f32 %v640_v63, %v639_v2  ;;  %v2632_v19 = vmul.f32 0.0078125, %v148_v31 }
  0xa6   :  { %v171_v46 = vrot.slane %v170_v58, 2  ;;  %v644_v7 = vrot.slane %v643_v12, 4  ;;  %v158_v34 = vmul.f32 %v2632_v19, %v2632_v19 }
  0xa7   :  { %v634_v13 = vpop.xlane.xlu1 %633 }
  0xa8   :  { %v172_v50 = vadd.f32 %v171_v46, %v170_v58  ;;  %v645_v33 = vadd.f32 %v644_v7, %v643_v12  ;;  %v161_v62 = vadd.f32 %v158_v34, %v157_v37  ;;  %v2640_v36 = vmul.f32 0.0078125, %v634_v13 }
  0xaa   :  { %v173_v26 = vrot.slane %v172_v50, 1  ;;  %v646_v29 = vrot.slane %v645_v33, 2  ;;  %v162_v35 = vrot.slane %v161_v62, 4  ;;  %v1110_v8 = vpop.xlane.xlu2 %1109  ;;  %v642_v41 = vmul.f32 %v2640_v36, %v2640_v36 }
  0xab   :  { %v2664_v48 = vmul.f32 0.0078125, %v1110_v8 }
  0xac   :  { %v2638_v3 = vadd.f32 %v173_v26, %v172_v50  ;;  %v647_v49 = vadd.f32 %v646_v29, %v645_v33  ;;  %v163_v4 = vadd.f32 %v162_v35, %v161_v62 }
  0xad   :  { %v2679_v63 = vmul.f32 %v2664_v48, %v2664_v48 }
  0xae   :  { %v2643_v45 = vadd.f32 1e-12, %v2638_v3  ;;  %v2646_v25 = vadd.f32 1.0, %v2638_v3  ;;  %v648_v6 = vrot.slane %v647_v49, 1  ;;  %v164_v38 = vrot.slane %v163_v4, 2  ;;  %v632_v40 = vpop.xlane.xlu0 %631 }
  0xaf   :  { %v2648_v32 = vmul.f32 0.0078125, %v632_v40 }
  0xb0   :  { %2082 = vrsqrt.f32 %v2643_v45  ;;  %v2654_v59 = vadd.f32 %v648_v6, %v647_v49  ;;  %v165_v53 = vadd.f32 %v164_v38, %v163_v4  ;;  %v224_v20 = vand.u32 2147483647, %v2646_v25 }
  0xb1   :  { %2084 = vrcp.f32 %v2646_v25  ;;  %v641_v9 = vmul.f32 %v2648_v32, %v2648_v32  ;;  %v226_v42 = vand.u32 2147483648, %v2646_v25  ;;  %vm193_vm0 = vweird.f32 %v2643_v45 }
  0xb2   :  { %v2659_v56 = vadd.f32 1e-12, %v2654_v59  ;;  %v2662_v57 = vadd.f32 1.0, %v2654_v59  ;;  %v166_v23 = vrot.slane %v165_v53, 1  ;;  %v1114_v17 = vpop.xlane.xlu1 %1113  ;;  %vm220_vm1 = vweird.f32 %v2646_v25 }
  0xb3   :  { %v650_v27 = vadd.f32 %v642_v41, %v641_v9  ;;  %v2681_v31 = vmul.f32 0.0078125, %v1114_v17  ;;  %vm2690_vm2 = vcmp.eq.f32.partialorder %v224_v20, 8.507059e+37  ;;  %v227_v34 = vor.u32 1.1754944e-38, %v226_v42 }
  0xb4   :  { %2086 = vrsqrt.f32 %v2659_v56  ;;  %v2672_v55 = vadd.f32 %v166_v23, %v165_v53  ;;  %v694_v12 = vand.u32 2147483648, %v2662_v57  ;;  %v692_v50 = vand.u32 2147483647, %v2662_v57 }
  0xb5   :  { %2088 = vrcp.f32 %v2662_v57  ;;  %v651_v2 = vrot.slane %v650_v27, 4  ;;  %vm688_vm5 = vweird.f32 %v2662_v57  ;;  %v1123_v4 = vmul.f32 %v2681_v31, %v2681_v31 }
  0xb6   :  { %v2669_v1 = vpop.eup %2082  ;;  %v2687_v37 = vadd.f32 1e-12, %v2672_v55  ;;  %v2696_v33 = vadd.f32 1.0, %v2672_v55  ;;  %vm665_vm6 = vweird.f32 %v2659_v56  ;;  %v695_v8 = vor.u32 1.1754944e-38, %v694_v12 }
  0xb7   :  { %v2085_v24 = vpop.eup %2084  ;;  %v188_v11 = vmul.f32 %v2669_v1, %v2643_v45  ;;  %v1116_v62 = vpop.xlane.xlu2 %1115  ;;  %vm194_vm3 = vweird.f32 %v2669_v1  ;;  %v652_v26 = vadd.f32 %v651_v2, %v650_v27  ;;  %vm2709_vm7 = vcmp.eq.f32.partialorder %v692_v50, 8.507059e+37 }
  0xb8   :  { %v216_v58 = vmul.f32 %v2085_v24, %v2646_v25  ;;  %2090 = vrsqrt.f32 %v2687_v37  ;;  %vm221_vm4 = vweird.f32 %v2085_v24  ;;  %v2706_v41 = vmul.f32 0.0078125, %v1116_v62  ;;  %vm195_vm11 = vmor %vm193_vm0, %vm194_vm3 }
  0xb9   :  { %v189_v46 = vmul.f32 %v2669_v1, %v188_v11  ;;  %2092 = vrcp.f32 %v2696_v33  ;;  %v653_v2 = vrot.slane %v652_v26, 2  ;;  %vm2720_vm9 = vmor %vm220_vm1, %vm221_vm4  ;;  %vm183_vm12 = vweird.f32 %v2687_v37 }
  0xba   :  { %v217_v13 = vsub.f32 1.0, %v216_v58  ;;  %v1112_v29 = vpop.xlane.xlu0 %1111  ;;  %v2087_v35 = vpop.eup %2086  ;;  %vm206_vm13 = vweird.f32 %v2696_v33 }
  0xbb   :  { %v190_v49 = vmul.f32 0.5, %v189_v46  ;;  %v2089_v6 = vpop.eup %2088  ;;  %v660_v40 = vmul.f32 %v2087_v35, %v2659_v56  ;;  %v2714_v17 = vmul.f32 0.0078125, %v1112_v29  ;;  %vm666_vm8 = vweird.f32 %v2087_v35 }
  0xbc   :  { %v218_v38 = vmul.f32 %v2085_v24, %v217_v13  ;;  %v684_v9 = vmul.f32 %v2089_v6, %v2662_v57  ;;  %vm689_vm10 = vweird.f32 %v2089_v6  ;;  %v212_v46 = vand.u32 2147483648, %v2696_v33  ;;  %vm667_vm0 = vmor %vm665_vm6, %vm666_vm8 }
  0xbd   :  { %v191_v53 = vsub.f32 1.5, %v190_v49  ;;  %v661_v42 = vmul.f32 %v2087_v35, %v660_v40  ;;  %v654_v25 = vadd.f32 %v653_v2, %v652_v26  ;;  %v1124_v29 = vmul.f32 %v2706_v41, %v2706_v41  ;;  %vm690_vm15 = vmor %vm688_vm5, %vm689_vm10 }
  0xbe   :  { %v219_v20 = vadd.f32 %v2085_v24, %v218_v38  ;;  %v685_v12 = vsub.f32 1.0, %v684_v9  ;;  %v2091_v50 = vpop.eup %2090  ;;  %v1122_v45 = vmul.f32 %v2714_v17, %v2714_v17  ;;  %v213_v23 = vor.u32 1.1754944e-38, %v212_v46 }
  0xbf   :  { %v192_v11 = vmul.f32 %v2669_v1, %v191_v53  ;;  %v662_v13 = vmul.f32 0.5, %v661_v42  ;;  %v2093_v49 = vpop.eup %2092  ;;  %v178_v53 = vmul.f32 %v2091_v50, %v2687_v37  ;;  %vm184_vm14 = vweird.f32 %v2091_v50 }
  0xc0   :  { %v223_v62 = vsel %vm2720_vm9, %v2085_v24, %v219_v20  ;;  %v686_v40 = vmul.f32 %v2089_v6, %v685_v12  ;;  %v202_v20 = vmul.f32 %v2093_v49, %v2696_v33  ;;  %v1132_v27 = vadd.f32 %v1124_v29, %v1123_v4 }
  0xc1   :  { %v196_v38 = vsel %vm195_vm11, %v2669_v1, %v192_v11  ;;  %v228_v9 = vsel %vm2690_vm2, %v227_v34, %v223_v62  ;;  %v663_v26 = vsub.f32 1.5, %v662_v13  ;;  %v179_v2 = vmul.f32 %v2091_v50, %v178_v53  ;;  %v4032_v53 = vld [vmem:[#allocation12_spill] sm:$0xff]  ;;  %vm185_vm2 = vmor %vm183_vm12, %vm184_vm14 }
  0xc2   :  { %v198_v24 = vmul.f32 %v196_v38, %v2638_v3  ;;  %v687_v42 = vadd.f32 %v2089_v6, %v686_v40  ;;  %v655_v1 = vrot.slane %v654_v25, 1  ;;  %v203_v12 = vsub.f32 1.0, %v202_v20 }
  0xc3   :  { %v664_v58 = vmul.f32 %v2087_v35, %v663_v26  ;;  %v180_v7 = vmul.f32 0.5, %v179_v2  ;;  %vm207_vm1 = vweird.f32 %v2093_v49  ;;  %v1125_v26 = vadd.f32 %v1122_v45, %v2679_v63 }
  0xc4   :  { %v230_v11 = vmul.f32 %v228_v9, %v198_v24  ;;  %v691_v3 = vsel %vm690_vm15, %v2089_v6, %v687_v42  ;;  %v2749_v34 = vadd.f32 %v655_v1, %v654_v25  ;;  %v204_v29 = vmul.f32 %v2093_v49, %v203_v12  ;;  %v1592_v6 = vpop.xlane.xlu0 %1591  ;;  %vm208_vm3 = vmor %vm206_vm13, %vm207_vm1 }
  0xc5   :  { %v668_v38 = vsel %vm667_vm0, %v2087_v35, %v664_v58  ;;  %v696_v57 = vsel %vm2709_vm7, %v695_v8, %v691_v3  ;;  %v181_v4 = vsub.f32 1.5, %v180_v7  ;;  %v1594_v8 = vpop.xlane.xlu1 %1593  ;;  %v4033_v58 = vand.u32 2147483647, %v2696_v33 }
  0xc6   :  { %v233_v62 = vmul.f32 %v230_v11, %v2614_v44  ;;  %v234_v13 = vmul.f32 %v230_v11, %v2620_v18  ;;  %v679_v40 = vmul.f32 %v668_v38, %v2654_v59  ;;  %v2757_v56 = vadd.f32 1e-12, %v2749_v34 }
  0xc7   :  { %v2762_v44 = vadd.f32 1.0, %v2749_v34  ;;  %v1133_v18 = vrot.slane %v1132_v27, 4  ;;  %v182_v9 = vmul.f32 %v2091_v50, %v181_v4  ;;  %v205_v59 = vadd.f32 %v2093_v49, %v204_v29 }
  0xc8   :  { %v237_v24 = vmul.f32 %v233_v62, %v4032_v53  ;;  %v238_v25 = vmul.f32 %v234_v13, %v2465_v39  ;;  %v711_v35 = vmul.f32 %v696_v57, %v679_v40  ;;  %2094 = vrsqrt.f32 %v2757_v56  ;;  %v1596_v57 = vpop.xlane.xlu2 %1595 }
  0xc9   :  { %2096 = vrcp.f32 %v2762_v44  ;;  %v186_v2 = vsel %vm185_vm2, %v2091_v50, %v182_v9  ;;  %v209_v37 = vsel %vm208_vm3, %v2093_v49, %v205_v59  ;;  %vm211_vm4 = vcmp.eq.f32.partialorder %v4033_v58, 8.507059e+37 }
  0xca   :  { %v713_v20 = vmul.f32 %v711_v35, %v2618_v54  ;;  %v714_v42 = vmul.f32 %v711_v35, %v2626_v15  ;;  %v246_v1 = vadd.f32 %v238_v25, %v237_v24  ;;  %v197_v11 = vmul.f32 %v186_v2, %v2672_v55 }
  0xcb   :  { %v2778_v12 = vmul.f32 0.0078125, %v1594_v8  ;;  %v214_v7 = vsel %vm211_vm4, %v213_v23, %v209_v37  ;;  %v1134_v63 = vadd.f32 %v1133_v18, %v1132_v27  ;;  %v1126_v54 = vrot.slane %v1125_v26, 4 }
  0xcc   :  { %v717_v46 = vmul.f32 %v713_v20, %v2448_v21  ;;  %v718_v3 = vmul.f32 %v714_v42, %v2476_v28  ;;  %v229_v45 = vmul.f32 %v214_v7, %v197_v11  ;;  %vm702_vm5 = vweird.f32 %v2762_v44 }
  0xcd   :  { %v1135_v15 = vrot.slane %v1134_v63, 2  ;;  %v2783_v50 = vmul.f32 0.0078125, %v1592_v6  ;;  %v247_v49 = vrot.slane %v246_v1, 4  ;;  %vm675_vm6 = vweird.f32 %v2757_v56  ;;  %v1598_v6 = vpop.xlane.xlu0 %1597 }
  0xce   :  { %v2095_v62 = vpop.eup %2094  ;;  %v706_v13 = vand.u32 2147483647, %v2762_v44  ;;  %v708_v38 = vand.u32 2147483648, %v2762_v44  ;;  %v721_v27 = vadd.f32 %v718_v3, %v717_v46  ;;  %v1604_v29 = vmul.f32 %v2778_v12, %v2778_v12 }
  0xcf   :  { %v2097_v55 = vpop.eup %2096  ;;  %v670_v33 = vmul.f32 %v2095_v62, %v2757_v56  ;;  %v1136_v4 = vadd.f32 %v1135_v15, %v1134_v63  ;;  %v231_v24 = vmul.f32 %v229_v45, %v2628_v30  ;;  %v232_v25 = vmul.f32 %v229_v45, %v2632_v19 }
  0xd0   :  { %v698_v40 = vmul.f32 %v2097_v55, %v2762_v44  ;;  %v1127_v35 = vadd.f32 %v1126_v54, %v1125_v26  ;;  %v1603_v8 = vmul.f32 %v2783_v50, %v2783_v50  ;;  %v2796_v23 = vmul.f32 0.0078125, %v1596_v57 }
  0xd1   :  { %v671_v18 = vmul.f32 %v2095_v62, %v670_v33  ;;  %v1137_v59 = vrot.slane %v1136_v4, 1  ;;  %vm703_vm7 = vweird.f32 %v2097_v55  ;;  %v2798_v2 = vmul.f32 0.0078125, %v1598_v6 }
  0xd2   :  { %v699_v9 = vsub.f32 1.0, %v698_v40  ;;  %v1128_v42 = vrot.slane %v1127_v35, 2  ;;  %v1607_v30 = vadd.f32 %v1604_v29, %v1603_v8  ;;  %v1605_v19 = vmul.f32 %v2796_v23, %v2796_v23  ;;  %vm2815_vm9 = vmor %vm702_vm5, %vm703_vm7 }
  0xd3   :  { %v672_v20 = vmul.f32 0.5, %v671_v18  ;;  %v2800_v11 = vadd.f32 %v1137_v59, %v1136_v4  ;;  %vm676_vm8 = vweird.f32 %v2095_v62  ;;  %v1606_v46 = vmul.f32 %v2798_v2, %v2798_v2 }
  0xd4   :  { %v700_v37 = vmul.f32 %v2097_v55, %v699_v9  ;;  %v1129_v58 = vadd.f32 %v1128_v42, %v1127_v35  ;;  %v1608_v45 = vrot.slane %v1607_v30, 4  ;;  %v248_v40 = vadd.f32 %v247_v49, %v246_v1  ;;  %vm677_vm10 = vmor %vm675_vm6, %vm676_vm8 }
  0xd5   :  { %v673_v26 = vsub.f32 1.5, %v672_v20  ;;  %v2807_v7 = vadd.f32 1e-12, %v2800_v11  ;;  %v2810_v63 = vadd.f32 1.0, %v2800_v11  ;;  %v1614_v57 = vadd.f32 %v1606_v46, %v1605_v19 }
  0xd6   :  { %v701_v3 = vadd.f32 %v2097_v55, %v700_v37  ;;  %v1130_v33 = vrot.slane %v1129_v58, 1  ;;  %v235_v4 = vmul.f32 %v231_v24, %v2454_v51  ;;  %v236_v29 = vmul.f32 %v232_v25, %v2491_v5 }
  0xd7   :  { %v674_v54 = vmul.f32 %v2095_v62, %v673_v26  ;;  %2098 = vrsqrt.f32 %v2807_v7  ;;  %v722_v44 = vrot.slane %v721_v27, 4  ;;  %v709_v35 = vor.u32 1.1754944e-38, %v708_v38 }
  0xd8   :  { %v705_v6 = vsel %vm2815_vm9, %v2097_v55, %v701_v3  ;;  %2100 = vrcp.f32 %v2810_v63  ;;  %vm707_vm11 = vcmp.eq.f32.partialorder %v706_v13, 8.507059e+37  ;;  %v2828_v1 = vadd.f32 %v1130_v33, %v1129_v58 }
  0xd9   :  { %v678_v18 = vsel %vm677_vm10, %v2095_v62, %v674_v54  ;;  %v1609_v49 = vadd.f32 %v1608_v45, %v1607_v30  ;;  %v710_v24 = vsel %vm707_vm11, %v709_v35, %v705_v6  ;;  %v1615_v25 = vrot.slane %v1614_v57, 4 }
  0xda   :  { %v680_v9 = vmul.f32 %v678_v18, %v2749_v34  ;;  %v249_v56 = vrot.slane %v248_v40, 2  ;;  %v2830_v59 = vadd.f32 %v236_v29, %v235_v4  ;;  %v2833_v55 = vadd.f32 1e-12, %v2828_v1 }
  0xdb   :  { %v2836_v62 = vadd.f32 1.0, %v2828_v1  ;;  %v1190_v38 = vand.u32 2147483648, %v2810_v63  ;;  %v1610_v20 = vrot.slane %v1609_v49, 2  ;;  %v2839_v34 = vadd.f32 %v722_v44, %v721_v27 }
  0xdc   :  { %v712_v8 = vmul.f32 %v710_v24, %v680_v9  ;;  %v1188_v42 = vand.u32 2147483647, %v2810_v63  ;;  %2102 = vrsqrt.f32 %v2833_v55  ;;  %v1616_v37 = vadd.f32 %v1615_v25, %v1614_v57 }
  0xdd   :  { %v2099_v13 = vpop.eup %2098  ;;  %v250_v30 = vadd.f32 %v249_v56, %v248_v40  ;;  %2104 = vrcp.f32 %v2836_v62  ;;  %v240_v3 = vrot.slane %v2830_v59, 4  ;;  %vm1157_vm12 = vweird.f32 %v2807_v7 }
  0xde   :  { %v2101_v19 = vpop.eup %2100  ;;  %v715_v26 = vmul.f32 %v712_v8, %v2648_v32  ;;  %v716_v58 = vmul.f32 %v712_v8, %v2640_v36  ;;  %v1152_v46 = vmul.f32 %v2099_v13, %v2807_v7  ;;  %vm1184_vm13 = vweird.f32 %v2810_v63 }
  0xdf   :  { %v1180_v27 = vmul.f32 %v2101_v19, %v2810_v63  ;;  %v1191_v54 = vor.u32 1.1754944e-38, %v1190_v38  ;;  %v1611_v15 = vadd.f32 %v1610_v20, %v1609_v49  ;;  %v724_v33 = vrot.slane %v2839_v34, 2 }
  0xe0   :  { %v1153_v45 = vmul.f32 %v2099_v13, %v1152_v46  ;;  %vm1158_vm14 = vweird.f32 %v2099_v13  ;;  %vm2852_vm15 = vcmp.eq.f32.partialorder %v1188_v42, 8.507059e+37  ;;  %v1617_v57 = vrot.slane %v1616_v37, 2 }
  0xe1   :  { %v1181_v32 = vsub.f32 1.0, %v1180_v27  ;;  %v251_v40 = vrot.slane %v250_v30, 1  ;;  %v719_v4 = vmul.f32 %v715_v26, %v2534_v60  ;;  %v720_v29 = vmul.f32 %v716_v58, %v2504_v10  ;;  %vm1159_vm4 = vmor %vm1157_vm12, %vm1158_vm14 }
  0xe2   :  { %v1154_v6 = vmul.f32 0.5, %v1153_v45  ;;  %v1612_v44 = vrot.slane %v1611_v15, 1  ;;  %v2103_v18 = vpop.eup %2102  ;;  %vm1185_vm0 = vweird.f32 %v2101_v19  ;;  %vm1170_vm1 = vweird.f32 %v2836_v62 }
  0xe3   :  { %v1182_v35 = vmul.f32 %v2101_v19, %v1181_v32  ;;  %v1618_v9 = vadd.f32 %v1617_v57, %v1616_v37  ;;  %v2859_v49 = vadd.f32 %v251_v40, %v250_v30  ;;  %v2105_v24 = vpop.eup %2104  ;;  %v1142_v56 = vmul.f32 %v2103_v18, %v2833_v55  ;;  %vm2872_vm3 = vmor %vm1184_vm13, %vm1185_vm0 }
  0xe4   :  { %v1155_v25 = vsub.f32 1.5, %v1154_v6  ;;  %vm1147_vm2 = vweird.f32 %v2833_v55  ;;  %v1174_v8 = vand.u32 2147483647, %v2836_v62  ;;  %v2864_v38 = vadd.f32 %v1612_v44, %v1611_v15 }
  0xe5   :  { %v1183_v20 = vadd.f32 %v2101_v19, %v1182_v35  ;;  %v1166_v42 = vmul.f32 %v2105_v24, %v2836_v62  ;;  %v1176_v26 = vand.u32 2147483648, %v2836_v62  ;;  %v1619_v58 = vrot.slane %v1618_v9, 1  ;;  %257 = vmax.xlane.f32.xlu2 %v2859_v49 }
  0xe6   :  { %v1156_v37 = vmul.f32 %v2099_v13, %v1155_v25  ;;  %v1143_v46 = vmul.f32 %v2103_v18, %v1142_v56  ;;  %v2877_v27 = vadd.f32 1e-12, %v2864_v38  ;;  %v2880_v45 = vadd.f32 1.0, %v2864_v38 }
  0xe7   :  { %v2882_v15 = vadd.f32 %v720_v29, %v719_v4  ;;  %v1187_v63 = vsel %vm2872_vm3, %v2101_v19, %v1183_v20  ;;  %v1167_v32 = vsub.f32 1.0, %v1166_v42  ;;  %v2889_v57 = vadd.f32 %v1619_v58, %v1618_v9 }
  0xe8   :  { %v1160_v40 = vsel %vm1159_vm4, %v2099_v13, %v1156_v37  ;;  %v1144_v6 = vmul.f32 0.5, %v1143_v46  ;;  %vm2891_vm5 = vcmp.eq.f32.partialorder %v1174_v8, 8.507059e+37  ;;  %2106 = vrsqrt.f32 %v2877_v27 }
  0xe9   :  { %v1162_v4 = vmul.f32 %v1160_v40, %v2800_v11  ;;  %v1168_v29 = vmul.f32 %v2105_v24, %v1167_v32  ;;  %vm1171_vm6 = vweird.f32 %v2105_v24  ;;  %2108 = vrcp.f32 %v2880_v45 }
  0xea   :  { %v1192_v7 = vsel %vm2852_vm15, %v1191_v54, %v1187_v63  ;;  %v1145_v19 = vsub.f32 1.5, %v1144_v6  ;;  %vm1148_vm7 = vweird.f32 %v2103_v18  ;;  %v725_v13 = vadd.f32 %v724_v33, %v2839_v34  ;;  %vm2910_vm8 = vmor %vm1170_vm1, %vm1171_vm6 }
  0xeb   :  { %v1194_v35 = vmul.f32 %v1192_v7, %v1162_v4  ;;  %v1169_v9 = vadd.f32 %v2105_v24, %v1168_v29  ;;  %v2902_v25 = vadd.f32 1e-12, %v2889_v57  ;;  %v2905_v56 = vadd.f32 1.0, %v2889_v57  ;;  %vm1149_vm9 = vmor %vm1147_vm2, %vm1148_vm7 }
  0xec   :  { %v729_v11 = vrot.slane %v2882_v15, 4  ;;  %v1146_v8 = vmul.f32 %v2103_v18, %v1145_v19  ;;  %v1177_v54 = vor.u32 1.1754944e-38, %v1176_v26  ;;  %v1658_v34 = vand.u32 2147483648, %v2880_v45 }
  0xed   :  { %v1197_v33 = vmul.f32 %v1194_v35, %v2681_v31  ;;  %v1198_v20 = vmul.f32 %v1194_v35, %v2706_v41  ;;  %v1173_v42 = vsel %vm2910_vm8, %v2105_v24, %v1169_v9  ;;  %2110 = vrsqrt.f32 %v2902_v25 }
  0xee   :  { %v2107_v62 = vpop.eup %2106  ;;  %v1150_v58 = vsel %vm1149_vm9, %v2103_v18, %v1146_v8  ;;  %v1656_v37 = vand.u32 2147483647, %v2880_v45  ;;  %2112 = vrcp.f32 %v2905_v56  ;;  %v726_v26 = vrot.slane %v725_v13, 1 }
  0xef   :  { %v2109_v30 = vpop.eup %2108  ;;  %v1201_v31 = vmul.f32 %v1197_v33, %v2555_v0  ;;  %v1202_v41 = vmul.f32 %v1198_v20, %v2568_v61  ;;  %v1161_v55 = vmul.f32 %v1150_v58, %v2828_v1  ;;  %v1624_v46 = vmul.f32 %v2107_v62, %v2877_v27 }
  0xf0   :  { %v1178_v24 = vsel %vm2891_vm5, %v1177_v54, %v1173_v42  ;;  %vm1629_vm10 = vweird.f32 %v2877_v27  ;;  %v1648_v18 = vmul.f32 %v2109_v30, %v2880_v45  ;;  %vm1652_vm11 = vweird.f32 %v2880_v45 }
  0xf1   :  { %v1210_v63 = vadd.f32 %v1202_v41, %v1201_v31  ;;  %v1193_v32 = vmul.f32 %v1178_v24, %v1161_v55  ;;  %v1625_v40 = vmul.f32 %v2107_v62, %v1624_v46  ;;  %v1659_v6 = vor.u32 1.1754944e-38, %v1658_v34 }
  0xf2   :  { %vm1630_vm12 = vweird.f32 %v2107_v62  ;;  %v1649_v4 = vsub.f32 1.0, %v1648_v18  ;;  %vm1653_vm13 = vweird.f32 %v2109_v30  ;;  %vm2933_vm14 = vcmp.eq.f32.partialorder %v1656_v37, 8.507059e+37 }
  0xf3   :  { %v2937_v29 = vadd.f32 %v726_v26, %v725_v13  ;;  %v2111_v44 = vpop.eup %2110  ;;  %v1195_v7 = vmul.f32 %v1193_v32, %v2664_v48  ;;  %v1196_v19 = vmul.f32 %v1193_v32, %v2714_v17  ;;  %v1626_v35 = vmul.f32 0.5, %v1625_v40  ;;  %vm2955_vm1 = vmor %vm1652_vm11, %vm1653_vm13 }
  0xf4   :  { %vm1666_vm15 = vweird.f32 %v2905_v56  ;;  %v241_v9 = vadd.f32 %v240_v3, %v2830_v59  ;;  %v2113_v8 = vpop.eup %2112  ;;  %v1211_v36 = vrot.slane %v1210_v63, 4  ;;  %v1650_v54 = vmul.f32 %v2109_v30, %v1649_v4  ;;  %vm1631_vm2 = vmor %vm1629_vm10, %vm1630_vm12 }
  0xf5   :  { %v1634_v34 = vmul.f32 %v2111_v44, %v2902_v25  ;;  %v1670_v13 = vand.u32 2147483647, %v2905_v56  ;;  %737 = vmax.xlane.f32.xlu0 %v2937_v29  ;;  %v1199_v48 = vmul.f32 %v1195_v7, %v2517_v47  ;;  %v1200_v17 = vmul.f32 %v1196_v19, %v2579_v43 }
  0xf6   :  { %v1627_v33 = vsub.f32 1.5, %v1626_v35  ;;  %v1662_v20 = vmul.f32 %v2113_v8, %v2905_v56  ;;  %v1651_v42 = vadd.f32 %v2109_v30, %v1650_v54  ;;  %vm1640_vm0 = vweird.f32 %v2111_v44 }
  0xf7   :  { %v1635_v58 = vmul.f32 %v2111_v44, %v1634_v34  ;;  %v1672_v59 = vand.u32 2147483648, %v2905_v56  ;;  %v1203_v3 = vadd.f32 %v1200_v17, %v1199_v48  ;;  %v242_v41 = vrot.slane %v241_v9, 2 }
  0xf8   :  { %v1628_v37 = vmul.f32 %v2107_v62, %v1627_v33  ;;  %v1663_v31 = vsub.f32 1.0, %v1662_v20  ;;  %v1655_v55 = vsel %vm2955_vm1, %v2109_v30, %v1651_v42  ;;  %v730_v24 = vadd.f32 %v729_v11, %v2882_v15 }
  0xf9   :  { %v1636_v46 = vmul.f32 0.5, %v1635_v58  ;;  %v1212_v18 = vadd.f32 %v1211_v36, %v1210_v63  ;;  %v1204_v32 = vrot.slane %v1203_v3, 4  ;;  %vm1667_vm3 = vweird.f32 %v2113_v8 }
  0xfa   :  { %v1632_v40 = vsel %vm1631_vm2, %v2107_v62, %v1628_v37  ;;  %v1664_v45 = vmul.f32 %v2113_v8, %v1663_v31  ;;  %v243_v19 = vadd.f32 %v242_v41, %v241_v9  ;;  %v731_v35 = vrot.slane %v730_v24, 2  ;;  %vm2971_vm5 = vmor %vm1666_vm15, %vm1667_vm3 }
  0xfb   :  { %v1643_v4 = vmul.f32 %v1632_v40, %v2864_v38  ;;  %v1637_v7 = vsub.f32 1.5, %v1636_v46  ;;  %v1660_v27 = vsel %vm2933_vm14, %v1659_v6, %v1655_v55  ;;  %v1213_v34 = vrot.slane %v1212_v18, 2 }
  0xfc   :  { %v1665_v54 = vadd.f32 %v2113_v8, %v1664_v45  ;;  %v1205_v48 = vadd.f32 %v1204_v32, %v1203_v3  ;;  %vm1639_vm4 = vweird.f32 %v2902_v25  ;;  %v244_v38 = vrot.slane %v243_v19, 1 }
  0xfd   :  { %v1675_v30 = vmul.f32 %v1660_v27, %v1643_v4  ;;  %v1638_v17 = vmul.f32 %v2111_v44, %v1637_v7  ;;  %vm1641_vm6 = vmor %vm1639_vm4, %vm1640_vm0  ;;  %v732_v62 = vadd.f32 %v731_v35, %v730_v24  ;;  %v1214_v63 = vadd.f32 %v1213_v34, %v1212_v18 }
  0xfe   :  { %v1669_v11 = vsel %vm2971_vm5, %v2113_v8, %v1665_v54  ;;  %v1206_v6 = vrot.slane %v1205_v48, 2  ;;  %v1673_v36 = vor.u32 1.1754944e-38, %v1672_v59  ;;  %vm1671_vm7 = vcmp.eq.f32.partialorder %v1670_v13, 8.507059e+37 }
  0xff   :  { %v1677_v1 = vmul.f32 %v1675_v30, %v2783_v50  ;;  %v1678_v9 = vmul.f32 %v1675_v30, %v2778_v12  ;;  %v1642_v25 = vsel %vm1641_vm6, %v2111_v44, %v1638_v17  ;;  %v2981_v33 = vadd.f32 %v244_v38, %v243_v19 }
 0x100   :  { %v1644_v56 = vmul.f32 %v1642_v25, %v2889_v57  ;;  %v1215_v20 = vrot.slane %v1214_v63, 1  ;;  %v1674_v8 = vsel %vm1671_vm7, %v1673_v36, %v1669_v11  ;;  %v1207_v3 = vadd.f32 %v1206_v6, %v1205_v48 }
 0x101   :  { %v1681_v42 = vmul.f32 %v1677_v1, %v2602_v14  ;;  %v1682_v58 = vmul.f32 %v1678_v9, %v2593_v52  ;;  %255 = vmax.xlane.f32.xlu1 %v2981_v33  ;;  %v733_v50 = vrot.slane %v732_v62, 1 }
 0x102   :  { %v1676_v37 = vmul.f32 %v1674_v8, %v1644_v56  ;;  %v2986_v26 = vadd.f32 %v1215_v20, %v1214_v63  ;;  %v1208_v44 = vrot.slane %v1207_v3, 1 }
 0x103   :  { %v1685_v12 = vadd.f32 %v1682_v58, %v1681_v42  ;;  %v2995_v46 = vadd.f32 %v733_v50, %v732_v62 }
 0x104   :  { %4050 = vst [vmem:[#allocation12_spill] sm:$0xff] %v2986_v26  ;;  %v1679_v57 = vmul.f32 %v1676_v37, %v2796_v23  ;;  %v1680_v13 = vmul.f32 %v1676_v37, %v2798_v2  ;;  %1221 = vmax.xlane.f32.xlu0 %v2986_v26  ;;  %v2991_v31 = vadd.f32 %v1208_v44, %v1207_v3 }
 0x105   :  { %v1686_v59 = vrot.slane %v1685_v12, 4  ;;  %4052 = vst [vmem:[#allocation16_spill] sm:$0xff] %v2995_v46 }
 0x106   :  { %4051 = vst [vmem:[#allocation15_spill] sm:$0xff] %v2991_v31  ;;  %v1683_v41 = vmul.f32 %v1679_v57, %v2608_v22  ;;  %v1684_v55 = vmul.f32 %v1680_v13, %v2611_v16  ;;  %1219 = vmax.xlane.f32.xlu2 %v2991_v31 }
 0x107   :  { %v1687_v24 = vadd.f32 %v1686_v59, %v1685_v12 }
 0x108   :  { %v1692_v18 = vadd.f32 %v1684_v55, %v1683_v41 }
 0x109   :  { %v1688_v32 = vrot.slane %v1687_v24, 2  ;;  %739 = vmax.xlane.f32.xlu1 %v2995_v46 }
 0x10a   :  { %v1693_v40 = vrot.slane %v1692_v18, 4 }
 0x10b   :  { %v1689_v23 = vadd.f32 %v1688_v32, %v1687_v24 }
 0x10c   :  { %v1694_v2 = vadd.f32 %v1693_v40, %v1692_v18 }
 0x10d   :  { %v1690_v45 = vrot.slane %v1689_v23, 1 }
 0x10e   :  { %v1695_v4 = vrot.slane %v1694_v2, 2 }
 0x10f   :  { %v2999_v7 = vadd.f32 %v1690_v45, %v1689_v23 }
 0x110   :  { %v1696_v19 = vadd.f32 %v1695_v4, %v1694_v2 }
 0x111   :  { %4053 = vst [vmem:[#allocation17_spill] sm:$0xff] %v2999_v7  ;;  %1701 = vmax.xlane.f32.xlu1 %v2999_v7 }
 0x112   :  { %v1697_v35 = vrot.slane %v1696_v19, 1 }
 0x114   :  { %v3002_v27 = vadd.f32 %v1697_v35, %v1696_v19 }
 0x116   :  { %4054 = vst [vmem:[#allocation18_spill] sm:$0xff] %v3002_v27  ;;  %1703 = vmax.xlane.f32.xlu2 %v3002_v27 }
 0x158   :  { %v258_v54 = vpop.xlane.xlu2 %257 }
 0x159   :  { %v260_v34 = vsub.f32 %v2859_v49, %v258_v54 }
 0x15b   :  { %v263_v48 = vmul.f32 1.442695, %v260_v34 }
 0x15d   :  { %2114 = vpow2.f32 %v263_v48 }
 0x163   :  { %v3006_v30 = vpop.eup %2114 }
 0x164   :  { %267 = vadd.xlane.f32.xlu1 %v3006_v30 }
 0x168   :  { %v738_v17 = vpop.xlane.xlu0 %737 }
 0x169   :  { %v741_v15 = vsub.f32 %v2937_v29, %v738_v17 }
 0x16b   :  { %v743_v38 = vmul.f32 1.442695, %v741_v15 }
 0x16d   :  { %2116 = vpow2.f32 %v743_v38 }
 0x173   :  { %v3010_v11 = vpop.eup %2116 }
 0x174   :  { %747 = vadd.xlane.f32.xlu2 %v3010_v11  ;;  %v256_v62 = vpop.xlane.xlu1 %255 }
 0x175   :  { %v259_v63 = vsub.f32 %v2981_v33, %v256_v62 }
 0x177   :  { %v1222_v6 = vpop.xlane.xlu0 %1221  ;;  %v261_v1 = vmul.f32 1.442695, %v259_v63 }
 0x178   :  { %v1224_v9 = vsub.f32 %v2986_v26, %v1222_v6 }
 0x179   :  { %2118 = vpow2.f32 %v261_v1  ;;  %v1220_v25 = vpop.xlane.xlu2 %1219 }
 0x17a   :  { %v1227_v36 = vmul.f32 1.442695, %v1224_v9  ;;  %v1223_v56 = vsub.f32 %v2991_v31, %v1220_v25 }
 0x17c   :  { %2120 = vpow2.f32 %v1227_v36  ;;  %v740_v20 = vpop.xlane.xlu1 %739  ;;  %v1225_v42 = vmul.f32 1.442695, %v1223_v56 }
 0x17d   :  { %v742_v58 = vsub.f32 %v2995_v46, %v740_v20 }
 0x17e   :  { %2122 = vpow2.f32 %v1225_v42 }
 0x17f   :  { %v3017_v8 = vpop.eup %2118  ;;  %v745_v3 = vmul.f32 1.442695, %v742_v58 }
 0x180   :  { %265 = vadd.xlane.f32.xlu0 %v3017_v8 }
 0x181   :  { %2124 = vpow2.f32 %v745_v3 }
 0x182   :  { %v3020_v37 = vpop.eup %2120 }
 0x183   :  { %1231 = vadd.xlane.f32.xlu2 %v3020_v37 }
 0x184   :  { %v3023_v50 = vpop.eup %2122  ;;  %v1702_v12 = vpop.xlane.xlu1 %1701 }
 0x185   :  { %v1705_v44 = vsub.f32 %v2999_v7, %v1702_v12  ;;  %1229 = vadd.xlane.f32.xlu1 %v3023_v50 }
 0x187   :  { %v3027_v57 = vpop.eup %2124  ;;  %v1707_v13 = vmul.f32 1.442695, %v1705_v44 }
 0x188   :  { %749 = vadd.xlane.f32.xlu0 %v3027_v57 }
 0x189   :  { %v1704_v59 = vpop.xlane.xlu2 %1703  ;;  %2126 = vpow2.f32 %v1707_v13 }
 0x18a   :  { %v1706_v41 = vsub.f32 %v3002_v27, %v1704_v59 }
 0x18c   :  { %v1709_v55 = vmul.f32 1.442695, %v1706_v41 }
 0x18e   :  { %2128 = vpow2.f32 %v1709_v55 }
 0x18f   :  { %v3031_v24 = vpop.eup %2126 }
 0x190   :  { %1711 = vadd.xlane.f32.xlu0 %v3031_v24 }
 0x194   :  { %v3034_v18 = vpop.eup %2128 }
 0x195   :  { %1713 = vadd.xlane.f32.xlu1 %v3034_v18 }
 0x1d7   :  { %v268_v32 = vpop.xlane.xlu1 %267 }
 0x1d8   :  { %2130 = vrcp.f32 %v268_v32  ;;  %v294_v45 = vand.u32 2147483648, %v268_v32  ;;  %v292_v19 = vand.u32 2147483647, %v268_v32  ;;  %vm288_vm9 = vweird.f32 %v268_v32 }
 0x1da   :  { %v295_v34 = vor.u32 1.1754944e-38, %v294_v45  ;;  %vm293_vm11 = vcmp.eq.f32.partialorder %v292_v19, 8.507059e+37 }
 0x1de   :  { %v2131_v40 = vpop.eup %2130 }
 0x1df   :  { %v284_v23 = vmul.f32 %v2131_v40, %v268_v32  ;;  %vm289_vm8 = vweird.f32 %v2131_v40 }
 0x1e0   :  { %vm290_vm10 = vmor %vm288_vm9, %vm289_vm8 }
 0x1e1   :  { %v285_v2 = vsub.f32 1.0, %v284_v23 }
 0x1e3   :  { %v286_v4 = vmul.f32 %v2131_v40, %v285_v2 }
 0x1e5   :  { %v287_v35 = vadd.f32 %v2131_v40, %v286_v4 }
 0x1e7   :  { %v748_v54 = vpop.xlane.xlu2 %747  ;;  %v291_v48 = vsel %vm290_vm10, %v2131_v40, %v287_v35 }
 0x1e8   :  { %2132 = vrcp.f32 %v748_v54  ;;  %v296_v17 = vsel %vm293_vm11, %v295_v34, %v291_v48  ;;  %v762_v9 = vand.u32 2147483648, %v748_v54  ;;  %v760_v36 = vand.u32 2147483647, %v748_v54 }
 0x1e9   :  { %v3038_v15 = vmul.f32 %v3006_v30, %v296_v17  ;;  %vm756_vm13 = vweird.f32 %v748_v54 }
 0x1ea   :  { %v763_v30 = vor.u32 1.1754944e-38, %v762_v9  ;;  %vm761_vm15 = vcmp.eq.f32.partialorder %v760_v36, 8.507059e+37 }
 0x1eb   :  { %v301_v38 = vmul.f32 %v3038_v15, %v4032_v53 }
 0x1ed   :  { %307 = vadd.xlane.f32.xlu1 %v301_v38 }
 0x1ee   :  { %v2133_v62 = vpop.eup %2132 }
 0x1ef   :  { %v752_v63 = vmul.f32 %v2133_v62, %v748_v54  ;;  %vm757_vm12 = vweird.f32 %v2133_v62 }
 0x1f0   :  { %vm758_vm14 = vmor %vm756_vm13, %vm757_vm12 }
 0x1f1   :  { %v753_v6 = vsub.f32 1.0, %v752_v63 }
 0x1f3   :  { %v754_v1 = vmul.f32 %v2133_v62, %v753_v6  ;;  %v266_v25 = vpop.xlane.xlu0 %265 }
 0x1f4   :  { %2134 = vrcp.f32 %v266_v25  ;;  %v280_v23 = vand.u32 2147483648, %v266_v25  ;;  %v278_v2 = vand.u32 2147483647, %v266_v25  ;;  %vm274_vm1 = vweird.f32 %v266_v25 }
 0x1f5   :  { %v755_v20 = vadd.f32 %v2133_v62, %v754_v1 }
 0x1f6   :  { %v3042_v56 = vpop.xlane.xlu2 %1231  ;;  %vm279_vm3 = vcmp.eq.f32.partialorder %v278_v2, 8.507059e+37  ;;  %v281_v17 = vor.u32 1.1754944e-38, %v280_v23 }
 0x1f7   :  { %2136 = vrcp.f32 %v3042_v56  ;;  %v759_v42 = vsel %vm758_vm14, %v2133_v62, %v755_v20  ;;  %vm1252_vm5 = vweird.f32 %v3042_v56  ;;  %v1258_v20 = vand.u32 2147483648, %v3042_v56 }
 0x1f8   :  { %v1230_v58 = vpop.xlane.xlu1 %1229  ;;  %v764_v3 = vsel %vm761_vm15, %v763_v30, %v759_v42  ;;  %v1256_v2 = vand.u32 2147483647, %v3042_v56 }
 0x1f9   :  { %2138 = vrcp.f32 %v1230_v58  ;;  %v3046_v12 = vmul.f32 %v3010_v11, %v764_v3  ;;  %v1244_v62 = vand.u32 2147483648, %v1230_v58  ;;  %v1242_v1 = vand.u32 2147483647, %v1230_v58 }
 0x1fa   :  { %v2135_v44 = vpop.eup %2134  ;;  %vm1238_vm6 = vweird.f32 %v1230_v58  ;;  %vm1257_vm14 = vcmp.eq.f32.partialorder %v1256_v2, 8.507059e+37 }
 0x1fb   :  { %v270_v13 = vmul.f32 %v2135_v44, %v266_v25  ;;  %v3048_v59 = vpop.xlane.xlu0 %749  ;;  %v782_v41 = vmul.f32 %v3046_v12, %v2476_v28  ;;  %vm275_vm0 = vweird.f32 %v2135_v44  ;;  %vm1243_vm9 = vcmp.eq.f32.partialorder %v1242_v1, 8.507059e+37 }
 0x1fc   :  { %2140 = vrcp.f32 %v3048_v59  ;;  %vm276_vm2 = vmor %vm274_vm1, %vm275_vm0  ;;  %vm770_vm12 = vweird.f32 %v3048_v59 }
 0x1fd   :  { %v3052_v55 = vpop.eup %2136  ;;  %v271_v32 = vsub.f32 1.0, %v270_v13  ;;  %787 = vadd.xlane.f32.xlu1 %v782_v41 }
 0x1fe   :  { %v1248_v40 = vmul.f32 %v3052_v55, %v3042_v56  ;;  %vm1253_vm7 = vweird.f32 %v3052_v55 }
 0x1ff   :  { %v2139_v11 = vpop.eup %2138  ;;  %v272_v45 = vmul.f32 %v2135_v44, %v271_v32  ;;  %vm1254_vm11 = vmor %vm1252_vm5, %vm1253_vm7 }
 0x200   :  { %v1249_v4 = vsub.f32 1.0, %v1248_v40  ;;  %v1234_v19 = vmul.f32 %v2139_v11, %v1230_v58  ;;  %vm1239_vm4 = vweird.f32 %v2139_v11  ;;  %v1245_v40 = vor.u32 1.1754944e-38, %v1244_v62 }
 0x201   :  { %v273_v35 = vadd.f32 %v2135_v44, %v272_v45  ;;  %vm1240_vm8 = vmor %vm1238_vm6, %vm1239_vm4 }
 0x202   :  { %v2141_v54 = vpop.eup %2140  ;;  %v1235_v34 = vsub.f32 1.0, %v1234_v19  ;;  %v1250_v48 = vmul.f32 %v3052_v55, %v1249_v4  ;;  %v776_v4 = vand.u32 2147483648, %v3048_v59 }
 0x203   :  { %v766_v38 = vmul.f32 %v2141_v54, %v3048_v59  ;;  %v277_v63 = vsel %vm276_vm2, %v2135_v44, %v273_v35  ;;  %v3059_v6 = vpop.xlane.xlu0 %1711  ;;  %vm771_vm10 = vweird.f32 %v2141_v54  ;;  %v774_v35 = vand.u32 2147483647, %v3048_v59 }
 0x204   :  { %v1236_v9 = vmul.f32 %v2139_v11, %v1235_v34  ;;  %v282_v36 = vsel %vm279_vm3, %v281_v17, %v277_v63  ;;  %2142 = vrcp.f32 %v3059_v6  ;;  %v1251_v3 = vadd.f32 %v3052_v55, %v1250_v48  ;;  %vm772_vm13 = vmor %vm770_vm12, %vm771_vm10 }
 0x205   :  { %v767_v25 = vsub.f32 1.0, %v766_v38  ;;  %v297_v30 = vmul.f32 %v3017_v8, %v282_v36  ;;  %v1259_v34 = vor.u32 1.1754944e-38, %v1258_v20  ;;  %v777_v63 = vor.u32 1.1754944e-38, %v776_v4 }
 0x206   :  { %v1237_v42 = vadd.f32 %v2139_v11, %v1236_v9  ;;  %vm775_vm15 = vcmp.eq.f32.partialorder %v774_v35, 8.507059e+37  ;;  %v1726_v2 = vand.u32 2147483648, %v3059_v6  ;;  %vm1720_vm5 = vweird.f32 %v3059_v6 }
 0x207   :  { %v768_v44 = vmul.f32 %v2141_v54, %v767_v25  ;;  %v300_v13 = vmul.f32 %v297_v30, %v2491_v5  ;;  %v299_v41 = vmul.f32 %v297_v30, %v2454_v51 }
 0x208   :  { %v1714_v32 = vpop.xlane.xlu1 %1713  ;;  %v1241_v23 = vsel %vm1240_vm8, %v2139_v11, %v1237_v42  ;;  %v1255_v11 = vsel %vm1254_vm11, %v3052_v55, %v1251_v3  ;;  %v302_v55 = vmul.f32 %v3038_v15, %v2465_v39  ;;  %v1727_v4 = vor.u32 1.1754944e-38, %v1726_v2 }
 0x209   :  { %2144 = vrcp.f32 %v1714_v32  ;;  %305 = vadd.xlane.f32.xlu0 %v300_v13  ;;  %303 = vadd.xlane.f32.xlu2 %v299_v41  ;;  %v1246_v8 = vsel %vm1243_vm9, %v1245_v40, %v1241_v23  ;;  %v769_v58 = vadd.f32 %v2141_v54, %v768_v44  ;;  %v1260_v38 = vsel %vm1257_vm14, %v1259_v34, %v1255_v11 }
 0x20a   :  { %v2143_v45 = vpop.eup %2142  ;;  %v1261_v19 = vmul.f32 %v3023_v50, %v1246_v8  ;;  %v781_v50 = vmul.f32 %v3046_v12, %v2448_v21  ;;  %v1262_v9 = vmul.f32 %v3020_v37, %v1260_v38  ;;  %v1738_v42 = vand.u32 2147483647, %v1714_v32 }
 0x20b   :  { %v1716_v17 = vmul.f32 %v2143_v45, %v3059_v6  ;;  %v773_v56 = vsel %vm772_vm13, %v2141_v54, %v769_v58  ;;  %v1740_v54 = vand.u32 2147483648, %v1714_v32  ;;  %vm1734_vm1 = vweird.f32 %v1714_v32 }
 0x20c   :  { %v1263_v48 = vmul.f32 %v1261_v19, %v2517_v47  ;;  %v778_v59 = vsel %vm775_vm15, %v777_v63, %v773_v56  ;;  %v1266_v12 = vmul.f32 %v1262_v9, %v2568_v61  ;;  %vm1739_vm3 = vcmp.eq.f32.partialorder %v1738_v42, 8.507059e+37 }
 0x20d   :  { %v1717_v36 = vsub.f32 1.0, %v1716_v17  ;;  %v780_v30 = vmul.f32 %v3027_v57, %v778_v59  ;;  %v1741_v44 = vor.u32 1.1754944e-38, %v1740_v54  ;;  %vm1721_vm4 = vweird.f32 %v2143_v45 }
 0x20e   :  { %1267 = vadd.xlane.f32.xlu1 %v1263_v48  ;;  %v1724_v8 = vand.u32 2147483647, %v3059_v6  ;;  %vm1722_vm6 = vmor %vm1720_vm5, %vm1721_vm4  ;;  %v1265_v11 = vmul.f32 %v1262_v9, %v2555_v0  ;;  %v1264_v35 = vmul.f32 %v1261_v19, %v2579_v43 }
 0x20f   :  { %v2145_v62 = vpop.eup %2144  ;;  %v1718_v3 = vmul.f32 %v2143_v45, %v1717_v36  ;;  %v784_v37 = vmul.f32 %v780_v30, %v2504_v10  ;;  %v783_v13 = vmul.f32 %v780_v30, %v2534_v60 }
 0x210   :  { %v1730_v1 = vmul.f32 %v2145_v62, %v1714_v32  ;;  %vm1735_vm0 = vweird.f32 %v2145_v62  ;;  %vm1725_vm7 = vcmp.eq.f32.partialorder %v1724_v8, 8.507059e+37 }
 0x211   :  { %785 = vadd.xlane.f32.xlu0 %v781_v50  ;;  %309 = vadd.xlane.f32.xlu2 %v302_v55  ;;  %vm1736_vm2 = vmor %vm1734_vm1, %vm1735_vm0  ;;  %v1719_v23 = vadd.f32 %v2143_v45, %v1718_v3 }
 0x212   :  { %v1731_v25 = vsub.f32 1.0, %v1730_v1 }
 0x213   :  { %v1723_v58 = vsel %vm1722_vm6, %v2143_v45, %v1719_v23 }
 0x214   :  { %v1732_v20 = vmul.f32 %v2145_v62, %v1731_v25 }
 0x216   :  { %v1733_v15 = vadd.f32 %v2145_v62, %v1732_v20  ;;  %1273 = vadd.xlane.f32.xlu1 %v1266_v12 }
 0x218   :  { %v1737_v41 = vsel %vm1736_vm2, %v2145_v62, %v1733_v15 }
 0x219   :  { %v1742_v40 = vsel %vm1739_vm3, %v1741_v44, %v1737_v41  ;;  %791 = vadd.xlane.f32.xlu0 %v784_v37  ;;  %789 = vadd.xlane.f32.xlu2 %v783_v13 }
 0x21a   :  { %v1744_v57 = vmul.f32 %v3034_v18, %v1742_v40  ;;  %v1728_v18 = vsel %vm1725_vm7, %v1727_v4, %v1723_v58 }
 0x21b   :  { %v1743_v34 = vmul.f32 %v3031_v24, %v1728_v18 }
 0x21c   :  { %v1747_v32 = vmul.f32 %v1744_v57, %v2608_v22  ;;  %v1748_v6 = vmul.f32 %v1744_v57, %v2611_v16 }
 0x21d   :  { %v1746_v48 = vmul.f32 %v1743_v34, %v2593_v52  ;;  %v1745_v17 = vmul.f32 %v1743_v34, %v2602_v14 }
 0x21e   :  { %1753 = vadd.xlane.f32.xlu1 %v1747_v32 }
 0x221   :  { %1271 = vadd.xlane.f32.xlu0 %v1265_v11  ;;  %1269 = vadd.xlane.f32.xlu2 %v1264_v35 }
 0x229   :  { %1751 = vadd.xlane.f32.xlu0 %v1746_v48  ;;  %1749 = vadd.xlane.f32.xlu2 %v1745_v17 }
 0x231   :  { %1755 = vadd.xlane.f32.xlu2 %v1748_v6 }
 0x260   :  { %v3101_v45 = vpop.xlane.xlu1 %307 }
 0x261   :  { %v313_v36 = vmul.f32 %v3101_v45, %v3101_v45 }
 0x270   :  { %v3111_v63 = vpop.xlane.xlu1 %787 }
 0x271   :  { %v794_v1 = vmul.f32 %v3111_v63, %v3111_v63 }
 0x27c   :  { %v3103_v56 = vpop.xlane.xlu2 %303  ;;  %v3105_v19 = vpop.xlane.xlu0 %305 }
 0x27d   :  { %v311_v38 = vmul.f32 %v3103_v56, %v3103_v56  ;;  %v312_v24 = vmul.f32 %v3105_v19, %v3105_v19 }
 0x27f   :  { %v315_v62 = vadd.f32 %v312_v24, %v311_v38 }
 0x281   :  { %v316_v50 = vrot.slane %v315_v62, 4  ;;  %v3125_v37 = vpop.xlane.xlu1 %1267 }
 0x283   :  { %v317_v55 = vadd.f32 %v316_v50, %v315_v62 }
 0x284   :  { %v3115_v59 = vpop.xlane.xlu2 %309  ;;  %v3117_v9 = vpop.xlane.xlu0 %785 }
 0x285   :  { %v318_v25 = vrot.slane %v317_v55, 2  ;;  %v314_v54 = vmul.f32 %v3115_v59, %v3115_v59  ;;  %v793_v20 = vmul.f32 %v3117_v9, %v3117_v9 }
 0x287   :  { %v319_v30 = vadd.f32 %v318_v25, %v317_v55  ;;  %v322_v42 = vadd.f32 %v314_v54, %v313_v36  ;;  %v797_v12 = vadd.f32 %v794_v1, %v793_v20  ;;  %v1275_v54 = vmul.f32 %v3125_v37, %v3125_v37 }
 0x289   :  { %v320_v3 = vrot.slane %v319_v30, 1  ;;  %v323_v15 = vrot.slane %v322_v42, 4  ;;  %v798_v44 = vrot.slane %v797_v12, 4  ;;  %v3143_v62 = vpop.xlane.xlu1 %1273 }
 0x28b   :  { %v3127_v13 = vadd.f32 %v320_v3, %v319_v30  ;;  %v324_v41 = vadd.f32 %v323_v15, %v322_v42  ;;  %v799_v40 = vadd.f32 %v798_v44, %v797_v12  ;;  %v1278_v3 = vmul.f32 %v3143_v62, %v3143_v62 }
 0x28c   :  { %v3129_v57 = vpop.xlane.xlu2 %789  ;;  %v3131_v23 = vpop.xlane.xlu0 %791 }
 0x28d   :  { %v329_v2 = vadd.f32 1e-12, %v3127_v13  ;;  %v353_v32 = vadd.f32 1.0, %v3127_v13  ;;  %v325_v8 = vrot.slane %v324_v41, 2  ;;  %v800_v58 = vrot.slane %v799_v40, 2 }
 0x28e   :  { %v795_v4 = vmul.f32 %v3129_v57, %v3129_v57  ;;  %v796_v11 = vmul.f32 %v3131_v23, %v3131_v23 }
 0x28f   :  { %2146 = vrsqrt.f32 %v329_v2  ;;  %v326_v35 = vadd.f32 %v325_v8, %v324_v41  ;;  %v801_v18 = vadd.f32 %v800_v58, %v799_v40  ;;  %v364_v44 = vand.u32 2147483647, %v353_v32 }
 0x290   :  { %2148 = vrcp.f32 %v353_v32  ;;  %v804_v34 = vadd.f32 %v796_v11, %v795_v4  ;;  %v366_v8 = vand.u32 2147483648, %v353_v32  ;;  %vm337_vm8 = vweird.f32 %v329_v2 }
 0x291   :  { %v327_v48 = vrot.slane %v326_v35, 1  ;;  %v802_v17 = vrot.slane %v801_v18, 1  ;;  %vm360_vm9 = vweird.f32 %v353_v32  ;;  %vm3174_vm12 = vcmp.eq.f32.partialorder %v364_v44, 8.507059e+37 }
 0x292   :  { %v805_v24 = vrot.slane %v804_v34, 4 }
 0x293   :  { %v3139_v6 = vadd.f32 %v327_v48, %v326_v35  ;;  %v3141_v38 = vadd.f32 %v802_v17, %v801_v18 }
 0x294   :  { %v3153_v20 = vpop.xlane.xlu2 %1269  ;;  %v806_v41 = vadd.f32 %v805_v24, %v804_v34  ;;  %v3167_v4 = vpop.xlane.xlu0 %1271 }
 0x295   :  { %v2147_v50 = vpop.eup %2146  ;;  %v3146_v36 = vadd.f32 1e-12, %v3139_v6  ;;  %v3149_v25 = vadd.f32 1.0, %v3139_v6  ;;  %v3156_v42 = vadd.f32 1e-12, %v3141_v38  ;;  %v3159_v12 = vadd.f32 1.0, %v3141_v38 }
 0x296   :  { %v2149_v55 = vpop.eup %2148  ;;  %v332_v1 = vmul.f32 %v2147_v50, %v329_v2  ;;  %v1276_v58 = vmul.f32 %v3153_v20, %v3153_v20  ;;  %vm338_vm11 = vweird.f32 %v2147_v50  ;;  %v807_v48 = vrot.slane %v806_v41, 2 }
 0x297   :  { %v356_v30 = vmul.f32 %v2149_v55, %v353_v32  ;;  %2150 = vrsqrt.f32 %v3146_v36  ;;  %vm361_vm10 = vweird.f32 %v2149_v55  ;;  %v380_v18 = vand.u32 2147483648, %v3149_v25  ;;  %vm339_vm15 = vmor %vm337_vm8, %vm338_vm11 }
 0x298   :  { %v333_v15 = vmul.f32 %v2147_v50, %v332_v1  ;;  %2152 = vrcp.f32 %v3149_v25  ;;  %v1277_v17 = vmul.f32 %v3167_v4, %v3167_v4  ;;  %vm3181_vm13 = vmor %vm360_vm9, %vm361_vm10  ;;  %vm374_vm14 = vweird.f32 %v3149_v25 }
 0x299   :  { %v357_v40 = vsub.f32 1.0, %v356_v30  ;;  %2154 = vrsqrt.f32 %v3156_v42  ;;  %v367_v30 = vor.u32 1.1754944e-38, %v366_v8  ;;  %v808_v26 = vadd.f32 %v807_v48, %v806_v41 }
 0x29a   :  { %v334_v11 = vmul.f32 0.5, %v333_v15  ;;  %2156 = vrcp.f32 %v3159_v12  ;;  %v1279_v15 = vadd.f32 %v1276_v58, %v1275_v54  ;;  %vm347_vm0 = vweird.f32 %v3146_v36 }
 0x29b   :  { %v358_v35 = vmul.f32 %v2149_v55, %v357_v40  ;;  %v381_v32 = vor.u32 1.1754944e-38, %v380_v18  ;;  %v846_v8 = vand.u32 2147483647, %v3159_v12  ;;  %vm842_vm2 = vweird.f32 %v3159_v12 }
 0x29c   :  { %v335_v34 = vsub.f32 1.5, %v334_v11  ;;  %v378_v11 = vand.u32 2147483647, %v3149_v25  ;;  %v1286_v2 = vadd.f32 %v1278_v3, %v1277_v17  ;;  %vm819_vm3 = vweird.f32 %v3156_v42 }
 0x29d   :  { %v359_v24 = vadd.f32 %v2149_v55, %v358_v35  ;;  %v3178_v27 = vpop.eup %2150  ;;  %v1280_v18 = vrot.slane %v1279_v15, 4  ;;  %v809_v17 = vrot.slane %v808_v26, 1 }
 0x29e   :  { %v336_v40 = vmul.f32 %v2147_v50, %v335_v34  ;;  %v3187_v35 = vpop.eup %2152  ;;  %v342_v44 = vmul.f32 %v3178_v27, %v3146_v36  ;;  %vm348_vm1 = vweird.f32 %v3178_v27  ;;  %vm3206_vm4 = vcmp.eq.f32.partialorder %v378_v11, 8.507059e+37 }
 0x29f   :  { %v363_v54 = vsel %vm3181_vm13, %v2149_v55, %v359_v24  ;;  %v2155_v58 = vpop.eup %2154  ;;  %v370_v41 = vmul.f32 %v3187_v35, %v3149_v25  ;;  %vm375_vm5 = vweird.f32 %v3187_v35  ;;  %v3215_v1 = vadd.f32 %v809_v17, %v808_v26  ;;  %vm349_vm9 = vmor %vm347_vm0, %vm348_vm1 }
 0x2a0   :  { %v340_v34 = vsel %vm339_vm15, %v2147_v50, %v336_v40  ;;  %v2157_v7 = vpop.eup %2156  ;;  %v343_v48 = vmul.f32 %v3178_v27, %v342_v44  ;;  %v814_v24 = vmul.f32 %v2155_v58, %v3156_v42  ;;  %v368_v50 = vsel %vm3174_vm12, %v367_v30, %v363_v54  ;;  %vm3231_vm7 = vmor %vm374_vm14, %vm375_vm5 }
 0x2a1   :  { %v351_v55 = vmul.f32 %v340_v34, %v3127_v13  ;;  %v371_v40 = vsub.f32 1.0, %v370_v41  ;;  %v838_v3 = vmul.f32 %v2157_v7, %v3159_v12  ;;  %v3212_v34 = vpop.xlane.xlu2 %1749  ;;  %vm843_vm6 = vweird.f32 %v2157_v7 }
 0x2a2   :  { %v344_v13 = vmul.f32 0.5, %v343_v48  ;;  %v815_v44 = vmul.f32 %v2155_v58, %v814_v24  ;;  %v3224_v24 = vadd.f32 1.0, %v3215_v1  ;;  %vm820_vm8 = vweird.f32 %v2155_v58  ;;  %vm3249_vm10 = vmor %vm842_vm2, %vm843_vm6 }
 0x2a3   :  { %v383_v22 = vmul.f32 %v368_v50, %v351_v55  ;;  %v372_v31 = vmul.f32 %v3187_v35, %v371_v40  ;;  %v839_v46 = vsub.f32 1.0, %v838_v3  ;;  %v3221_v50 = vadd.f32 1e-12, %v3215_v1  ;;  %vm821_vm11 = vmor %vm819_vm3, %vm820_vm8 }
 0x2a4   :  { %v345_v54 = vsub.f32 1.5, %v344_v13  ;;  %v816_v41 = vmul.f32 0.5, %v815_v44  ;;  %v1287_v36 = vrot.slane %v1286_v2, 4  ;;  %vm847_vm12 = vcmp.eq.f32.partialorder %v846_v8, 8.507059e+37 }
 0x2a5   :  { %v385_v30 = vmul.f32 %v383_v22, %v3103_v56  ;;  %v386_v11 = vmul.f32 %v383_v22, %v3105_v19  ;;  %v373_v55 = vadd.f32 %v3187_v35, %v372_v31  ;;  %v840_v48 = vmul.f32 %v2157_v7, %v839_v46 }
 0x2a6   :  { %v346_v40 = vmul.f32 %v3178_v27, %v345_v54  ;;  %v817_v22 = vsub.f32 1.5, %v816_v41  ;;  %v848_v31 = vand.u32 2147483648, %v3159_v12  ;;  %2158 = vrsqrt.f32 %v3221_v50 }
 0x2a7   :  { %v377_v46 = vsel %vm3231_vm7, %v3187_v35, %v373_v55  ;;  %v841_v56 = vadd.f32 %v2157_v7, %v840_v48  ;;  %v1281_v19 = vadd.f32 %v1280_v18, %v1279_v15  ;;  %v389_v25 = vmul.f32 %v385_v30, %v2454_v51  ;;  %v3269_v48 = vpop.xlane.xlu0 %1751 }
 0x2a8   :  { %v350_v3 = vsel %vm349_vm9, %v3178_v27, %v346_v40  ;;  %v818_v17 = vmul.f32 %v2155_v58, %v817_v22  ;;  %v390_v44 = vmul.f32 %v386_v11, %v2491_v5  ;;  %2160 = vrcp.f32 %v3224_v24  ;;  %v3260_v27 = vpop.xlane.xlu1 %1753 }
 0x2a9   :  { %v352_v35 = vmul.f32 %v350_v3, %v3139_v6  ;;  %v845_v15 = vsel %vm3249_vm10, %v2157_v7, %v841_v56  ;;  %v382_v12 = vsel %vm3206_vm4, %v381_v32, %v377_v46  ;;  %v849_v30 = vor.u32 1.1754944e-38, %v848_v31  ;;  %v3271_v40 = vpop.xlane.xlu2 %1755 }
 0x2aa   :  { %v822_v18 = vsel %vm821_vm11, %v2155_v58, %v818_v17  ;;  %v1282_v6 = vrot.slane %v1281_v19, 2  ;;  %v1288_v42 = vadd.f32 %v1287_v36, %v1286_v2  ;;  %v1759_v55 = vmul.f32 %v3260_v27, %v3260_v27 }
 0x2ab   :  { %v384_v54 = vmul.f32 %v382_v12, %v352_v35  ;;  %v833_v11 = vmul.f32 %v822_v18, %v3141_v38  ;;  %v850_v41 = vsel %vm847_vm12, %v849_v30, %v845_v15  ;;  %v1757_v7 = vmul.f32 %v3212_v34, %v3212_v34 }
 0x2ac   :  { %v2159_v16 = vpop.eup %2158  ;;  %v3273_v32 = vadd.f32 %v390_v44, %v389_v25  ;;  %vm829_vm13 = vweird.f32 %v3221_v50  ;;  %v862_v26 = vand.u32 2147483648, %v3224_v24  ;;  %v1283_v22 = vadd.f32 %v1282_v6, %v1281_v19 }
 0x2ad   :  { %v387_v58 = vmul.f32 %v384_v54, %v3101_v45  ;;  %v388_v38 = vmul.f32 %v384_v54, %v3115_v59  ;;  %v865_v8 = vmul.f32 %v850_v41, %v833_v11  ;;  %v824_v2 = vmul.f32 %v2159_v16, %v3221_v50 }
 0x2ae   :  { %v1289_v31 = vrot.slane %v1288_v42, 2  ;;  %v2161_v46 = vpop.eup %2160  ;;  %v1758_v25 = vmul.f32 %v3269_v48, %v3269_v48  ;;  %v1760_v45 = vmul.f32 %v3271_v40, %v3271_v40  ;;  %vm830_vm14 = vweird.f32 %v2159_v16 }
 0x2af   :  { %v867_v56 = vmul.f32 %v865_v8, %v3117_v9  ;;  %v868_v3 = vmul.f32 %v865_v8, %v3111_v63  ;;  %v825_v59 = vmul.f32 %v2159_v16, %v824_v2  ;;  %v852_v17 = vmul.f32 %v2161_v46, %v3224_v24  ;;  %vm831_vm1 = vmor %vm829_vm13, %vm830_vm14 }
 0x2b0   :  { %v1284_v13 = vrot.slane %v1283_v22, 1  ;;  %v391_v36 = vmul.f32 %v387_v58, %v4032_v53  ;;  %v392_v19 = vmul.f32 %v388_v38, %v2465_v39  ;;  %vm857_vm15 = vweird.f32 %v2161_v46 }
 0x2b1   :  { %v1290_v44 = vadd.f32 %v1289_v31, %v1288_v42  ;;  %v871_v9 = vmul.f32 %v867_v56, %v2448_v21  ;;  %v826_v63 = vmul.f32 0.5, %v825_v59  ;;  %v853_v35 = vsub.f32 1.0, %v852_v17 }
 0x2b2   :  { %v3290_v15 = vadd.f32 %v1284_v13, %v1283_v22  ;;  %v872_v12 = vmul.f32 %v868_v3, %v2476_v28  ;;  %v1761_v30 = vadd.f32 %v1758_v25, %v1757_v7  ;;  %v1768_v54 = vadd.f32 %v1760_v45, %v1759_v55 }
 0x2b3   :  { %v1291_v18 = vrot.slane %v1290_v44, 1  ;;  %v827_v11 = vsub.f32 1.5, %v826_v63  ;;  %v854_v6 = vmul.f32 %v2161_v46, %v853_v35  ;;  %vm856_vm0 = vweird.f32 %v3224_v24 }
 0x2b4   :  { %v3294_v41 = vadd.f32 1e-12, %v3290_v15  ;;  %v3297_v58 = vadd.f32 1.0, %v3290_v15  ;;  %v860_v42 = vand.u32 2147483647, %v3224_v24  ;;  %v863_v38 = vor.u32 1.1754944e-38, %v862_v26  ;;  %vm858_vm2 = vmor %vm856_vm0, %vm857_vm15 }
 0x2b5   :  { %v3301_v8 = vadd.f32 %v1291_v18, %v1290_v44  ;;  %v400_v2 = vadd.f32 %v392_v19, %v391_v36  ;;  %v828_v22 = vmul.f32 %v2159_v16, %v827_v11  ;;  %v855_v55 = vadd.f32 %v2161_v46, %v854_v6 }
 0x2b6   :  { %2162 = vrsqrt.f32 %v3294_v41  ;;  %v3307_v7 = vadd.f32 %v872_v12, %v871_v9  ;;  %v1762_v31 = vrot.slane %v1761_v30, 4  ;;  %v1769_v24 = vrot.slane %v1768_v54, 4 }
 0x2b7   :  { %2164 = vrcp.f32 %v3297_v58  ;;  %v832_v26 = vsel %vm831_vm1, %v2159_v16, %v828_v22  ;;  %v859_v56 = vsel %vm858_vm2, %v2161_v46, %v855_v55  ;;  %v3312_v3 = vadd.f32 1e-12, %v3301_v8 }
 0x2b8   :  { %v3315_v25 = vadd.f32 1.0, %v3301_v8  ;;  %v834_v50 = vmul.f32 %v832_v26, %v3215_v1  ;;  %vm861_vm3 = vcmp.eq.f32.partialorder %v860_v42, 8.507059e+37  ;;  %v1330_v59 = vand.u32 2147483648, %v3297_v58 }
 0x2b9   :  { %v864_v45 = vsel %vm861_vm3, %v863_v38, %v859_v56  ;;  %2166 = vrsqrt.f32 %v3312_v3  ;;  %v394_v17 = vrot.slane %v3273_v32, 4  ;;  %v1763_v16 = vadd.f32 %v1762_v31, %v1761_v30 }
 0x2ba   :  { %v866_v13 = vmul.f32 %v864_v45, %v834_v50  ;;  %2168 = vrcp.f32 %v3315_v25  ;;  %v401_v36 = vrot.slane %v400_v2, 4  ;;  %v1328_v44 = vand.u32 2147483647, %v3297_v58 }
 0x2bb   :  { %v1770_v9 = vadd.f32 %v1769_v24, %v1768_v54  ;;  %vm1301_vm4 = vweird.f32 %v3294_v41  ;;  %vm1324_vm5 = vweird.f32 %v3297_v58  ;;  %v1331_v30 = vor.u32 1.1754944e-38, %v1330_v59 }
 0x2bc   :  { %v2163_v46 = vpop.eup %2162  ;;  %v869_v63 = vmul.f32 %v866_v13, %v3129_v57  ;;  %v870_v35 = vmul.f32 %v866_v13, %v3131_v23  ;;  %v1764_v11 = vrot.slane %v1763_v16, 2  ;;  %v1342_v42 = vand.u32 2147483647, %v3315_v25 }
 0x2bd   :  { %v2165_v1 = vpop.eup %2164  ;;  %v1296_v12 = vmul.f32 %v2163_v46, %v3294_v41  ;;  %v1344_v54 = vand.u32 2147483648, %v3315_v25  ;;  %v1771_v38 = vrot.slane %v1770_v9, 2  ;;  %vm3334_vm6 = vcmp.eq.f32.partialorder %v1328_v44, 8.507059e+37 }
 0x2be   :  { %v1320_v18 = vmul.f32 %v2165_v1, %v3297_v58  ;;  %v873_v57 = vmul.f32 %v869_v63, %v2534_v60  ;;  %v874_v23 = vmul.f32 %v870_v35, %v2504_v10  ;;  %vm1338_vm7 = vweird.f32 %v3315_v25 }
 0x2bf   :  { %v1297_v6 = vmul.f32 %v2163_v46, %v1296_v12  ;;  %v2167_v22 = vpop.eup %2166  ;;  %v1765_v24 = vadd.f32 %v1764_v11, %v1763_v16  ;;  %vm1311_vm8 = vweird.f32 %v3312_v3  ;;  %v395_v45 = vadd.f32 %v394_v17, %v3273_v32 }
 0x2c0   :  { %v1321_v55 = vsub.f32 1.0, %v1320_v18  ;;  %v2169_v26 = vpop.eup %2168  ;;  %v1306_v50 = vmul.f32 %v2167_v22, %v3312_v3  ;;  %v402_v59 = vadd.f32 %v401_v36, %v400_v2  ;;  %vm1325_vm9 = vweird.f32 %v2165_v1 }
 0x2c1   :  { %v1298_v56 = vmul.f32 0.5, %v1297_v6  ;;  %v1334_v63 = vmul.f32 %v2169_v26, %v3315_v25  ;;  %v1766_v44 = vrot.slane %v1765_v24, 1  ;;  %vm1302_vm10 = vweird.f32 %v2163_v46  ;;  %vm3353_vm12 = vmor %vm1324_vm5, %vm1325_vm9 }
 0x2c2   :  { %v1322_v13 = vmul.f32 %v2165_v1, %v1321_v55  ;;  %v1307_v12 = vmul.f32 %v2167_v22, %v1306_v50  ;;  %v1772_v18 = vadd.f32 %v1771_v38, %v1770_v9  ;;  %v3343_v19 = vadd.f32 %v874_v23, %v873_v57  ;;  %vm1303_vm14 = vmor %vm1301_vm4, %vm1302_vm10 }
 0x2c3   :  { %v1299_v35 = vsub.f32 1.5, %v1298_v56  ;;  %v1335_v11 = vsub.f32 1.0, %v1334_v63  ;;  %vm3345_vm11 = vcmp.eq.f32.partialorder %v1342_v42, 8.507059e+37  ;;  %v3349_v10 = vadd.f32 %v1766_v44, %v1765_v24 }
 0x2c4   :  { %v1323_v16 = vadd.f32 %v2165_v1, %v1322_v13  ;;  %v1308_v17 = vmul.f32 0.5, %v1307_v12  ;;  %vm1339_vm13 = vweird.f32 %v2169_v26  ;;  %v1773_v36 = vrot.slane %v1772_v18, 1 }
 0x2c5   :  { %v1300_v32 = vmul.f32 %v2163_v46, %v1299_v35  ;;  %v1336_v42 = vmul.f32 %v2169_v26, %v1335_v11  ;;  %v3362_v38 = vadd.f32 1e-12, %v3349_v10  ;;  %v3365_v57 = vadd.f32 1.0, %v3349_v10  ;;  %vm3376_vm0 = vmor %vm1338_vm7, %vm1339_vm13 }
 0x2c6   :  { %v1327_v9 = vsel %vm3353_vm12, %v2165_v1, %v1323_v16  ;;  %v1309_v23 = vsub.f32 1.5, %v1308_v17  ;;  %vm1312_vm15 = vweird.f32 %v2167_v22  ;;  %v3367_v55 = vadd.f32 %v1773_v36, %v1772_v18 }
 0x2c7   :  { %v1304_v58 = vsel %vm1303_vm14, %v2163_v46, %v1300_v32  ;;  %v1337_v56 = vadd.f32 %v2169_v26, %v1336_v42  ;;  %2170 = vrsqrt.f32 %v3362_v38  ;;  %v396_v41 = vrot.slane %v395_v45, 2  ;;  %vm1313_vm1 = vmor %vm1311_vm8, %vm1312_vm15 }
 0x2c8   :  { %v1315_v24 = vmul.f32 %v1304_v58, %v3290_v15  ;;  %v1332_v1 = vsel %vm3334_vm6, %v1331_v30, %v1327_v9  ;;  %v1310_v50 = vmul.f32 %v2167_v22, %v1309_v23  ;;  %2172 = vrcp.f32 %v3365_v57 }
 0x2c9   :  { %v403_v46 = vrot.slane %v402_v59, 2  ;;  %v1341_v15 = vsel %vm3376_vm0, %v2169_v26, %v1337_v56  ;;  %v1345_v31 = vor.u32 1.1754944e-38, %v1344_v54  ;;  %v3386_v30 = vadd.f32 1e-12, %v3367_v55 }
 0x2ca   :  { %v1347_v63 = vmul.f32 %v1332_v1, %v1315_v24  ;;  %v883_v25 = vrot.slane %v3343_v19, 4  ;;  %v1314_v44 = vsel %vm1313_vm1, %v2167_v22, %v1310_v50  ;;  %v1812_v35 = vand.u32 2147483648, %v3365_v57 }
 0x2cb   :  { %v3391_v12 = vadd.f32 1.0, %v3367_v55  ;;  %v1316_v16 = vmul.f32 %v1314_v44, %v3301_v8  ;;  %v397_v11 = vadd.f32 %v396_v41, %v395_v45  ;;  %v1346_v54 = vsel %vm3345_vm11, %v1345_v31, %v1341_v15 }
 0x2cc   :  { %v1349_v18 = vmul.f32 %v1347_v63, %v3125_v37  ;;  %v1350_v3 = vmul.f32 %v1347_v63, %v3153_v20  ;;  %v1810_v26 = vand.u32 2147483647, %v3365_v57  ;;  %2174 = vrsqrt.f32 %v3386_v30 }
 0x2cd   :  { %v404_v22 = vadd.f32 %v403_v46, %v402_v59  ;;  %v2171_v32 = vpop.eup %2170  ;;  %v1348_v36 = vmul.f32 %v1346_v54, %v1316_v16  ;;  %2176 = vrcp.f32 %v3391_v12  ;;  %vm1783_vm2 = vweird.f32 %v3362_v38 }
 0x2ce   :  { %v1353_v2 = vmul.f32 %v1349_v18, %v2517_v47  ;;  %v1354_v17 = vmul.f32 %v1350_v3, %v2579_v43  ;;  %v2173_v37 = vpop.eup %2172  ;;  %v1778_v20 = vmul.f32 %v2171_v32, %v3362_v38  ;;  %vm1806_vm3 = vweird.f32 %v3365_v57 }
 0x2cf   :  { %v1813_v8 = vor.u32 1.1754944e-38, %v1812_v35  ;;  %v1824_v45 = vand.u32 2147483647, %v3391_v12  ;;  %v1351_v59 = vmul.f32 %v1348_v36, %v3167_v4  ;;  %v1352_v9 = vmul.f32 %v1348_v36, %v3143_v62 }
 0x2d0   :  { %v1357_v6 = vadd.f32 %v1354_v17, %v1353_v2  ;;  %v1802_v42 = vmul.f32 %v2173_v37, %v3365_v57  ;;  %v1779_v58 = vmul.f32 %v2171_v32, %v1778_v20  ;;  %vm1784_vm4 = vweird.f32 %v2171_v32  ;;  %v4081_v20 = vld [vmem:[#allocation15_spill] sm:$0xff] }
 0x2d1   :  { %v1826_v23 = vand.u32 2147483648, %v3391_v12  ;;  %v398_v24 = vrot.slane %v397_v11, 1  ;;  %v1355_v56 = vmul.f32 %v1351_v59, %v2555_v0  ;;  %v1356_v41 = vmul.f32 %v1352_v9, %v2568_v61  ;;  %vm1785_vm11 = vmor %vm1783_vm2, %vm1784_vm4 }
 0x2d2   :  { %v1803_v1 = vsub.f32 1.0, %v1802_v42  ;;  %vm1807_vm5 = vweird.f32 %v2173_v37  ;;  %vm3413_vm6 = vcmp.eq.f32.partialorder %v1810_v26, 8.507059e+37  ;;  %v2175_v4 = vpop.eup %2174  ;;  %v1780_v13 = vmul.f32 0.5, %v1779_v58 }
 0x2d3   :  { %vm1820_vm7 = vweird.f32 %v3391_v12  ;;  %v399_v62 = vadd.f32 %v398_v24, %v397_v11  ;;  %v405_v46 = vrot.slane %v404_v22, 1  ;;  %v4075_v63 = vrot.slane %v3307_v7, 4  ;;  %v2177_v31 = vpop.eup %2176  ;;  %vm3430_vm10 = vmor %vm1806_vm3, %vm1807_vm5 }
 0x2d4   :  { %v1358_v44 = vrot.slane %v1357_v6, 4  ;;  %v1364_v35 = vadd.f32 %v1356_v41, %v1355_v56  ;;  %v1804_v18 = vmul.f32 %v2173_v37, %v1803_v1  ;;  %v1788_v3 = vmul.f32 %v2175_v4, %v3386_v30 }
 0x2d5   :  { %v877_v15 = vadd.f32 %v4075_v63, %v3307_v7  ;;  %vm1793_vm8 = vweird.f32 %v3386_v30  ;;  %v1781_v16 = vsub.f32 1.5, %v1780_v13  ;;  %vm1794_vm9 = vweird.f32 %v2175_v4 }
 0x2d6   :  { %v1816_v54 = vmul.f32 %v2177_v31, %v3391_v12  ;;  %v3425_v26 = vadd.f32 %v399_v62, %v2981_v33  ;;  %v1365_v11 = vrot.slane %v1364_v35, 4  ;;  %v1805_v2 = vadd.f32 %v2173_v37, %v1804_v18  ;;  %vm1795_vm14 = vmor %vm1793_vm8, %vm1794_vm9 }
 0x2d7   :  { %v1789_v17 = vmul.f32 %v2175_v4, %v1788_v3  ;;  %v406_v36 = vadd.f32 %v405_v46, %v404_v22  ;;  %v1782_v7 = vmul.f32 %v2171_v32, %v1781_v16  ;;  %v878_v9 = vrot.slane %v877_v15, 2 }
 0x2d8   :  { %v1817_v59 = vsub.f32 1.0, %v1816_v54  ;;  %409 = vmax.xlane.f32.xlu0 %v3425_v26  ;;  %v884_v42 = vadd.f32 %v883_v25, %v3343_v19  ;;  %v1809_v33 = vsel %vm3430_vm10, %v2173_v37, %v1805_v2  ;;  %v1359_v58 = vadd.f32 %v1358_v44, %v1357_v6 }
 0x2d9   :  { %v1790_v22 = vmul.f32 0.5, %v1789_v17  ;;  %v3442_v57 = vadd.f32 %v406_v36, %v2859_v49  ;;  %v1786_v24 = vsel %vm1785_vm11, %v2171_v32, %v1782_v7  ;;  %vm1821_vm12 = vweird.f32 %v2177_v31 }
 0x2da   :  { %v1818_v56 = vmul.f32 %v2177_v31, %v1817_v59  ;;  %v879_v41 = vadd.f32 %v878_v9, %v877_v15  ;;  %v1797_v1 = vmul.f32 %v1786_v24, %v3349_v10  ;;  %v885_v19 = vrot.slane %v884_v42, 2  ;;  %vm3450_vm13 = vmor %vm1820_vm7, %vm1821_vm12 }
 0x2db   :  { %v1791_v13 = vsub.f32 1.5, %v1790_v22  ;;  %411 = vmax.xlane.f32.xlu1 %v3442_v57  ;;  %v1360_v38 = vrot.slane %v1359_v58, 2  ;;  %v1814_v25 = vsel %vm3413_vm6, %v1813_v8, %v1809_v33  ;;  %v1366_v46 = vadd.f32 %v1365_v11, %v1364_v35  ;;  %v4082_v33 = vld [vmem:[#allocation11_spill] sm:$0xff] }
 0x2dc   :  { %v1819_v37 = vadd.f32 %v2177_v31, %v1818_v56  ;;  %v880_v62 = vrot.slane %v879_v41, 1  ;;  %v1829_v49 = vmul.f32 %v1814_v25, %v1797_v1  ;;  %v886_v10 = vadd.f32 %v885_v19, %v884_v42  ;;  %v4084_v56 = vld [vmem:[#allocation12_spill] sm:$0xff] }
 0x2dd   :  { %v1792_v63 = vmul.f32 %v2175_v4, %v1791_v13  ;;  %v1361_v6 = vadd.f32 %v1360_v38, %v1359_v58  ;;  %vm1825_vm15 = vcmp.eq.f32.partialorder %v1824_v45, 8.507059e+37  ;;  %v1367_v15 = vrot.slane %v1366_v46, 2  ;;  %v4083_v58 = vld [vmem:[#allocation14_spill] sm:$0xff] }
 0x2de   :  { %v1823_v8 = vsel %vm3450_vm13, %v2177_v31, %v1819_v37  ;;  %v881_v50 = vadd.f32 %v880_v62, %v879_v41  ;;  %v1831_v44 = vmul.f32 %v1829_v49, %v3212_v34  ;;  %v1832_v35 = vmul.f32 %v1829_v49, %v3269_v48  ;;  %v4085_v49 = vld [vmem:[#allocation17_spill] sm:$0xff] }
 0x2df   :  { %v1796_v18 = vsel %vm1795_vm14, %v2175_v4, %v1792_v63  ;;  %v1827_v3 = vor.u32 1.1754944e-38, %v1826_v23  ;;  %v887_v54 = vrot.slane %v886_v10, 1  ;;  %v1362_v11 = vrot.slane %v1361_v6, 1  ;;  %v4080_v23 = vld [vmem:[#allocation16_spill] sm:$0xff] }
 0x2e0   :  { %v1798_v16 = vmul.f32 %v1796_v18, %v3367_v55  ;;  %v889_v30 = vadd.f32 %v881_v50, %v2937_v29  ;;  %v1835_v31 = vmul.f32 %v1831_v44, %v2602_v14  ;;  %v1836_v45 = vmul.f32 %v1832_v35, %v2593_v52 }
 0x2e1   :  { %v1828_v2 = vsel %vm1825_vm15, %v1827_v3, %v1823_v8  ;;  %v1368_v17 = vadd.f32 %v1367_v15, %v1366_v46  ;;  %v888_v34 = vadd.f32 %v887_v54, %v886_v10  ;;  %v1363_v48 = vadd.f32 %v1362_v11, %v1361_v6  ;;  %v4086_v6 = vld [vmem:[#allocation18_spill] sm:$0xff] }
 0x2e2   :  { %v1830_v36 = vmul.f32 %v1828_v2, %v1798_v16  ;;  %891 = vmax.xlane.f32.xlu2 %v889_v30  ;;  %v1839_v4 = vadd.f32 %v1836_v45, %v1835_v31 }
 0x2e3   :  { %v1369_v7 = vrot.slane %v1368_v17, 1  ;;  %v890_v29 = vadd.f32 %v888_v34, %v4080_v23  ;;  %v1371_v59 = vadd.f32 %v1363_v48, %v4081_v20 }
 0x2e4   :  { %v1833_v12 = vmul.f32 %v1830_v36, %v3260_v27  ;;  %v1834_v55 = vmul.f32 %v1830_v36, %v3271_v40  ;;  %v1840_v9 = vrot.slane %v1839_v4, 4 }
 0x2e5   :  { %v1370_v42 = vadd.f32 %v1369_v7, %v1368_v17  ;;  %893 = vmax.xlane.f32.xlu0 %v890_v29  ;;  %1373 = vmax.xlane.f32.xlu1 %v1371_v59 }
 0x2e6   :  { %v1837_v22 = vmul.f32 %v1833_v12, %v4082_v33  ;;  %v1838_v24 = vmul.f32 %v1834_v55, %v4083_v58  ;;  %v1841_v1 = vadd.f32 %v1840_v9, %v1839_v4 }
 0x2e7   :  { %v1372_v41 = vadd.f32 %v1370_v42, %v4084_v56 }
 0x2e8   :  { %v1846_v13 = vadd.f32 %v1838_v24, %v1837_v22  ;;  %v1842_v19 = vrot.slane %v1841_v1, 2 }
 0x2ea   :  { %v1847_v27 = vrot.slane %v1846_v13, 4  ;;  %1375 = vmax.xlane.f32.xlu2 %v1372_v41  ;;  %v1843_v40 = vadd.f32 %v1842_v19, %v1841_v1 }
 0x2ec   :  { %v1848_v38 = vadd.f32 %v1847_v27, %v1846_v13  ;;  %v1844_v25 = vrot.slane %v1843_v40, 1 }
 0x2ee   :  { %v1849_v37 = vrot.slane %v1848_v38, 2  ;;  %v1845_v62 = vadd.f32 %v1844_v25, %v1843_v40 }
 0x2f0   :  { %v1850_v46 = vadd.f32 %v1849_v37, %v1848_v38  ;;  %v1853_v63 = vadd.f32 %v1845_v62, %v4085_v49 }
 0x2f2   :  { %v1851_v32 = vrot.slane %v1850_v46, 1  ;;  %1855 = vmax.xlane.f32.xlu0 %v1853_v63 }
 0x2f4   :  { %v1852_v10 = vadd.f32 %v1851_v32, %v1850_v46 }
 0x2f6   :  { %v1854_v8 = vadd.f32 %v1852_v10, %v4086_v6 }
 0x2f8   :  { %1857 = vmax.xlane.f32.xlu1 %v1854_v8 }
 0x34b   :  { %v410_v50 = vpop.xlane.xlu0 %409 }
 0x34c   :  { %v413_v15 = vsub.f32 %v3425_v26, %v410_v50 }
 0x34e   :  { %v415_v44 = vmul.f32 1.442695, %v413_v15  ;;  %v412_v35 = vpop.xlane.xlu1 %411 }
 0x34f   :  { %v414_v18 = vsub.f32 %v3442_v57, %v412_v35 }
 0x350   :  { %2178 = vpow2.f32 %v415_v44 }
 0x351   :  { %v417_v3 = vmul.f32 1.442695, %v414_v18 }
 0x353   :  { %2180 = vpow2.f32 %v417_v3 }
 0x355   :  { %v892_v16 = vpop.xlane.xlu2 %891 }
 0x356   :  { %v3480_v54 = vpop.eup %2178  ;;  %v895_v11 = vsub.f32 %v889_v30, %v892_v16 }
 0x357   :  { %419 = vadd.xlane.f32.xlu2 %v3480_v54 }
 0x358   :  { %v897_v31 = vmul.f32 1.442695, %v895_v11  ;;  %v894_v2 = vpop.xlane.xlu0 %893  ;;  %v1374_v17 = vpop.xlane.xlu1 %1373 }
 0x359   :  { %v3483_v45 = vpop.eup %2180  ;;  %v896_v26 = vsub.f32 %v890_v29, %v894_v2  ;;  %v1377_v36 = vsub.f32 %v1371_v59, %v1374_v17 }
 0x35a   :  { %2182 = vpow2.f32 %v897_v31  ;;  %421 = vadd.xlane.f32.xlu0 %v3483_v45 }
 0x35b   :  { %v899_v57 = vmul.f32 1.442695, %v896_v26  ;;  %v1379_v34 = vmul.f32 1.442695, %v1377_v36 }
 0x35d   :  { %v1376_v48 = vpop.xlane.xlu2 %1375  ;;  %2184 = vpow2.f32 %v899_v57 }
 0x35e   :  { %v1378_v4 = vsub.f32 %v1372_v41, %v1376_v48  ;;  %2186 = vpow2.f32 %v1379_v34 }
 0x360   :  { %v3486_v7 = vpop.eup %2182  ;;  %v1381_v30 = vmul.f32 1.442695, %v1378_v4 }
 0x361   :  { %901 = vadd.xlane.f32.xlu1 %v3486_v7 }
 0x362   :  { %2188 = vpow2.f32 %v1381_v30 }
 0x363   :  { %v3489_v12 = vpop.eup %2184 }
 0x364   :  { %v3491_v55 = vpop.eup %2186  ;;  %903 = vadd.xlane.f32.xlu2 %v3489_v12 }
 0x365   :  { %v1856_v23 = vpop.xlane.xlu0 %1855  ;;  %1383 = vadd.xlane.f32.xlu0 %v3491_v55 }
 0x366   :  { %v1859_v29 = vsub.f32 %v1853_v63, %v1856_v23 }
 0x368   :  { %v3495_v20 = vpop.eup %2188  ;;  %v1861_v59 = vmul.f32 1.442695, %v1859_v29 }
 0x369   :  { %1385 = vadd.xlane.f32.xlu1 %v3495_v20 }
 0x36a   :  { %2190 = vpow2.f32 %v1861_v59 }
 0x36b   :  { %v1858_v9 = vpop.xlane.xlu1 %1857 }
 0x36c   :  { %v1860_v42 = vsub.f32 %v1854_v8, %v1858_v9 }
 0x36e   :  { %v1863_v22 = vmul.f32 1.442695, %v1860_v42 }
 0x370   :  { %2192 = vpow2.f32 %v1863_v22  ;;  %v3498_v24 = vpop.eup %2190 }
 0x371   :  { %1865 = vadd.xlane.f32.xlu2 %v3498_v24 }
 0x376   :  { %v3501_v56 = vpop.eup %2192 }
 0x377   :  { %1867 = vadd.xlane.f32.xlu0 %v3501_v56 }
 0x3ca   :  { %v420_v41 = vpop.xlane.xlu2 %419 }
 0x3cb   :  { %2194 = vrcp.f32 %v420_v41  ;;  %v434_v38 = vand.u32 2147483648, %v420_v41  ;;  %v432_v46 = vand.u32 2147483647, %v420_v41  ;;  %vm428_vm1 = vweird.f32 %v420_v41 }
 0x3cd   :  { %v422_v1 = vpop.xlane.xlu0 %421  ;;  %v435_v6 = vor.u32 1.1754944e-38, %v434_v38  ;;  %vm433_vm4 = vcmp.eq.f32.partialorder %v432_v46, 8.507059e+37 }
 0x3ce   :  { %2196 = vrcp.f32 %v422_v1  ;;  %v448_v63 = vand.u32 2147483648, %v422_v1  ;;  %v446_v15 = vand.u32 2147483647, %v422_v1  ;;  %vm442_vm5 = vweird.f32 %v422_v1 }
 0x3d0   :  { %v449_v17 = vor.u32 1.1754944e-38, %v448_v63  ;;  %vm447_vm7 = vcmp.eq.f32.partialorder %v446_v15, 8.507059e+37 }
 0x3d1   :  { %v2195_v13 = vpop.eup %2194 }
 0x3d2   :  { %v424_v19 = vmul.f32 %v2195_v13, %v420_v41  ;;  %vm429_vm0 = vweird.f32 %v2195_v13 }
 0x3d3   :  { %vm430_vm2 = vmor %vm428_vm1, %vm429_vm0 }
 0x3d4   :  { %v2197_v27 = vpop.eup %2196  ;;  %v425_v40 = vsub.f32 1.0, %v424_v19  ;;  %v902_v25 = vpop.xlane.xlu1 %901 }
 0x3d5   :  { %2198 = vrcp.f32 %v902_v25  ;;  %v438_v37 = vmul.f32 %v2197_v27, %v422_v1  ;;  %vm443_vm3 = vweird.f32 %v2197_v27  ;;  %v916_v11 = vand.u32 2147483648, %v902_v25 }
 0x3d6   :  { %v426_v62 = vmul.f32 %v2195_v13, %v425_v40  ;;  %vm444_vm6 = vmor %vm442_vm5, %vm443_vm3  ;;  %v914_v26 = vand.u32 2147483647, %v902_v25  ;;  %vm910_vm8 = vweird.f32 %v902_v25 }
 0x3d7   :  { %v439_v49 = vsub.f32 1.0, %v438_v37  ;;  %v3504_v32 = vpop.xlane.xlu2 %903  ;;  %v917_v42 = vor.u32 1.1754944e-38, %v916_v11 }
 0x3d8   :  { %v427_v10 = vadd.f32 %v2195_v13, %v426_v62  ;;  %2200 = vrcp.f32 %v3504_v32  ;;  %v3507_v50 = vpop.xlane.xlu0 %1383  ;;  %v930_v23 = vand.u32 2147483648, %v3504_v32  ;;  %vm924_vm10 = vweird.f32 %v3504_v32 }
 0x3d9   :  { %v440_v8 = vmul.f32 %v2197_v27, %v439_v49  ;;  %2202 = vrcp.f32 %v3507_v50  ;;  %vm3521_vm11 = vcmp.eq.f32.partialorder %v914_v26, 8.507059e+37  ;;  %vm1392_vm12 = vweird.f32 %v3507_v50 }
 0x3da   :  { %v431_v44 = vsel %vm430_vm2, %v2195_v13, %v427_v10  ;;  %v931_v40 = vor.u32 1.1754944e-38, %v930_v23 }
 0x3db   :  { %v2199_v35 = vpop.eup %2198  ;;  %v436_v18 = vsel %vm433_vm4, %v435_v6, %v431_v44  ;;  %v441_v3 = vadd.f32 %v2197_v27, %v440_v8 }
 0x3dc   :  { %v906_v16 = vmul.f32 %v2199_v35, %v902_v25  ;;  %v451_v31 = vmul.f32 %v3480_v54, %v436_v18  ;;  %v3511_v2 = vpop.xlane.xlu1 %1385  ;;  %vm911_vm9 = vweird.f32 %v2199_v35  ;;  %v1396_v25 = vand.u32 2147483647, %v3507_v50 }
 0x3dd   :  { %2204 = vrcp.f32 %v3511_v2  ;;  %v445_v36 = vsel %vm444_vm6, %v2197_v27, %v441_v3  ;;  %vm912_vm13 = vmor %vm910_vm8, %vm911_vm9  ;;  %v928_v27 = vand.u32 2147483647, %v3504_v32  ;;  %vm1406_vm0 = vweird.f32 %v3511_v2 }
 0x3de   :  { %v907_v57 = vsub.f32 1.0, %v906_v16  ;;  %v453_v34 = vmul.f32 %v451_v31, %v2454_v51  ;;  %v454_v48 = vmul.f32 %v451_v31, %v2491_v5  ;;  %v450_v4 = vsel %vm447_vm7, %v449_v17, %v445_v36  ;;  %v2201_v30 = vpop.eup %2200 }
 0x3df   :  { %v452_v54 = vmul.f32 %v3483_v45, %v450_v4  ;;  %v2203_v29 = vpop.eup %2202  ;;  %v920_v9 = vmul.f32 %v2201_v30, %v3504_v32  ;;  %v1398_v45 = vand.u32 2147483648, %v3507_v50  ;;  %vm925_vm14 = vweird.f32 %v2201_v30  ;;  %v4089_v4 = vld [vmem:[#allocation13_spill] sm:$0xff] }
 0x3e0   :  { %v908_v59 = vmul.f32 %v2199_v35, %v907_v57  ;;  %457 = vadd.xlane.f32.xlu1 %v453_v34  ;;  %459 = vadd.xlane.f32.xlu2 %v454_v48  ;;  %v1388_v51 = vmul.f32 %v2203_v29, %v3507_v50  ;;  %vm1393_vm15 = vweird.f32 %v2203_v29  ;;  %v1412_v8 = vand.u32 2147483648, %v3511_v2  ;;  %vm926_vm1 = vmor %vm924_vm10, %vm925_vm14 }
 0x3e1   :  { %v455_v22 = vmul.f32 %v452_v54, %v4032_v53  ;;  %v921_v41 = vsub.f32 1.0, %v920_v9  ;;  %v456_v53 = vmul.f32 %v452_v54, %v2465_v39  ;;  %vm929_vm2 = vcmp.eq.f32.partialorder %v928_v27, 8.507059e+37  ;;  %vm1394_vm4 = vmor %vm1392_vm12, %vm1393_vm15 }
 0x3e2   :  { %v909_v1 = vadd.f32 %v2199_v35, %v908_v59  ;;  %v1389_v19 = vsub.f32 1.0, %v1388_v51  ;;  %vm1397_vm5 = vcmp.eq.f32.partialorder %v1396_v25, 8.507059e+37  ;;  %v1410_v17 = vand.u32 2147483647, %v3511_v2 }
 0x3e3   :  { %v2205_v13 = vpop.eup %2204  ;;  %461 = vadd.xlane.f32.xlu0 %v455_v22  ;;  %v922_v38 = vmul.f32 %v2201_v30, %v921_v41  ;;  %v1413_v48 = vor.u32 1.1754944e-38, %v1412_v8 }
 0x3e4   :  { %v1402_v37 = vmul.f32 %v2205_v13, %v3511_v2  ;;  %v913_v62 = vsel %vm912_vm13, %v2199_v35, %v909_v1  ;;  %v1390_v46 = vmul.f32 %v2203_v29, %v1389_v19  ;;  %v1866_v63 = vpop.xlane.xlu2 %1865  ;;  %vm1407_vm3 = vweird.f32 %v2205_v13 }
 0x3e5   :  { %v918_v49 = vsel %vm3521_vm11, %v917_v42, %v913_v62  ;;  %2206 = vrcp.f32 %v1866_v63  ;;  %v923_v15 = vadd.f32 %v2201_v30, %v922_v38  ;;  %vm1408_vm6 = vmor %vm1406_vm0, %vm1407_vm3  ;;  %vm1411_vm7 = vcmp.eq.f32.partialorder %v1410_v17, 8.507059e+37 }
 0x3e6   :  { %v1403_v10 = vsub.f32 1.0, %v1402_v37  ;;  %v933_v6 = vmul.f32 %v3486_v7, %v918_v49  ;;  %v1391_v39 = vadd.f32 %v2203_v29, %v1390_v46  ;;  %v1399_v7 = vor.u32 1.1754944e-38, %v1398_v45 }
 0x3e7   :  { %v927_v18 = vsel %vm926_vm1, %v2201_v30, %v923_v15  ;;  %v1878_v9 = vand.u32 2147483647, %v1866_v63  ;;  %vm1874_vm9 = vweird.f32 %v1866_v63 }
 0x3e8   :  { %v1404_v44 = vmul.f32 %v2205_v13, %v1403_v10  ;;  %v935_v35 = vmul.f32 %v933_v6, %v2448_v21  ;;  %463 = vadd.xlane.f32.xlu1 %v456_v53  ;;  %v936_v3 = vmul.f32 %v933_v6, %v2476_v28  ;;  %v1395_v16 = vsel %vm1394_vm4, %v2203_v29, %v1391_v39 }
 0x3e9   :  { %v932_v32 = vsel %vm929_vm2, %v931_v40, %v927_v18  ;;  %v1400_v26 = vsel %vm1397_vm5, %v1399_v7, %v1395_v16  ;;  %v1880_v29 = vand.u32 2147483648, %v1866_v63  ;;  %vm1879_vm11 = vcmp.eq.f32.partialorder %v1878_v9, 8.507059e+37 }
 0x3ea   :  { %939 = vadd.xlane.f32.xlu2 %v935_v35  ;;  %v1868_v11 = vpop.xlane.xlu0 %1867  ;;  %v1405_v31 = vadd.f32 %v2205_v13, %v1404_v44  ;;  %v934_v21 = vmul.f32 %v3489_v12, %v932_v32  ;;  %v1415_v28 = vmul.f32 %v3491_v55, %v1400_v26  ;;  %vm1998_vm5 = vcmask 130112  }
 0x3eb   :  { %941 = vadd.xlane.f32.xlu0 %v936_v3  ;;  %2208 = vrcp.f32 %v1868_v11  ;;  %v2207_v50 = vpop.eup %2206  ;;  %v1881_v22 = vor.u32 1.1754944e-38, %v1880_v29  ;;  %v1894_v41 = vand.u32 2147483648, %v1868_v11  ;;  %v1892_v45 = vand.u32 2147483647, %v1868_v11 }
 0x3ec   :  { %v1409_v36 = vsel %vm1408_vm6, %v2205_v13, %v1405_v31  ;;  %v1870_v57 = vmul.f32 %v2207_v50, %v1866_v63  ;;  %v937_v34 = vmul.f32 %v934_v21, %v2534_v60  ;;  %v938_v30 = vmul.f32 %v934_v21, %v4089_v4 }
 0x3ed   :  { %v1414_v54 = vsel %vm1411_vm7, %v1413_v48, %v1409_v36  ;;  %v1417_v12 = vmul.f32 %v1415_v28, %v2517_v47  ;;  %vm1875_vm8 = vweird.f32 %v2207_v50  ;;  %v1418_v5 = vmul.f32 %v1415_v28, %v2579_v43 }
 0x3ee   :  { %v1871_v23 = vsub.f32 1.0, %v1870_v57  ;;  %v1416_v55 = vmul.f32 %v3495_v20, %v1414_v54  ;;  %vm1876_vm10 = vmor %vm1874_vm9, %vm1875_vm8  ;;  %vm1888_vm13 = vweird.f32 %v1868_v11  ;;  %v1895_v43 = vor.u32 1.1754944e-38, %v1894_v41 }
 0x3ef   :  { %vm1893_vm15 = vcmp.eq.f32.partialorder %v1892_v45, 8.507059e+37 }
 0x3f0   :  { %943 = vadd.xlane.f32.xlu1 %v937_v34  ;;  %v1872_v2 = vmul.f32 %v2207_v50, %v1871_v23  ;;  %v1419_v13 = vmul.f32 %v1416_v55, %v2555_v0  ;;  %v1420_v40 = vmul.f32 %v1416_v55, %v2568_v61 }
 0x3f1   :  { %v2209_v59 = vpop.eup %2208 }
 0x3f2   :  { %945 = vadd.xlane.f32.xlu2 %v938_v30  ;;  %v1884_v42 = vmul.f32 %v2209_v59, %v1868_v11  ;;  %v1873_v60 = vadd.f32 %v2207_v50, %v1872_v2  ;;  %vm1889_vm12 = vweird.f32 %v2209_v59 }
 0x3f3   :  { %1421 = vadd.xlane.f32.xlu0 %v1417_v12  ;;  %vm1890_vm14 = vmor %vm1888_vm13, %vm1889_vm12 }
 0x3f4   :  { %v1885_v51 = vsub.f32 1.0, %v1884_v42  ;;  %v1877_v47 = vsel %vm1876_vm10, %v2207_v50, %v1873_v60 }
 0x3f5   :  { %v1882_v19 = vsel %vm1879_vm11, %v1881_v22, %v1877_v47 }
 0x3f6   :  { %v1886_v1 = vmul.f32 %v2209_v59, %v1885_v51  ;;  %v1897_v20 = vmul.f32 %v3498_v24, %v1882_v19 }
 0x3f8   :  { %1423 = vadd.xlane.f32.xlu1 %v1418_v5  ;;  %v1887_v27 = vadd.f32 %v2209_v59, %v1886_v1  ;;  %v1899_v62 = vmul.f32 %v1897_v20, %v2602_v14  ;;  %v1900_v53 = vmul.f32 %v1897_v20, %v2593_v52  ;;  %v1993_v1 = vlaneseq }
 0x3fa   :  { %1425 = vadd.xlane.f32.xlu2 %v1419_v13  ;;  %v1891_v38 = vsel %vm1890_vm14, %v2209_v59, %v1887_v27 }
 0x3fb   :  { %1427 = vadd.xlane.f32.xlu0 %v1420_v40  ;;  %v1896_v37 = vsel %vm1893_vm15, %v1895_v43, %v1891_v38  ;;  %vm2003_vm15 = vcmask 1041409  }
 0x3fc   :  { %v1898_v0 = vmul.f32 %v3501_v56, %v1896_v37 }
 0x3fe   :  { %v1901_v46 = vmul.f32 %v1898_v0, %v4082_v33  ;;  %v1902_v61 = vmul.f32 %v1898_v0, %v4083_v58 }
 0x400   :  { %1903 = vadd.xlane.f32.xlu1 %v1899_v62 }
 0x402   :  { %1905 = vadd.xlane.f32.xlu2 %v1900_v53  ;;  %v3616_v53 = vand.u32 127, %v1993_v1 }
 0x403   :  { %1907 = vadd.xlane.f32.xlu0 %v1901_v46 }
 0x408   :  { %1909 = vadd.xlane.f32.xlu1 %v1902_v61 }
 0x453   :  { %v3565_v24 = vpop.xlane.xlu1 %457  ;;  %v3567_v49 = vpop.xlane.xlu2 %459 }
 0x454   :  { %v465_v63 = vmul.f32 %v3565_v24, %v3565_v24  ;;  %v466_v14 = vmul.f32 %v3567_v49, %v3567_v49 }
 0x456   :  { %v469_v56 = vadd.f32 %v466_v14, %v465_v63  ;;  %v3573_v52 = vpop.xlane.xlu0 %461 }
 0x457   :  { %v467_v10 = vmul.f32 %v3573_v52, %v3573_v52 }
 0x458   :  { %v470_v33 = vrot.slane %v469_v56, 4 }
 0x45a   :  { %v471_v25 = vadd.f32 %v470_v33, %v469_v56 }
 0x45b   :  { %v3577_v58 = vpop.xlane.xlu1 %463 }
 0x45c   :  { %v472_v6 = vrot.slane %v471_v25, 2  ;;  %v468_v8 = vmul.f32 %v3577_v58, %v3577_v58 }
 0x45d   :  { %v3581_v15 = vpop.xlane.xlu2 %939 }
 0x45e   :  { %v473_v39 = vadd.f32 %v472_v6, %v471_v25  ;;  %v476_v44 = vadd.f32 %v468_v8, %v467_v10  ;;  %v3583_v35 = vpop.xlane.xlu0 %941  ;;  %v947_v7 = vmul.f32 %v3581_v15, %v3581_v15 }
 0x45f   :  { %v948_v18 = vmul.f32 %v3583_v35, %v3583_v35 }
 0x460   :  { %v474_v3 = vrot.slane %v473_v39, 1  ;;  %v477_v16 = vrot.slane %v476_v44, 4 }
 0x461   :  { %v951_v32 = vadd.f32 %v948_v18, %v947_v7 }
 0x462   :  { %v3589_v11 = vadd.f32 %v474_v3, %v473_v39  ;;  %v478_v31 = vadd.f32 %v477_v16, %v476_v44  ;;  %v1996_v16 = vadd.s32 4294967288, %v3616_v53 }
 0x463   :  { %v3591_v17 = vpop.xlane.xlu1 %943  ;;  %v952_v26 = vrot.slane %v951_v32, 4 }
 0x464   :  { %v483_v21 = vadd.f32 1e-12, %v3589_v11  ;;  %v507_v50 = vadd.f32 1.0, %v3589_v11  ;;  %v479_v36 = vrot.slane %v478_v31, 2  ;;  %v949_v57 = vmul.f32 %v3591_v17, %v3591_v17 }
 0x465   :  { %v3595_v28 = vpop.xlane.xlu2 %945  ;;  %v953_v34 = vadd.f32 %v952_v26, %v951_v32 }
 0x466   :  { %2210 = vrsqrt.f32 %v483_v21  ;;  %v480_v48 = vadd.f32 %v479_v36, %v478_v31  ;;  %v950_v4 = vmul.f32 %v3595_v28, %v3595_v28  ;;  %v518_v27 = vand.u32 2147483647, %v507_v50  ;;  %v3622_v14 = vpop.xlane.xlu0 %1421 }
 0x467   :  { %2212 = vrcp.f32 %v507_v50  ;;  %v954_v30 = vrot.slane %v953_v34, 2  ;;  %v520_v43 = vand.u32 2147483648, %v507_v50  ;;  %vm514_vm2 = vweird.f32 %v507_v50 }
 0x468   :  { %v481_v23 = vrot.slane %v480_v48, 1  ;;  %v958_v54 = vadd.f32 %v950_v4, %v949_v57  ;;  %vm491_vm3 = vweird.f32 %v483_v21  ;;  %vm519_vm7 = vcmp.eq.f32.partialorder %v518_v27, 8.507059e+37 }
 0x469   :  { %v955_v12 = vadd.f32 %v954_v30, %v953_v34  ;;  %v521_v39 = vor.u32 1.1754944e-38, %v520_v43  ;;  %v1429_v26 = vmul.f32 %v3622_v14, %v3622_v14 }
 0x46a   :  { %v3601_v29 = vadd.f32 %v481_v23, %v480_v48  ;;  %v959_v59 = vrot.slane %v958_v54, 4 }
 0x46b   :  { %v956_v9 = vrot.slane %v955_v12, 1  ;;  %v3630_v6 = vpop.xlane.xlu1 %1423 }
 0x46c   :  { %v2211_v2 = vpop.eup %2210  ;;  %v3604_v60 = vadd.f32 1e-12, %v3601_v29  ;;  %v3607_v51 = vadd.f32 1.0, %v3601_v29  ;;  %v960_v22 = vadd.f32 %v959_v59, %v958_v54  ;;  %v1430_v57 = vmul.f32 %v3630_v6, %v3630_v6 }
 0x46d   :  { %v2213_v42 = vpop.eup %2212  ;;  %v486_v55 = vmul.f32 %v2211_v2, %v483_v21  ;;  %v3611_v45 = vadd.f32 %v956_v9, %v955_v12  ;;  %vm492_vm1 = vweird.f32 %v2211_v2  ;;  %v3628_v10 = vpop.xlane.xlu2 %1425 }
 0x46e   :  { %v510_v5 = vmul.f32 %v2213_v42, %v507_v50  ;;  %2214 = vrsqrt.f32 %v3604_v60  ;;  %v961_v19 = vrot.slane %v960_v22, 2  ;;  %vm515_vm0 = vweird.f32 %v2213_v42  ;;  %vm493_vm6 = vmor %vm491_vm3, %vm492_vm1 }
 0x46f   :  { %v487_v41 = vmul.f32 %v2211_v2, %v486_v55  ;;  %2216 = vrcp.f32 %v3607_v51  ;;  %v3614_v62 = vadd.f32 1e-12, %v3611_v45  ;;  %vm3618_vm4 = vmor %vm514_vm2, %vm515_vm0  ;;  %v534_v36 = vand.u32 2147483648, %v3607_v51 }
 0x470   :  { %v511_v47 = vsub.f32 1.0, %v510_v5  ;;  %v962_v38 = vadd.f32 %v961_v19, %v960_v22  ;;  %v3644_v34 = vadd.f32 1.0, %v3611_v45  ;;  %vm501_vm10 = vweird.f32 %v3604_v60 }
 0x471   :  { %v488_v13 = vmul.f32 0.5, %v487_v41  ;;  %2218 = vrsqrt.f32 %v3614_v62  ;;  %vm528_vm11 = vweird.f32 %v3607_v51  ;;  %v532_v12 = vand.u32 2147483647, %v3607_v51 }
 0x472   :  { %v512_v20 = vmul.f32 %v2213_v42, %v511_v47  ;;  %v963_v63 = vrot.slane %v962_v38, 1  ;;  %2220 = vrcp.f32 %v3644_v34  ;;  %v535_v5 = vor.u32 1.1754944e-38, %v534_v36 }
 0x473   :  { %v489_v40 = vsub.f32 1.5, %v488_v13  ;;  %v3669_v41 = vpop.xlane.xlu1 %1903  ;;  %vm533_vm14 = vcmp.eq.f32.partialorder %v532_v12, 8.507059e+37  ;;  %vm973_vm1 = vweird.f32 %v3614_v62  ;;  %vm996_vm2 = vweird.f32 %v3644_v34 }
 0x474   :  { %v513_v37 = vadd.f32 %v2213_v42, %v512_v20  ;;  %v2215_v0 = vpop.eup %2214  ;;  %v3634_v3 = vadd.f32 %v963_v63, %v962_v38  ;;  %v1911_v43 = vmul.f32 %v3669_v41, %v3669_v41 }
 0x475   :  { %v490_v46 = vmul.f32 %v2211_v2, %v489_v40  ;;  %v2217_v56 = vpop.eup %2216  ;;  %v496_v25 = vmul.f32 %v2215_v0, %v3604_v60  ;;  %vm502_vm8 = vweird.f32 %v2215_v0  ;;  %v3667_v22 = vpop.xlane.xlu2 %1905 }
 0x476   :  { %v517_v33 = vsel %vm3618_vm4, %v2213_v42, %v513_v37  ;;  %v524_v44 = vmul.f32 %v2217_v56, %v3607_v51  ;;  %vm529_vm9 = vweird.f32 %v2217_v56  ;;  %v3649_v23 = vadd.f32 1e-12, %v3634_v3  ;;  %vm503_vm13 = vmor %vm501_vm10, %vm502_vm8 }
 0x477   :  { %v494_v8 = vsel %vm493_vm6, %v2211_v2, %v490_v46  ;;  %v497_v18 = vmul.f32 %v2215_v0, %v496_v25  ;;  %v522_v32 = vsel %vm519_vm7, %v521_v39, %v517_v33  ;;  %v3654_v59 = vpop.eup %2218  ;;  %vm3657_vm12 = vmor %vm528_vm11, %vm529_vm9  ;;  %v3673_v1 = vadd.f32 1.0, %v3634_v3 }
 0x478   :  { %v505_v7 = vmul.f32 %v494_v8, %v3589_v11  ;;  %v525_v31 = vsub.f32 1.0, %v524_v44  ;;  %2222 = vrsqrt.f32 %v3649_v23  ;;  %v968_v13 = vmul.f32 %v3654_v59, %v3614_v62  ;;  %v3681_v37 = vpop.eup %2220 }
 0x479   :  { %v498_v50 = vmul.f32 0.5, %v497_v18  ;;  %v1912_v40 = vmul.f32 %v3667_v22, %v3667_v22  ;;  %2224 = vrcp.f32 %v3673_v1  ;;  %v992_v39 = vmul.f32 %v3681_v37, %v3644_v34 }
 0x47a   :  { %v537_v21 = vmul.f32 %v522_v32, %v505_v7  ;;  %v526_v11 = vmul.f32 %v2217_v56, %v525_v31  ;;  %v969_v46 = vmul.f32 %v3654_v59, %v968_v13  ;;  %vm974_vm0 = vweird.f32 %v3654_v59 }
 0x47b   :  { %v499_v30 = vsub.f32 1.5, %v498_v50  ;;  %v1915_v8 = vadd.f32 %v1912_v40, %v1911_v43  ;;  %vm3736_vm3 = vmor %vm973_vm1, %vm974_vm0  ;;  %vm997_vm4 = vweird.f32 %v3681_v37  ;;  %vm983_vm6 = vweird.f32 %v3649_v23 }
 0x47c   :  { %v539_v48 = vmul.f32 %v537_v21, %v3565_v24  ;;  %v540_v4 = vmul.f32 %v537_v21, %v3567_v49  ;;  %v527_v54 = vadd.f32 %v2217_v56, %v526_v11  ;;  %v1433_v49 = vadd.f32 %v1430_v57, %v1429_v26  ;;  %vm3762_vm8 = vmor %vm996_vm2, %vm997_vm4 }
 0x47d   :  { %v500_v42 = vmul.f32 %v2215_v0, %v499_v30  ;;  %v970_v7 = vmul.f32 0.5, %v969_v46  ;;  %v1916_v26 = vrot.slane %v1915_v8, 4  ;;  %v993_v21 = vsub.f32 1.0, %v992_v39 }
 0x47e   :  { %v1995_v2 = vperm.slane %v539_v48, %v3616_v53  ;;  %v1997_v9 = vperm.slane %v540_v4, %v1996_v16  ;;  %v531_v55 = vsel %vm3657_vm12, %v2217_v56, %v527_v54  ;;  %v1434_v20 = vrot.slane %v1433_v49, 4  ;;  %v3687_v61 = vpop.eup %2222  ;;  %v3689_v56 = vpop.xlane.xlu0 %1427 }
 0x47f   :  { %v504_v51 = vsel %vm503_vm13, %v2215_v0, %v500_v42  ;;  %v536_v19 = vsel %vm533_vm14, %v535_v5, %v531_v55  ;;  %v978_v44 = vmul.f32 %v3687_v61, %v3649_v23  ;;  %v3700_v31 = vpop.eup %2224  ;;  %v971_v36 = vsub.f32 1.5, %v970_v7  ;;  %v3710_v4 = vpop.xlane.xlu1 %1909 }
 0x480   :  { %v1999_v60 = vsel %vm1998_vm5, %v1997_v9, %v1995_v2  ;;  %v506_v47 = vmul.f32 %v504_v51, %v3601_v29  ;;  %v1435_v38 = vadd.f32 %v1434_v20, %v1433_v49  ;;  %v1917_v57 = vadd.f32 %v1916_v26, %v1915_v8 }
 0x481   :  { %v979_v50 = vmul.f32 %v3687_v61, %v978_v44  ;;  %v1006_v11 = vmul.f32 %v3700_v31, %v3673_v1  ;;  %v1431_v30 = vmul.f32 %v3628_v10, %v3628_v10  ;;  %v1432_v2 = vmul.f32 %v3689_v56, %v3689_v56 }
 0x482   :  { %v538_v27 = vmul.f32 %v536_v19, %v506_v47  ;;  %v1436_v63 = vrot.slane %v1435_v38, 2  ;;  %v1918_v12 = vrot.slane %v1917_v57, 2  ;;  %v994_v9 = vmul.f32 %v3681_v37, %v993_v21 }
 0x483   :  { %v1000_v42 = vand.u32 2147483647, %v3644_v34  ;;  %v980_v49 = vmul.f32 0.5, %v979_v50  ;;  %v972_v55 = vmul.f32 %v3654_v59, %v971_v36  ;;  %v1007_v51 = vsub.f32 1.0, %v1006_v11 }
 0x484   :  { %v541_v29 = vmul.f32 %v538_v27, %v3573_v52  ;;  %v542_v0 = vmul.f32 %v538_v27, %v3577_v58  ;;  %v1437_v52 = vadd.f32 %v1436_v63, %v1435_v38  ;;  %v1002_v5 = vand.u32 2147483648, %v3644_v34 }
 0x485   :  { %v1919_v47 = vadd.f32 %v1918_v12, %v1917_v57  ;;  %v1440_v13 = vadd.f32 %v1432_v2, %v1431_v30  ;;  %v995_v27 = vadd.f32 %v3681_v37, %v994_v9  ;;  %v981_v38 = vsub.f32 1.5, %v980_v49 }
 0x486   :  { %v2000_v33 = vperm.slane %v541_v29, %v3616_v53  ;;  %v2001_v25 = vperm.slane %v542_v0, %v1996_v16  ;;  %v1438_v32 = vrot.slane %v1437_v52, 1  ;;  %v3723_v24 = vpop.xlane.xlu0 %1907  ;;  %v976_v62 = vsel %vm3736_vm3, %v3654_v59, %v972_v55 }
 0x487   :  { %v1913_v19 = vmul.f32 %v3723_v24, %v3723_v24  ;;  %v1920_v40 = vrot.slane %v1919_v47, 1  ;;  %v1441_v43 = vrot.slane %v1440_v13, 4  ;;  %v1008_v63 = vmul.f32 %v3700_v31, %v1007_v51 }
 0x488   :  { %v2002_v58 = vsel %vm1998_vm5, %v2001_v25, %v2000_v33  ;;  %v3702_v16 = vadd.f32 %v1438_v32, %v1437_v52  ;;  %vm3745_vm5 = vcmp.eq.f32.partialorder %v1000_v42, 8.507059e+37  ;;  %v1003_v33 = vor.u32 1.1754944e-38, %v1002_v5 }
 0x489   :  { %v3698_v18 = vsel %vm2003_vm15, %v2002_v58, %v1999_v60  ;;  %v1914_v60 = vmul.f32 %v3710_v4, %v3710_v4  ;;  %v3752_v25 = vadd.f32 %v1920_v40, %v1919_v47  ;;  %v1442_v8 = vadd.f32 %v1441_v43, %v1440_v13 }
 0x48a   :  { %v3708_v48 = vadd.f32 1e-12, %v3702_v16  ;;  %v3715_v54 = vadd.f32 1.0, %v3702_v16  ;;  %vm984_vm7 = vweird.f32 %v3687_v61  ;;  %v987_v44 = vmul.f32 %v976_v62, %v3611_v45 }
 0x48b   :  { %v1922_v0 = vadd.f32 %v1914_v60, %v1913_v19  ;;  %v999_v7 = vsel %vm3762_vm8, %v3681_v37, %v995_v27  ;;  %v3773_v32 = vadd.f32 1e-12, %v3752_v25  ;;  %v3776_v26 = vadd.f32 1.0, %v3752_v25  ;;  %vm3792_vm10 = vmor %vm983_vm6, %vm984_vm7 }
 0x48c   :  { %2226 = vrsqrt.f32 %v3708_v48  ;;  %v982_v34 = vmul.f32 %v3687_v61, %v981_v38  ;;  %v1443_v50 = vrot.slane %v1442_v8, 2  ;;  %v1009_v57 = vadd.f32 %v3700_v31, %v1008_v63 }
 0x48d   :  { %2228 = vrcp.f32 %v3715_v54  ;;  %v1923_v58 = vrot.slane %v1922_v0, 4  ;;  %vm1011_vm9 = vweird.f32 %v3700_v31  ;;  %v1014_v37 = vand.u32 2147483647, %v3673_v1 }
 0x48e   :  { %2230 = vrsqrt.f32 %v3773_v32  ;;  %v1016_v11 = vand.u32 2147483648, %v3673_v1  ;;  %vm1010_vm11 = vweird.f32 %v3673_v1  ;;  %v1004_v2 = vsel %vm3745_vm5, %v1003_v33, %v999_v7 }
 0x48f   :  { %v1924_v36 = vadd.f32 %v1923_v58, %v1922_v0  ;;  %2232 = vrcp.f32 %v3776_v26  ;;  %v1444_v9 = vadd.f32 %v1443_v50, %v1442_v8  ;;  %v3800_v49 = vadd.s32 4294967280, %v3616_v53  ;;  %vm3805_vm12 = vmor %vm1010_vm11, %vm1011_vm9 }
 0x490   :  { %v986_v55 = vsel %vm3792_vm10, %v3687_v61, %v982_v34  ;;  %v3810_v60 = vadd.s32 4294967272, %v3616_v53  ;;  %v1019_v1 = vmul.f32 %v1004_v2, %v987_v44  ;;  %v1013_v51 = vsel %vm3805_vm12, %v3700_v31, %v1009_v57 }
 0x491   :  { %v1925_v42 = vrot.slane %v1924_v36, 2  ;;  %v1445_v47 = vrot.slane %v1444_v9, 1  ;;  %vm1015_vm13 = vcmp.eq.f32.partialorder %v1014_v37, 8.507059e+37  ;;  %v1017_v19 = vor.u32 1.1754944e-38, %v1016_v11 }
 0x492   :  { %v3749_v46 = vpop.eup %2226  ;;  %v3816_v20 = vadd.s32 4294967264, %v3616_v53  ;;  %v988_v40 = vmul.f32 %v986_v55, %v3634_v3  ;;  %v3822_v43 = vadd.s32 4294967248, %v3616_v53  ;;  %v3829_v0 = vmul.f32 %v1019_v1, %v3581_v15 }
 0x493   :  { %v3754_v39 = vpop.eup %2228  ;;  %v1450_v52 = vmul.f32 %v3749_v46, %v3708_v48  ;;  %v1926_v13 = vadd.f32 %v1925_v42, %v1924_v36  ;;  %v3824_v38 = vadd.f32 %v1445_v47, %v1444_v9  ;;  %v1018_v29 = vsel %vm1015_vm13, %v1017_v19, %v1013_v51 }
 0x494   :  { %v1474_v45 = vmul.f32 %v3754_v39, %v3715_v54  ;;  %v3818_v27 = vpop.eup %2230  ;;  %v3832_v63 = vadd.s32 4294967240, %v3616_v53  ;;  %vm1456_vm14 = vweird.f32 %v3749_v46  ;;  %v1020_v7 = vmul.f32 %v1018_v29, %v988_v40 }
 0x495   :  { %v1451_v21 = vmul.f32 %v3749_v46, %v1450_v52  ;;  %v1927_v62 = vrot.slane %v1926_v13, 1  ;;  %v3826_v31 = vpop.eup %2232  ;;  %v1932_v33 = vmul.f32 %v3818_v27, %v3773_v32  ;;  %v3841_v59 = vadd.f32 1e-12, %v3824_v38 }
 0x496   :  { %v1475_v5 = vsub.f32 1.0, %v1474_v45  ;;  %v1956_v8 = vmul.f32 %v3826_v31, %v3776_v26  ;;  %v3846_v58 = vadd.f32 1.0, %v3824_v38  ;;  %v3851_v34 = vmul.f32 %v1019_v1, %v3583_v35 }
 0x497   :  { %v1452_v30 = vmul.f32 0.5, %v1451_v21  ;;  %v1933_v15 = vmul.f32 %v3818_v27, %v1932_v33  ;;  %v3848_v44 = vadd.f32 %v1927_v62, %v1926_v13  ;;  %v3854_v21 = vadd.s32 4294967256, %v3616_v53 }
 0x498   :  { %v1476_v3 = vmul.f32 %v3754_v39, %v1475_v5  ;;  %2234 = vrsqrt.f32 %v3841_v59  ;;  %v2011_v50 = vperm.slane %v3829_v0, %v3800_v49  ;;  %vm1455_vm0 = vweird.f32 %v3708_v48 }
 0x499   :  { %v1453_v61 = vsub.f32 1.5, %v1452_v30  ;;  %v1934_v36 = vmul.f32 0.5, %v1933_v15  ;;  %2236 = vrcp.f32 %v3846_v58  ;;  %vm3863_vm1 = vmor %vm1455_vm0, %vm1456_vm14  ;;  %vm1479_vm2 = vweird.f32 %v3754_v39 }
 0x49a   :  { %v1477_v35 = vadd.f32 %v3754_v39, %v1476_v3  ;;  %v1482_v53 = vand.u32 2147483647, %v3715_v54  ;;  %v1957_v45 = vsub.f32 1.0, %v1956_v8  ;;  %v1484_v37 = vand.u32 2147483648, %v3715_v54 }
 0x49b   :  { %v1454_v52 = vmul.f32 %v3749_v46, %v1453_v61  ;;  %v3875_v11 = vadd.f32 1e-12, %v3848_v44  ;;  %v3878_v30 = vadd.f32 1.0, %v3848_v44  ;;  %v3881_v12 = vmul.f32 %v1020_v7, %v3591_v17 }
 0x49c   :  { %v2013_v2 = vperm.slane %v3851_v34, %v3810_v60  ;;  %vm1478_vm3 = vweird.f32 %v3715_v54  ;;  %v1935_v9 = vsub.f32 1.5, %v1934_v36  ;;  %v3887_v42 = vmul.f32 %v1020_v7, %v3595_v28 }
 0x49d   :  { %v1458_v48 = vsel %vm3863_vm1, %v3749_v46, %v1454_v52  ;;  %vm3889_vm4 = vmor %vm1478_vm3, %vm1479_vm2  ;;  %v1964_v55 = vand.u32 2147483647, %v3776_v26  ;;  %v1966_v23 = vand.u32 2147483648, %v3776_v26  ;;  %2238 = vrsqrt.f32 %v3875_v11 }
 0x49e   :  { %v2235_v17 = vpop.eup %2234  ;;  %v1469_v1 = vmul.f32 %v1458_v48, %v3702_v16  ;;  %v1481_v54 = vsel %vm3889_vm4, %v3754_v39, %v1477_v35  ;;  %v1958_v28 = vmul.f32 %v3826_v31, %v1957_v45  ;;  %2240 = vrcp.f32 %v3878_v30 }
 0x49f   :  { %v2237_v51 = vpop.eup %2236  ;;  %vm1483_vm5 = vcmp.eq.f32.partialorder %v1482_v53, 8.507059e+37  ;;  %v1485_v5 = vor.u32 1.1754944e-38, %v1484_v37  ;;  %vm1937_vm6 = vweird.f32 %v3773_v32  ;;  %v1460_v47 = vmul.f32 %v2235_v17, %v3841_v59 }
 0x4a0   :  { %v1936_v13 = vmul.f32 %v3818_v27, %v1935_v9  ;;  %vm1938_vm7 = vweird.f32 %v3818_v27  ;;  %vm1960_vm8 = vweird.f32 %v3776_v26  ;;  %v1488_v16 = vmul.f32 %v2237_v51, %v3846_v58 }
 0x4a1   :  { %v1486_v39 = vsel %vm1483_vm5, %v1485_v5, %v1481_v54  ;;  %vm3908_vm9 = vcmp.eq.f32.partialorder %v1964_v55, 8.507059e+37  ;;  %v1967_v61 = vor.u32 1.1754944e-38, %v1966_v23  ;;  %v1461_v40 = vmul.f32 %v2235_v17, %v1460_v47  ;;  %vm3916_vm11 = vmor %vm1937_vm6, %vm1938_vm7 }
 0x4a2   :  { %v1501_v62 = vmul.f32 %v1486_v39, %v1469_v1  ;;  %v1959_v29 = vadd.f32 %v3826_v31, %v1958_v28  ;;  %vm1961_vm10 = vweird.f32 %v3826_v31  ;;  %v1489_v33 = vsub.f32 1.0, %v1488_v16 }
 0x4a3   :  { %v2239_v3 = vpop.eup %2238  ;;  %v1462_v52 = vmul.f32 0.5, %v1461_v40  ;;  %vm1465_vm12 = vweird.f32 %v3841_v59  ;;  %v1496_v15 = vand.u32 2147483647, %v3846_v58  ;;  %v1498_v7 = vand.u32 2147483648, %v3846_v58  ;;  %vm3929_vm14 = vmor %vm1960_vm8, %vm1961_vm10 }
 0x4a4   :  { %v2241_v36 = vpop.eup %2240  ;;  %v1940_v57 = vsel %vm3916_vm11, %v3818_v27, %v1936_v13  ;;  %v1490_v35 = vmul.f32 %v2237_v51, %v1489_v33  ;;  %vm1493_vm13 = vweird.f32 %v2237_v51  ;;  %v1942_v32 = vmul.f32 %v2239_v3, %v3875_v11 }
 0x4a5   :  { %v1463_v45 = vsub.f32 1.5, %v1462_v52  ;;  %vm1466_vm0 = vweird.f32 %v2235_v17  ;;  %vm1492_vm1 = vweird.f32 %v3846_v58  ;;  %v1970_v48 = vmul.f32 %v2241_v36, %v3878_v30 }
 0x4a6   :  { %vm2014_vm2 = vcmask 261312   ;;  %v1503_v37 = vmul.f32 %v1501_v62, %v3622_v14  ;;  %v1963_v27 = vsel %vm3929_vm14, %v3826_v31, %v1959_v29  ;;  %v1491_v9 = vadd.f32 %v2237_v51, %v1490_v35  ;;  %vm3940_vm3 = vmor %vm1492_vm1, %vm1493_vm13 }
 0x4a7   :  { %v1943_v46 = vmul.f32 %v2239_v3, %v1942_v32  ;;  %v1951_v26 = vmul.f32 %v1940_v57, %v3752_v25  ;;  %v1464_v55 = vmul.f32 %v2235_v17, %v1463_v45  ;;  %vm3944_vm4 = vcmp.eq.f32.partialorder %v1496_v15, 8.507059e+37  ;;  %vm1467_vm5 = vmor %vm1465_vm12, %vm1466_vm0 }
 0x4a8   :  { %v1971_v1 = vsub.f32 1.0, %v1970_v48  ;;  %v1495_v14 = vsel %vm3940_vm3, %v2237_v51, %v1491_v9  ;;  %v1499_v31 = vor.u32 1.1754944e-38, %v1498_v7  ;;  %vm1974_vm6 = vweird.f32 %v3878_v30 }
 0x4a9   :  { %v1944_v54 = vmul.f32 0.5, %v1943_v46  ;;  %v1968_v25 = vsel %vm3908_vm9, %v1967_v61, %v1963_v27  ;;  %v1468_v28 = vsel %vm1467_vm5, %v2235_v17, %v1464_v55  ;;  %vm1975_vm7 = vweird.f32 %v2241_v36 }
 0x4aa   :  { %v1972_v5 = vmul.f32 %v2241_v36, %v1971_v1  ;;  %v1470_v47 = vmul.f32 %v1468_v28, %v3824_v38  ;;  %vm1948_vm8 = vweird.f32 %v2239_v3  ;;  %v1980_v59 = vand.u32 2147483648, %v3878_v30  ;;  %vm3964_vm10 = vmor %vm1974_vm6, %vm1975_vm7 }
 0x4ab   :  { %v1945_v13 = vsub.f32 1.5, %v1944_v54  ;;  %v1983_v16 = vmul.f32 %v1968_v25, %v1951_v26  ;;  %v1500_v51 = vsel %vm3944_vm4, %v1499_v31, %v1495_v14  ;;  %v1978_v40 = vand.u32 2147483647, %v3878_v30 }
 0x4ac   :  { %v1973_v39 = vadd.f32 %v2241_v36, %v1972_v5  ;;  %v1504_v29 = vmul.f32 %v1501_v62, %v3630_v6  ;;  %v1502_v19 = vmul.f32 %v1500_v51, %v1470_v47  ;;  %vm1947_vm9 = vweird.f32 %v3875_v11 }
 0x4ad   :  { %v1946_v61 = vmul.f32 %v2239_v3, %v1945_v13  ;;  %v2016_v17 = vperm.slane %v3881_v12, %v3800_v49  ;;  %v2017_v33 = vperm.slane %v3887_v42, %v3810_v60  ;;  %v2026_v8 = vperm.slane %v1503_v37, %v3816_v20  ;;  %vm1949_vm11 = vmor %vm1947_vm9, %vm1948_vm8 }
 0x4ae   :  { %v1977_v6 = vsel %vm3964_vm10, %v2241_v36, %v1973_v39  ;;  %v1505_v11 = vmul.f32 %v1502_v19, %v3628_v10  ;;  %v1506_v30 = vmul.f32 %v1502_v19, %v3689_v56  ;;  %v1981_v52 = vor.u32 1.1754944e-38, %v1980_v59 }
 0x4af   :  { %v1950_v62 = vsel %vm1949_vm11, %v2239_v3, %v1946_v61  ;;  %v1985_v15 = vmul.f32 %v1983_v16, %v3669_v41  ;;  %v1986_v7 = vmul.f32 %v1983_v16, %v3667_v22  ;;  %vm1979_vm12 = vcmp.eq.f32.partialorder %v1978_v40, 8.507059e+37 }
 0x4b0   :  { %v1952_v12 = vmul.f32 %v1950_v62, %v3848_v44  ;;  %v2028_v42 = vperm.slane %v1504_v29, %v3854_v21  ;;  %v2031_v57 = vperm.slane %v1505_v11, %v3816_v20  ;;  %v2032_v35 = vperm.slane %v1506_v30, %v3854_v21 }
 0x4b1   :  { %v1982_v36 = vsel %vm1979_vm12, %v1981_v52, %v1977_v6  ;;  %v2018_v10 = vsel %vm2014_vm2, %v2017_v33, %v2016_v17  ;;  %v2015_v22 = vsel %vm2014_vm2, %v2013_v2, %v2011_v50  ;;  %vm2029_vm13 = vcmask 392512  }
 0x4b2   :  { %v1984_v41 = vmul.f32 %v1982_v36, %v1952_v12  ;;  %v2033_v56 = vsel %vm2029_vm13, %v2032_v35, %v2031_v57  ;;  %v2041_v44 = vperm.slane %v1985_v15, %v3822_v43  ;;  %v2043_v20 = vperm.slane %v1986_v7, %v3832_v63 }
 0x4b3   :  { %v2019_v32 = vsel %vm2003_vm15, %v2018_v10, %v2015_v22  ;;  %vm2044_vm14 = vcmask 523712   ;;  %v2030_v49 = vsel %vm2029_vm13, %v2028_v42, %v2026_v8  ;;  %vm2051_vm0 = vcmask 130048  }
 0x4b4   :  { %v1987_v21 = vmul.f32 %v1984_v41, %v3723_v24  ;;  %v1988_v3 = vmul.f32 %v1984_v41, %v3710_v4  ;;  %v2034_v34 = vsel %vm2003_vm15, %v2033_v56, %v2030_v49  ;;  %vm2053_vm1 = vcmask 261120  }
 0x4b5   :  { %vm2055_vm2 = vcmask 392192   ;;  %v2045_v4 = vsel %vm2044_vm14, %v2043_v20, %v2041_v44  ;;  %v2052_v50 = vsel %vm2051_vm0, %v3698_v18, %v2019_v32  ;;  %vm2057_vm3 = vcmask 517120  }
 0x4b6   :  { %v2046_v60 = vperm.slane %v1987_v21, %v3822_v43  ;;  %v2047_v0 = vperm.slane %v1988_v3, %v3832_v63  ;;  %v2054_v43 = vsel %vm2053_vm1, %v2052_v50, %v2034_v34 }
 0x4b8   :  { %v2048_v24 = vsel %vm2044_vm14, %v2047_v0, %v2046_v60 }
 0x4b9   :  { %v2049_v2 = vsel %vm2003_vm15, %v2048_v24, %v2045_v4 }
 0x4ba   :  { %v2056_v63 = vsel %vm2055_vm2, %v2054_v43, %v2049_v2 }
 0x4bb   :  { %2058 = vst.msk [vmem:[#allocation7] sm:$0x3] %vm2057_vm3, %v2056_v63 }
 0x4bc   :  { %2069 = dma.vmem_to_hbm [thread:$0]  %s2065_s1, 32, %s2067_s23, [#allocation4]  }
 0x4bd   :  { %2318 = dma.done.wait [#allocation4], 32  }
 0x4be   :  { %2319 = vsyncadd [#allocation4], 4294967264 }
 0x4bf   :  { %2074 = vsyncpa [#allocation3], 1 }
 0x4c0   :  { %2075 = vsyncpa [#allocation6], 1 }
 0x4c1   :  { %2076 = vsyncpa [#allocation4], 1 }

</bundles_post_ra>
